<compile_context>
chip_gen: v7x
topology: tpu7x:2x2x1
jax: 0.10.0
libtpu: 0.0.40
codegen_flags: <defaults>
</compile_context>

<pallas_src>
import functools

import jax
import jax.numpy as jnp
from jax.experimental import pallas as pl
from jax.experimental.pallas import tpu as pltpu


def attn_net_kernel(x_ref, w1_ref, b1_ref, w2_ref, b2_ref, a_ref):
    # First projection on the MXU: bf16 operands, f32 accumulation.
    x = x_ref[...].astype(jnp.bfloat16)
    h = jnp.dot(x, w1_ref[...], preferred_element_type=jnp.float32)
    # Bias-add + tanh in f32 (EUP tanh).
    h = jnp.tanh(h + b1_ref[...])
    # Second projection: bf16 operands, f32 accumulation, lane-dense padded output.
    a = jnp.dot(h.astype(jnp.bfloat16), w2_ref[...],
                preferred_element_type=jnp.float32)
    # NOTE: if bundle analysis shows the EUP tanh phase serialized against MXU work,
    # sub-chunk the row tile with a short unrolled lax.fori_loop to overlap them.
    a_ref[...] = (a + b2_ref[...]).astype(a_ref.dtype)


@functools.partial(jax.jit, static_argnames=("tm",))
def attn_net_forward(x, w1, b1, w2, b2, tm=None):
    """Pallas version of Attn_Net.forward. Returns (A, x) like the PyTorch module."""
    N, L = x.shape
    D = w1.shape[1]
    C = w2.shape[1]

    # Row-tile selection: large enough to amortize the ~0.35 us per-grid-step overhead,
    # small enough for scoped VMEM, and >= 2 tiles for medium N so the "parallel" grid
    # axis can shard across both v7x TensorCores (no-op on single-TC v5e/v6e).
    if tm is None:
        tm = 2048 if x.dtype == jnp.bfloat16 else 1024
    half = pl.cdiv(pl.cdiv(N, 2), 256) * 256       # ~N/2, rounded up to 256
    tm = max(256, min(tm, half))
    tm = max(8, min(tm, pl.cdiv(N, 8) * 8))        # never (much) larger than the problem
    n_tiles = pl.cdiv(N, tm)                       # ragged last tile handled by Pallas

    # Lane-dense output: pad n_classes up to a full 128-lane block with zero columns.
    c_pad = pl.cdiv(C, 128) * 128
    w2_p = w2 if c_pad == C else jnp.pad(w2, ((0, 0), (0, c_pad - C)))
    b2_p = b2 if c_pad == C else jnp.pad(b2, (0, c_pad - C))

    # Weights in bf16 for the native MXU path (tiny, VMEM-resident); biases stay f32.
    w1_b = w1.astype(jnp.bfloat16)
    w2_b = w2_p.astype(jnp.bfloat16)
    b1_2d = b1.astype(jnp.float32).reshape(1, D)
    b2_2d = b2_p.astype(jnp.float32).reshape(1, c_pad)

    a_p = pl.pallas_call(
        attn_net_kernel,
        out_shape=jax.ShapeDtypeStruct((N, c_pad), x.dtype),
        grid_spec=pl.GridSpec(
            grid=(n_tiles,),
            in_specs=[
                pl.BlockSpec((tm, L), lambda i: (i, 0)),      # x row tile (streamed)
                pl.BlockSpec((L, D), lambda i: (0, 0)),       # W1 bf16 (VMEM-resident)
                pl.BlockSpec((1, D), lambda i: (0, 0)),       # b1 f32
                pl.BlockSpec((D, c_pad), lambda i: (0, 0)),   # W2 bf16, zero-padded lanes
                pl.BlockSpec((1, c_pad), lambda i: (0, 0)),   # b2 f32, zero-padded lanes
            ],
            out_specs=pl.BlockSpec((tm, c_pad), lambda i: (i, 0)),
        ),
        compiler_params=pltpu.CompilerParams(
            dimension_semantics=("parallel",),
            vmem_limit_bytes=32 * 1024 * 1024,
        ),
    )(x, w1_b, b1_2d, w2_b, b2_2d)

    # Slice back to (N, n_classes); inside the same jit so it fuses with the program.
    a = a_p[:, :C]
    return a, x  # Attn_Net.forward returns (module(x), x)


def init_attn_net_params(key, L, D, n_classes, dtype=jnp.float32):
    """Deterministic synthetic parameters (shapes follow nn.Linear in __init__)."""
    k1, k2, k3, k4 = jax.random.split(key, 4)
    bound1 = 1.0 / jnp.sqrt(L)
    bound2 = 1.0 / jnp.sqrt(D)
    w1 = jax.random.uniform(k1, (L, D), dtype, -bound1, bound1)
    b1 = jax.random.uniform(k2, (D,), dtype, -bound1, bound1)
    w2 = jax.random.uniform(k3, (D, n_classes), dtype, -bound2, bound2)
    b2 = jax.random.uniform(k4, (n_classes,), dtype, -bound2, bound2)
    return w1, b1, w2, b2


if __name__ == "__main__":
    # Module-default feature dims (L=1024, D=256, n_classes=1); N deliberately NOT a
    # multiple of the row tile to exercise the ragged (un-padded) last tile and a
    # 2-tile grid for the parallel axis.
    N, L, D, n_classes = 777, 1024, 256, 1

    key = jax.random.PRNGKey(0)
    kx, kp = jax.random.split(key)
    x = jax.random.normal(kx, (N, L), dtype=jnp.float32)
    w1, b1, w2, b2 = init_attn_net_params(kp, L, D, n_classes)

    # TODO(synk): train-mode Dropout(0.25) (dropout=True) not implemented; would need
    # pltpu.prng_seed/prng_random_bits masking. Default dropout=False path only.

    a, x_out = attn_net_forward(x, w1, b1, w2, b2)
    jax.block_until_ready((a, x_out))

    assert a.shape == (N, n_classes)
    assert x_out.shape == (N, L)
    assert jnp.array_equal(x_out, x)

    # Reference using the same bf16-operand / f32-accumulate recipe -> tight tolerance.
    xb = x.astype(jnp.bfloat16)
    w1b = w1.astype(jnp.bfloat16)
    w2b = w2.astype(jnp.bfloat16)
    h_ref = jnp.tanh(jnp.dot(xb, w1b, preferred_element_type=jnp.float32) + b1)
    a_ref_bf16 = jnp.dot(h_ref.astype(jnp.bfloat16), w2b,
                         preferred_element_type=jnp.float32) + b2
    assert jnp.allclose(a, a_ref_bf16, atol=5e-3, rtol=5e-3), float(
        jnp.max(jnp.abs(a - a_ref_bf16)))

    # Sanity check against the pure-f32 reference (loose bf16-matmul tolerance).
    a_ref_f32 = jnp.tanh(x @ w1 + b1) @ w2 + b2
    assert jnp.allclose(a, a_ref_f32, atol=5e-2, rtol=5e-2), float(
        jnp.max(jnp.abs(a - a_ref_f32)))

    print("KERNEL_OK")
</pallas_src>

<mosaic_0001>
module attributes {stable_mosaic.version = 11 : i64} {
  func.func @attn_net_kernel(%arg0: i32, %arg1: memref<512x1024xf32, #tpu.memory_space<vmem>>, %arg2: memref<1024x256xbf16, #tpu.memory_space<vmem>>, %arg3: memref<1x256xf32, #tpu.memory_space<vmem>>, %arg4: memref<256x128xbf16, #tpu.memory_space<vmem>>, %arg5: memref<1x128xf32, #tpu.memory_space<vmem>>, %arg6: memref<512x128xf32, #tpu.memory_space<vmem>>) attributes {dimension_semantics = [#tpu.dimension_semantics<parallel>], iteration_bounds = array<i64: 2>, scalar_prefetch = 0 : i64, scratch_operands = 0 : i64, tpu.core_type = #tpu.core_type<tc>, window_params = [{transform_indices = @transform_0, window_bounds = array<i64: 512, 1024>}, {pipeline_mode = #tpu.pipeline_mode<synchronous>, transform_indices = @transform_1, window_bounds = array<i64: 1024, 256>}, {pipeline_mode = #tpu.pipeline_mode<synchronous>, transform_indices = @transform_2, window_bounds = array<i64: 1, 256>}, {pipeline_mode = #tpu.pipeline_mode<synchronous>, transform_indices = @transform_3, window_bounds = array<i64: 256, 128>}, {pipeline_mode = #tpu.pipeline_mode<synchronous>, transform_indices = @transform_4, window_bounds = array<i64: 1, 128>}, {transform_indices = @transform_5, window_bounds = array<i64: 512, 128>}]} {
    %c0 = arith.constant 0 : index
    %c0_0 = arith.constant 0 : index
    %0 = vector.load %arg1[%c0, %c0_0] : memref<512x1024xf32, #tpu.memory_space<vmem>>, vector<512x1024xf32>
    %1 = arith.truncf %0 : vector<512x1024xf32> to vector<512x1024xbf16>
    %c0_1 = arith.constant 0 : index
    %c0_2 = arith.constant 0 : index
    %2 = vector.load %arg2[%c0_1, %c0_2] : memref<1024x256xbf16, #tpu.memory_space<vmem>>, vector<1024x256xbf16>
    %cst = arith.constant dense<0.000000e+00> : vector<512x256xf32>
    %3 = tpu.matmul %1, %2, %cst {dimension_numbers = #tpu.dot_dimension_numbers<[1], [0], [0], [1], [0, 0, 1, 1], [], []>} : vector<512x1024xbf16>, vector<1024x256xbf16>, vector<512x256xf32> -> vector<512x256xf32>
    %c0_3 = arith.constant 0 : index
    %c0_4 = arith.constant 0 : index
    %4 = vector.load %arg3[%c0_3, %c0_4] : memref<1x256xf32, #tpu.memory_space<vmem>>, vector<1x256xf32>
    %5 = vector.broadcast %4 : vector<1x256xf32> to vector<512x256xf32>
    %6 = arith.addf %3, %5 : vector<512x256xf32>
    %7 = math.tanh %6 : vector<512x256xf32>
    %8 = arith.truncf %7 : vector<512x256xf32> to vector<512x256xbf16>
    %c0_5 = arith.constant 0 : index
    %c0_6 = arith.constant 0 : index
    %9 = vector.load %arg4[%c0_5, %c0_6] : memref<256x128xbf16, #tpu.memory_space<vmem>>, vector<256x128xbf16>
    %cst_7 = arith.constant dense<0.000000e+00> : vector<512x128xf32>
    %10 = tpu.matmul %8, %9, %cst_7 {dimension_numbers = #tpu.dot_dimension_numbers<[1], [0], [0], [1], [0, 0, 1, 1], [], []>} : vector<512x256xbf16>, vector<256x128xbf16>, vector<512x128xf32> -> vector<512x128xf32>
    %c0_8 = arith.constant 0 : index
    %c0_9 = arith.constant 0 : index
    %11 = vector.load %arg5[%c0_8, %c0_9] : memref<1x128xf32, #tpu.memory_space<vmem>>, vector<1x128xf32>
    %12 = vector.broadcast %11 : vector<1x128xf32> to vector<512x128xf32>
    %13 = arith.addf %10, %12 : vector<512x128xf32>
    %c0_10 = arith.constant 0 : index
    %c0_11 = arith.constant 0 : index
    %14 = vector.load %arg6[%c0_10, %c0_11] : memref<512x128xf32, #tpu.memory_space<vmem>>, vector<512x128xf32>
    tpu.vector_store %arg6[%c0_10, %c0_11], %13 {strides = array<i32>} : memref<512x128xf32, #tpu.memory_space<vmem>>, vector<512x128xf32>,
    return
  }
  func.func @transform_0(%arg0: i32) -> (i32, i32) {
    %c0_i32 = arith.constant 0 : i32
    %c0_i32_0 = arith.constant 0 : i32
    return %arg0, %c0_i32 : i32, i32
  }
  func.func @transform_1(%arg0: i32) -> (i32, i32) {
    %c0_i32 = arith.constant 0 : i32
    %c0_i32_0 = arith.constant 0 : i32
    %c0_i32_1 = arith.constant 0 : i32
    return %c0_i32, %c0_i32_0 : i32, i32
  }
  func.func @transform_2(%arg0: i32) -> (i32, i32) {
    %c0_i32 = arith.constant 0 : i32
    %c0_i32_0 = arith.constant 0 : i32
    %c0_i32_1 = arith.constant 0 : i32
    return %c0_i32, %c0_i32_0 : i32, i32
  }
  func.func @transform_3(%arg0: i32) -> (i32, i32) {
    %c0_i32 = arith.constant 0 : i32
    %c0_i32_0 = arith.constant 0 : i32
    %c0_i32_1 = arith.constant 0 : i32
    return %c0_i32, %c0_i32_0 : i32, i32
  }
  func.func @transform_4(%arg0: i32) -> (i32, i32) {
    %c0_i32 = arith.constant 0 : i32
    %c0_i32_0 = arith.constant 0 : i32
    %c0_i32_1 = arith.constant 0 : i32
    return %c0_i32, %c0_i32_0 : i32, i32
  }
  func.func @transform_5(%arg0: i32) -> (i32, i32) {
    %c0_i32 = arith.constant 0 : i32
    %c0_i32_0 = arith.constant 0 : i32
    return %arg0, %c0_i32 : i32, i32
  }
}

</mosaic_0001>

<bundles_post_ra>
// kernel: attn_net_forward.1
= control target key start
LH: loop header
LB: loop body
LE: loop exit
PB: predicated region body
PF: predicated region fallthrough
CT: control target
= control target key end

     0   :  { %10 = vsyncpa [#allocation3], 0  ;;  %s7990_s0 = inlined_call_operand.hbm [shape: f32[777,1024], index: 0, kind: input, shape index: {}]   ;;  %s7991_s1 = inlined_call_operand.vmem [shape: bf16[1024,256], index: 1, kind: input, shape index: {}]   ;;  %s7992_s2 = inlined_call_operand.hbm [shape: f32[1,256], index: 2, kind: input, shape index: {}]   ;;  %s7993_s3 = inlined_call_operand.vmem [shape: bf16[256,128], index: 3, kind: input, shape index: {}]   ;;  %s7994_s4 = inlined_call_operand.vmem [shape: f32[1,128], index: 4, kind: input, shape index: {}]   ;;  %s7995_s5 = inlined_call_operand.vmem [shape: f32[777,128], index: 5, kind: output, shape index: {}]  }
   0x1   :  { %12 = vsyncpa [#allocation3 + $0x1], 0 }
   0x2   :  { %13 = vsyncpa [#allocation5], 0  ;;  %s5899_s18 = smov 0   ;;  %s5901_s19 = smov 0  }
   0x3   :  { %s5903_s20 = smov 0   ;;  %s5905_s21 = smov 0  }
   0x4 LB: > { %s5918_s22 = sadd.s32 4294967295, %s5830_s21   ;;  %s5921_s23 = sadd.s32 1, %s5830_s21   ;;  %s5830_s21 = sphi %s5905_s21, %s8163_s21   ;;  %s5826_s20 = sphi %s5903_s20, %s8162_s20   ;;  %s5822_s19 = sphi %s5901_s19, %s8161_s19   ;;  %s5818_s18 = sphi %s5899_s18, %s8160_s18  }
   0x5   : > { %s23_s24 = ssub.s32 %s5830_s21, %s5921_s23  ;;  %s26_s25 = sadd.s32 1, %s5826_s20 }
   0x6   : > { %p24_p0 = scmp.eq.s32.totalorder %s23_s24, 0  ;;  %p33_p1 = scmp.ne.s32.totalorder %s5826_s20, %s5822_s19 }
   0x7   : > { %p34_p2 = scmp.eq.s32.totalorder %s5830_s21, 0  ;;  %p39_p3 = scmp.ne.s32.totalorder %s5822_s19, %s5818_s18 }
   0x8   : > { %s5931_s26 = scalar_select %p24_p0, %s5826_s20, %s26_s25  }
   0x9   : > { %p5933_p4 = por %p34_p2, %p33_p1  ;;  %p7996_p5 = scmp.eq.s32.totalorder %s5918_s22, 0 }
   0xa   : > { %p147_p6 = scmp.eq.s32.totalorder %s5918_s22, 1  ;;  %p4401_p7 = scmp.ge.s32.totalorder %s5830_s21, 1 }
   0xb   : > { %s8001_s27 = scalar_select %p5933_p4, 1, 0 }
   0xc   : > { %p5942_p8 = por %p7996_p5, %p39_p3  ;;  %p160_p9 = scmp.lt.s32.totalorder %s5830_s21, 3 }
   0xd   : > { %p5947_p10 = por %p147_p6, %p33_p1  ;;  %s5864_s6 = smov [#allocation4]  }
   0xe   : > { %s8002_s28 = scalar_select %p5942_p8, 1, 0 }
   0xf   : > { %s8003_s29 = scalar_select %p5947_p10, 1, 0 }
  0x10   : > { %p5951_p11 = pnand %p4401_p7, %p160_p9  ;;  %s176_s7 = sshll.u32 %s5864_s6, 4  ;;  %s177_s7 = int_to_ptr.vmem [resolvable:$true] %s176_s7 }
  0x11   : > { %s5704_s11 = scalar_lea.hbm %s7992_s2, 32 }
  0x12   : > { %s8004_s30 = scalar_select %p5951_p11, 1, 0 }
  0x13   : > { %p5134_p12 = pneg %p5951_p11  ;;  %p5705_p0 = scmp.ne.s32.totalorder %s7992_s2, %s5704_s11 }
  0x14   : > { %p5711_p6 = scmp.lt.u32.totalorder %s5704_s11, %s7992_s2 }
  0x15   : > { %p5959_p13 = pnand %p5134_p12, %p7996_p5 }
  0x17   : > { %p5706_p1 = pneg %p5959_p13 }
  0x19   : > { %p5707_p2 = pnand %p5706_p1, %p5705_p0 }
  0x1b   : > { %p5708_p3 = pneg %p5707_p2 }
  0x1d   : > { %p5713_p7 = pnand %p5711_p6, %p5708_p3 }
  0x1f   : > { %5716 = shalt.err (!%p5713_p7)
}
  0x20   : > { %s5717_s16 = scalar_lea.vmem %s177_s7, 32  ;;  %p5725_p10 = scmp.lt.s32.totalorder %s177_s7, %s177_s7 }
  0x21   : > { %p5718_p9 = scmp.ne.s32.totalorder %s177_s7, %s5717_s16  ;;  %p5726_p8 = scmp.lt.s32.totalorder %s5717_s16, %s5717_s16 }
  0x23   : > { %p5720_p12 = pnand %p5718_p9, %p5706_p1  ;;  %p5727_p11 = por %p5726_p8, %p5725_p10 }
  0x25   : > { %p5721_p5 = pneg %p5720_p12 }
  0x27   : > { %p5728_p4 = pnand %p5727_p11, %p5721_p5 }
  0x29   : > { %5731 = shalt.err (!%p5728_p4)
}
  0x2a   : > { %5137 = dma.hbm_to_vmem [thread:$0]  (!%p5959_p13), %s7992_s2, 32, %s177_s7, [#allocation5]  }
  0x2b   : > { %p4403_p0 = scmp.ge.s32.totalorder %s5830_s21, 2 }
  0x2c   : > { %p8006_p2 = scmp.ne.s32.totalorder (!%p4403_p0), %s8001_s27, 0 }
  0x2d   : > { %189 = sbr.rel (%p4403_p0) target bundleno = 87 (0x57), region = 32 }
  0x34   : > { %192 = sbr.rel (!%p8006_p2) target bundleno = 87 (0x57), region = 36  ;;  %s193_s24 = sand.u32 (%p8006_p2), 1, %s5826_s20  }
  0x35   : > { %s4405_s25 = sshll.u32 (%p8006_p2), %s5830_s21, 6  ;;  %s4404_s6 = sshll.u32 (%p8006_p2), %s193_s24, 12 }
  0x36   : > { %s199_s9 = ssub.s32 (%p8006_p2), 98, %s4405_s25  ;;  %s5987_s11 = scalar_lea.sflag (%p8006_p2), [#allocation3], %s193_s24 }
  0x37   : > { %p200_p5 = scmp.lt.s32.totalorder (%p8006_p2), %s199_s9, 64  ;;  %s197_s7 = scalar_lea.vmem (%p8006_p2), [#allocation2], %s4404_s6 }
  0x3b   : > { %s8165_s9 = smov (!%p200_p5, %s199_s9), 64 }
  0x3c   : > { %s5984_s10 = sshll.u32 %s8165_s9, 10 }
  0x3d   : > { %s205_s8 = ssub.s32 65536, %s5984_s10 }
  0x3e   : > { %206 = vsyncadd %s5987_s11, %s205_s8  ;;  %p4408_p4 = scmp.ne.s32.totalorder %s5984_s10, 0  ;;  %s4581_s27 = sshll.u32 %s5830_s21, 16 }
  0x3f   : > { %s5995_s14 = scalar_lea.hbm %s7990_s0, %s4581_s27  ;;  %s212_s15 = sshll.u32 %s197_s7, 4  ;;  %s5997_s15 = int_to_ptr.vmem [resolvable:$true] %s212_s15 }
  0x40   : > { %s5732_s16 = scalar_lea.hbm %s5995_s14, %s5984_s10  ;;  %s5736_s21 = scalar_lea.hbm %s7990_s0, 100352 }
  0x41   : > { %p5733_p8 = scmp.ne.s32.totalorder %s5995_s14, %s5732_s16  ;;  %p5737_p13 = scmp.lt.u32.totalorder %s5995_s14, %s7990_s0 }
  0x42   : > { %p5738_p1 = scmp.lt.u32.totalorder %s5736_s21, %s5732_s16  ;;  %p5740_p6 = scmp.lt.u32.totalorder %s5732_s16, %s5995_s14 }
  0x43   : > { %p5734_p10 = pnand %p5733_p8, %p4408_p4 }
  0x44   : > { %p5739_p3 = por %p5738_p1, %p5737_p13 }
  0x45   : > { %p5735_p11 = pneg %p5734_p10 }
  0x46   : > { %p5741_p7 = por %p5740_p6, %p5739_p3 }
  0x48   : > { %p5742_p9 = pnand %p5741_p7, %p5735_p11 }
  0x4a   : > { %5745 = shalt.err (!%p5742_p9)
}
  0x4b   : > { %s5746_s6 = scalar_lea.vmem %s5997_s15, %s5984_s10  ;;  %s5865_s9 = smov [#allocation2]  }
  0x4c   : > { %p5747_p12 = scmp.ne.s32.totalorder %s5997_s15, %s5746_s6  ;;  %s5750_s8 = sshll.u32 %s5865_s9, 4  ;;  %s5751_s8 = int_to_ptr.vmem [resolvable:$false] %s5750_s8 }
  0x4d   : > { %s5752_s7 = scalar_lea.vmem %s5751_s8, 131072  ;;  %p5753_p5 = scmp.lt.s32.totalorder %s5997_s15, %s5751_s8 }
  0x4e   : > { %p5748_p0 = pnand %p5747_p12, %p4408_p4  ;;  %p5754_p8 = scmp.lt.s32.totalorder %s5752_s7, %s5746_s6 }
  0x50   : > { %p5749_p2 = pneg %p5748_p0  ;;  %p5755_p10 = por %p5754_p8, %p5753_p5 }
  0x52   : > { %p5756_p13 = pnand %p5755_p10, %p5749_p2 }
  0x54   : > { %5759 = shalt.err (!%p5756_p13)
}
  0x55   : > { %s5866_s27 = smov 1024   ;;  %s5867_s12 = smov 64  }
  0x56   : > { %218 = dma.hbm_to_vmem [thread:$0]  (%p4408_p4), %s5995_s14, %s5984_s10, %s5997_s15, %s5987_s11, %s5866_s27, %s5866_s27, %s5867_s12  }
  0x57 PF: > { %p8007_p11 = scmp.ne.s32.totalorder %s8004_s30, 0 }
  0x59   : > { %224 = sbr.rel (%p8007_p11) target bundleno = 1320 (0x528), region = 40 }
  0x60   : > { %s6027_s13 = sand.u32 1, %s5822_s19   ;;  %p8008_p1 = scmp.ne.s32.totalorder %s8002_s28, 0 }
  0x61   : > { %s4414_s16 = sshll.u32 %s6027_s13, 12  ;;  %s227_s17 = scalar_lea.sflag [#allocation3], %s6027_s13 }
  0x62   : > { %s6031_s18 = scalar_lea.vmem [#allocation2], %s4414_s16 }
  0x63   : > { %5809 = dma.done.wait (%p8008_p1), %s227_s17, 65536  }
  0x64   : > { %5811 = vsyncadd (%p8008_p1), %s227_s17, 4294901760  ;;  %p8009_p4 = scmp.eq.s32.totalorder %s5918_s22, 0 }
  0x66   : > { %5813 = dma.done.wait (%p8009_p4), [#allocation5], 32   ;;  %p8010_p3 = pmov %p8009_p4 }
  0x67   : > { %v6044_v0 = vld [vmem:[%s7991_s1 + $0x104] ss:$8 sps:$4 sm:$0xff]   ;;  %v6049_v1 = vld [vmem:[%s7991_s1 + $0x100] ss:$8 sps:$4 sm:$0xff]   ;;  %v6055_v2 = vld [vmem:[%s7991_s1 + $0x114] ss:$8 sps:$4 sm:$0xff]  }
  0x68   : > { %5815 = vsyncadd (%p8010_p3), [#allocation5], 4294967264  ;;  %2173 = vmatprep.subr.bf16.mxu0 %v6044_v0  ;;  %v6061_v3 = vld [vmem:[%s7991_s1 + $0x110] ss:$8 sps:$4 sm:$0xff]   ;;  %v6067_v4 = vld [vmem:[%s7991_s1 + $0x124] ss:$8 sps:$4 sm:$0xff]  }
  0x69   : > { %2174 = vmatpush1.bf16.msra.mxu0 %v6049_v1  ;;  %v6073_v5 = vld [vmem:[%s7991_s1 + $0x120] ss:$8 sps:$4 sm:$0xff]   ;;  %v6079_v6 = vld [vmem:[%s7991_s1 + $0x134] ss:$8 sps:$4 sm:$0xff]   ;;  %v6085_v7 = vld [vmem:[%s7991_s1 + $0x130] ss:$8 sps:$4 sm:$0xff]  }
  0x6a   : > { %2175 = vmatprep.subr.bf16.mxu0 %v6055_v2  ;;  %v6091_v8 = vld [vmem:[%s7991_s1 + $0x144] ss:$8 sps:$4 sm:$0xff]   ;;  %v6097_v9 = vld [vmem:[%s7991_s1 + $0x140] ss:$8 sps:$4 sm:$0xff]   ;;  %v6103_v10 = vld [vmem:[%s7991_s1 + $0x154] ss:$8 sps:$4 sm:$0xff]  }
  0x6b   : > { %v6109_v11 = vld [vmem:[%s7991_s1 + $0x150] ss:$8 sps:$4 sm:$0xff]   ;;  %v6115_v12 = vld [vmem:[%s7991_s1 + $0x164] ss:$8 sps:$4 sm:$0xff]   ;;  %v6123_v16 = vld [vmem:[%s7991_s1 + $0x160] ss:$8 sps:$4 sm:$0xff]  }
  0x6c   : > { %v275_v13 = vld [vmem:[%s6031_s18 + $0x18] sm:$0xff]  ;;  %v6141_v19 = vld [vmem:[%s7991_s1 + $0x184] ss:$8 sps:$4 sm:$0xff]   ;;  %v6147_v20 = vld [vmem:[%s7991_s1 + $0x180] ss:$8 sps:$4 sm:$0xff]   ;;  %p8154_p6 = scmp.ne.s32.totalorder %s8003_s29, 0 }
  0x6d   : > { %2176 = vmatpush1.bf16.msra.mxu0 %v6061_v3  ;;  %v283_v14 = vld [vmem:[%s6031_s18 + $0x58] sm:$0xff]  ;;  %v5303_v23 = vld [vmem:[%s7991_s1 + $0x4] ss:$8 sps:$4 sm:$0xff]   ;;  %v5305_v24 = vld [vmem:[%s7991_s1] ss:$8 sps:$4 sm:$0xff]   ;;  %s4563_s10 = sshll.u32 (%p8154_p6), %s5918_s22, 6 }
  0x6e   : > { %2177 = vmatprep.subr.bf16.mxu0 %v6067_v4  ;;  %v787_v15 = vpack.c.bf16 %v283_v14, %v275_v13  ;;  %v6129_v17 = vld [vmem:[%s7991_s1 + $0x174] ss:$8 sps:$4 sm:$0xff]   ;;  %v6135_v18 = vld [vmem:[%s7991_s1 + $0x170] ss:$8 sps:$4 sm:$0xff]   ;;  %v6171_v25 = vld [vmem:[%s7991_s1 + $0x1a4] ss:$8 sps:$4 sm:$0xff]   ;;  %1820 = vmatprep.subr.bf16.mxu1 %v5303_v23 }
  0x6f   : > { %v6153_v21 = vld [vmem:[%s7991_s1 + $0x194] ss:$8 sps:$4 sm:$0xff]   ;;  %v6158_v22 = vld [vmem:[%s7991_s1 + $0x190] ss:$8 sps:$4 sm:$0xff]   ;;  %v6176_v26 = vld [vmem:[%s7991_s1 + $0x1a0] ss:$8 sps:$4 sm:$0xff]   ;;  %1821 = vmatpush1.bf16.msra.mxu1 %v5305_v24 }
  0x70   : > { %2205 = vmatprep.mubr.bf16.mxu0 %v787_v15  ;;  %v6181_v27 = vld [vmem:[%s7991_s1 + $0x1b4] ss:$8 sps:$4 sm:$0xff]   ;;  %v5311_v29 = vld [vmem:[%s7991_s1 + $0x10] ss:$8 sps:$4 sm:$0xff]   ;;  %v5312_v30 = vld [vmem:[%s7991_s1 + $0x24] ss:$8 sps:$4 sm:$0xff]  }
  0x71   : > { %2178 = vmatpush1.bf16.msra.mxu0 %v6073_v5  ;;  %v5309_v28 = vld [vmem:[%s7991_s1 + $0x14] ss:$8 sps:$4 sm:$0xff]   ;;  %v5314_v31 = vld [vmem:[%s7991_s1 + $0x20] ss:$8 sps:$4 sm:$0xff]   ;;  %v6201_v32 = vld [vmem:[%s7991_s1 + $0x1b0] ss:$8 sps:$4 sm:$0xff]  }
  0x72   : > { %2179 = vmatprep.subr.bf16.mxu0 %v6079_v6  ;;  %1822 = vmatprep.subr.bf16.mxu1 %v5309_v28  ;;  %v6206_v33 = vld [vmem:[%s7991_s1 + $0x1c4] ss:$8 sps:$4 sm:$0xff]   ;;  %v5318_v34 = vld [vmem:[%s7991_s1 + $0x34] ss:$8 sps:$4 sm:$0xff]   ;;  %v5320_v35 = vld [vmem:[%s7991_s1 + $0x30] ss:$8 sps:$4 sm:$0xff]  }
  0x73   : > { %1823 = vmatpush1.bf16.msra.mxu1 %v5311_v29  ;;  %v6219_v36 = vld [vmem:[%s7991_s1 + $0x1c0] ss:$8 sps:$4 sm:$0xff]   ;;  %v5321_v37 = vld [vmem:[%s7991_s1 + $0x44] ss:$8 sps:$4 sm:$0xff]   ;;  %v6228_v38 = vld [vmem:[%s7991_s1 + $0x1d4] ss:$8 sps:$4 sm:$0xff]  }
  0x74   : > { %1824 = vmatprep.subr.bf16.mxu1 %v5312_v30  ;;  %v5323_v39 = vld [vmem:[%s7991_s1 + $0x40] ss:$8 sps:$4 sm:$0xff]   ;;  %v6237_v40 = vld [vmem:[%s7991_s1 + $0x1d0] ss:$8 sps:$4 sm:$0xff]   ;;  %v5327_v41 = vld [vmem:[%s7991_s1 + $0x54] ss:$8 sps:$4 sm:$0xff]  }
  0x75   : > { %2180 = vmatpush1.bf16.msra.mxu0 %v6085_v7  ;;  %v6246_v42 = vld [vmem:[%s7991_s1 + $0x1e4] ss:$8 sps:$4 sm:$0xff]   ;;  %v5329_v43 = vld [vmem:[%s7991_s1 + $0x50] ss:$8 sps:$4 sm:$0xff]   ;;  %v6255_v44 = vld [vmem:[%s7991_s1 + $0x1e0] ss:$8 sps:$4 sm:$0xff]  }
  0x76   : > { %2181 = vmatprep.subr.bf16.mxu0 %v6091_v8  ;;  %v5330_v45 = vld [vmem:[%s7991_s1 + $0x64] ss:$8 sps:$4 sm:$0xff]   ;;  %v6264_v46 = vld [vmem:[%s7991_s1 + $0x1f4] ss:$8 sps:$4 sm:$0xff]   ;;  %v6269_v47 = vld [vmem:[%s7991_s1 + $0x1f0] ss:$8 sps:$4 sm:$0xff]  }
  0x77   : > { %1825 = vmatpush1.bf16.msra.mxu1 %v5314_v31  ;;  %v274_v48 = vld [vmem:[%s6031_s18 + $0x10] sm:$0xff]  ;;  %v5290_v50 = vld [vmem:[%s7991_s1 + $0x204] ss:$8 sps:$4 sm:$0xff]   ;;  %v5332_v51 = vld [vmem:[%s7991_s1 + $0x60] ss:$8 sps:$4 sm:$0xff]   ;;  %s4582_s11 = sshll.u32 (%p8154_p6), %s5918_s22, 9 }
  0x78   : > { %1826 = vmatprep.subr.bf16.mxu1 %v5318_v34  ;;  %v282_v49 = vld [vmem:[%s6031_s18 + $0x50] sm:$0xff]  ;;  %v291_v52 = vld [vmem:[%s6031_s18 + $0x98] sm:$0xff]  ;;  %v5288_v57 = vld [vmem:[%s7991_s1 + $0x200] ss:$8 sps:$4 sm:$0xff]   ;;  %s3920_s14 = ssub.s32 (%p8154_p6), 98, %s4563_s10  ;;  %s7788_s21 = scalar_lea.vmem (%p8154_p6), %s7995_s5, %s4582_s11  }
  0x79   : > { %2182 = vmatpush1.bf16.msra.mxu0 %v6097_v9  ;;  %v5336_v53 = vld [vmem:[%s7991_s1 + $0x74] ss:$8 sps:$4 sm:$0xff]   ;;  %v786_v55 = vpack.c.bf16 %v282_v49, %v274_v48  ;;  %v5338_v56 = vld [vmem:[%s7991_s1 + $0x70] ss:$8 sps:$4 sm:$0xff]   ;;  %v5339_v60 = vld [vmem:[%s7991_s1 + $0x84] ss:$8 sps:$4 sm:$0xff]  }
  0x7a   : > { %2183 = vmatprep.subr.bf16.mxu0 %v6103_v10  ;;  %v299_v54 = vld [vmem:[%s6031_s18 + $0xd8] sm:$0xff]  ;;  %v290_v61 = vld [vmem:[%s6031_s18 + $0x90] sm:$0xff]  ;;  %v5341_v63 = vld [vmem:[%s7991_s1 + $0x80] ss:$8 sps:$4 sm:$0xff]   ;;  %p3921_p7 = scmp.lt.s32.totalorder (%p8154_p6), %s3920_s14, 64 }
  0x7b   : > { %1827 = vmatpush1.bf16.msra.mxu1 %v5320_v35  ;;  %v795_v58 = vpack.c.bf16 %v299_v54, %v291_v52  ;;  %v5293_v59 = vld [vmem:[%s7991_s1 + $0x214] ss:$8 sps:$4 sm:$0xff]   ;;  %v5291_v13 = vld [vmem:[%s7991_s1 + $0x210] ss:$8 sps:$4 sm:$0xff]   ;;  %v5296_v24 = vld [vmem:[%s7991_s1 + $0x224] ss:$8 sps:$4 sm:$0xff]  }
  0x7c   : > { %1828 = vmatprep.subr.bf16.mxu1 %v5321_v37  ;;  %v298_v62 = vld [vmem:[%s6031_s18 + $0xd0] sm:$0xff]  ;;  %v307_v15 = vld [vmem:[%s6031_s18 + $0x118] sm:$0xff]  ;;  %v5294_v31 = vld [vmem:[%s7991_s1 + $0x220] ss:$8 sps:$4 sm:$0xff]  }
  0x7d   : > { %2184 = vmatpush1.bf16.msra.mxu0 %v6109_v11  ;;  %v5345_v14 = vld [vmem:[%s7991_s1 + $0x94] ss:$8 sps:$4 sm:$0xff]   ;;  %v794_v28 = vpack.c.bf16 %v298_v62, %v290_v61  ;;  %v5347_v29 = vld [vmem:[%s7991_s1 + $0x90] ss:$8 sps:$4 sm:$0xff]   ;;  %v5348_v35 = vld [vmem:[%s7991_s1 + $0xa4] ss:$8 sps:$4 sm:$0xff]  }
  0x7e   : > { %2185 = vmatprep.subr.bf16.mxu0 %v6115_v12  ;;  %v315_v23 = vld [vmem:[%s6031_s18 + $0x158] sm:$0xff]  ;;  %v306_v37 = vld [vmem:[%s6031_s18 + $0x110] sm:$0xff]  ;;  %v281_v52 = vld [vmem:[%s6031_s18 + $0x48] sm:$0xff] }
  0x7f   : > { %1829 = vmatpush1.bf16.msra.mxu1 %v5323_v39  ;;  %v803_v30 = vpack.c.bf16 %v315_v23, %v307_v15  ;;  %v5299_v34 = vld [vmem:[%s7991_s1 + $0x234] ss:$8 sps:$4 sm:$0xff]   ;;  %v5297_v48 = vld [vmem:[%s7991_s1 + $0x230] ss:$8 sps:$4 sm:$0xff]   ;;  %v5317_v23 = vld [vmem:[%s7991_s1 + $0x264] ss:$8 sps:$4 sm:$0xff]  }
  0x80   : > { %1830 = vmatprep.subr.bf16.mxu1 %v5327_v41  ;;  %v314_v39 = vld [vmem:[%s6031_s18 + $0x150] sm:$0xff]  ;;  %v323_v41 = vld [vmem:[%s6031_s18 + $0x198] sm:$0xff] }
  0x81   : > { %2186 = vmatpush1.bf16.msra.mxu0 %v6123_v16  ;;  %v5354_v49 = vld [vmem:[%s7991_s1 + $0xb4] ss:$8 sps:$4 sm:$0xff]   ;;  %v5356_v54 = vld [vmem:[%s7991_s1 + $0xb0] ss:$8 sps:$4 sm:$0xff]  }
  0x82   : > { %2187 = vmatprep.subr.bf16.mxu0 %v6129_v17  ;;  %v330_v61 = vld [vmem:[%s6031_s18 + $0x1d0] sm:$0xff]  ;;  %v339_v62 = vld [vmem:[%s6031_s18 + $0x218] sm:$0xff] }
  0x83   : > { %1831 = vmatpush1.bf16.msra.mxu1 %v5329_v43  ;;  %v331_v43 = vld [vmem:[%s6031_s18 + $0x1d8] sm:$0xff] }
  0x84   : > { %1832 = vmatprep.subr.bf16.mxu1 %v5330_v45  ;;  %v5350_v45 = vld [vmem:[%s7991_s1 + $0xa0] ss:$8 sps:$4 sm:$0xff]   ;;  %v5363_v15 = vld [vmem:[%s7991_s1 + $0xd4] ss:$8 sps:$4 sm:$0xff]  }
  0x85   : > { %2188 = vmatpush1.bf16.msra.mxu0 %v6135_v18 }
  0x86   : > { %2189 = vmatprep.subr.bf16.mxu0 %v6141_v19 }
  0x87   : > { %1833 = vmatpush1.bf16.msra.mxu1 %v5332_v51  ;;  %v273_v51 = vld [vmem:[%s6031_s18 + $0x8] sm:$0xff] }
  0x88   : > { %1834 = vmatprep.subr.bf16.mxu1 %v5336_v53  ;;  %v802_v53 = vpack.c.bf16 %v314_v39, %v306_v37  ;;  %v346_v37 = vld [vmem:[%s6031_s18 + $0x250] sm:$0xff]  ;;  %v355_v39 = vld [vmem:[%s6031_s18 + $0x298] sm:$0xff] }
  0x89   : > { %2190 = vmatpush1.bf16.msra.mxu0 %v6147_v20 }
  0x8a   : > { %2191 = vmatprep.subr.bf16.mxu0 %v6153_v21 }
  0x8b   : > { %1835 = vmatpush1.bf16.msra.mxu1 %v5338_v56  ;;  %v811_v56 = vpack.c.bf16 %v331_v43, %v323_v41  ;;  %v5368_v41 = vld [vmem:[%s7991_s1 + $0xe0] ss:$8 sps:$4 sm:$0xff]   ;;  %v363_v43 = vld [vmem:[%s6031_s18 + $0x2d8] sm:$0xff] }
  0x8c   : > { %1836 = vmatprep.subr.bf16.mxu1 %v5339_v60  ;;  %v322_v60 = vld [vmem:[%s6031_s18 + $0x190] sm:$0xff] }
  0x8d   : > { %2192 = vmatpush1.bf16.msra.mxu0 %v6158_v22 }
  0x8e   : > { %2193 = vmatprep.subr.bf16.mxu0 %v6171_v25 }
  0x8f   : > { %1837 = vmatpush1.bf16.msra.mxu1 %v5341_v63  ;;  %v5359_v63 = vld [vmem:[%s7991_s1 + $0xc0] ss:$8 sps:$4 sm:$0xff]  }
  0x90   : > { %1838 = vmatprep.subr.bf16.mxu1 %v5345_v14  ;;  %v5306_v14 = vld [vmem:[%s7991_s1 + $0x250] ss:$8 sps:$4 sm:$0xff]  }
  0x91   : > { %2194 = vmatpush1.bf16.msra.mxu0 %v6176_v26 }
  0x92   : > { %2195 = vmatprep.subr.bf16.mxu0 %v6181_v27 }
  0x93   : > { %1839 = vmatpush1.bf16.msra.mxu1 %v5347_v29 }
  0x94   : > { %1840 = vmatprep.subr.bf16.mxu1 %v5348_v35  ;;  %v338_v35 = vld [vmem:[%s6031_s18 + $0x210] sm:$0xff] }
  0x95   : > { %2196 = vmatpush1.bf16.msra.mxu0 %v6201_v32 }
  0x96   : > { %2197 = vmatprep.subr.bf16.mxu0 %v6206_v33 }
  0x97   : > { %1841 = vmatpush1.bf16.msra.mxu1 %v5350_v45  ;;  %v5324_v45 = vld [vmem:[%s7991_s1 + $0x270] ss:$8 sps:$4 sm:$0xff]  }
  0x98   : > { %1842 = vmatprep.subr.bf16.mxu1 %v5354_v49  ;;  %v5335_v49 = vld [vmem:[%s7991_s1 + $0x284] ss:$8 sps:$4 sm:$0xff]  }
  0x99   : > { %2198 = vmatpush1.bf16.msra.mxu0 %v6219_v36 }
  0x9a   : > { %2199 = vmatprep.subr.bf16.mxu0 %v6228_v38 }
  0x9b   : > { %1843 = vmatpush1.bf16.msra.mxu1 %v5356_v54  ;;  %v827_v54 = vpack.c.bf16 %v363_v43, %v355_v39  ;;  %v378_v39 = vld [vmem:[%s6031_s18 + $0x350] sm:$0xff]  ;;  %v395_v43 = vld [vmem:[%s6031_s18 + $0x3d8] sm:$0xff] }
  0x9d   : > { %2200 = vmatpush1.bf16.msra.mxu0 %v6237_v40 }
  0x9e   : > { %2201 = vmatprep.subr.bf16.mxu0 %v6246_v42 }
  0xa1   : > { %2202 = vmatpush1.bf16.msra.mxu0 %v6255_v44 }
  0xa2   : > { %2203 = vmatprep.subr.bf16.mxu0 %v6264_v46 }
  0xa5   : > { %2204 = vmatpush1.bf16.msra.mxu0 %v6269_v47 }
  0xa6   : > { %2526 = vmatprep.subr.bf16.mxu0 %v5290_v50  ;;  %v5302_v50 = vld [vmem:[%s7991_s1 + $0x244] ss:$8 sps:$4 sm:$0xff]  }
  0xa8   : > { %2206 = vmatmul.mubr.bf16.vlgmr.msra.gmra.mrb[0].mxu0 %v786_v55  ;;  %v785_v55 = vpack.c.bf16 %v281_v52, %v273_v51  ;;  %v5374_v51 = vld [vmem:[%s7991_s1 + $0xf0] ss:$8 sps:$4 sm:$0xff]   ;;  %v272_v52 = vld [vmem:[%s6031_s18] sm:$0xff] }
  0xa9   : > { %2527 = vmatpush1.bf16.msra.mxu0 %v5288_v57  ;;  %2215 = vmatprep.mubr.bf16.mxu0 %v795_v58  ;;  %v5300_v57 = vld [vmem:[%s7991_s1 + $0x240] ss:$8 sps:$4 sm:$0xff]   ;;  %v5308_v58 = vld [vmem:[%s7991_s1 + $0x254] ss:$8 sps:$4 sm:$0xff]  }
  0xaa   : > { %2528 = vmatprep.subr.bf16.mxu0 %v5293_v59  ;;  %v5357_v59 = vld [vmem:[%s7991_s1 + $0xc4] ss:$8 sps:$4 sm:$0xff]   ;;  %1852 = vmatprep.mubr.bf16.mxu1 %v785_v55  ;;  %v5333_v55 = vld [vmem:[%s7991_s1 + $0x280] ss:$8 sps:$4 sm:$0xff]  }
  0xab   : > { %1844 = vmatprep.subr.bf16.mxu1 %v5357_v59 }
  0xac   : > { %1845 = vmatpush1.bf16.msra.mxu1 %v5359_v63  ;;  %v5342_v63 = vld [vmem:[%s7991_s1 + $0x290] ss:$8 sps:$4 sm:$0xff]  }
  0xad   : > { %2529 = vmatpush1.bf16.msra.mxu0 %v5291_v13  ;;  %v347_v13 = vld [vmem:[%s6031_s18 + $0x258] sm:$0xff]  ;;  %1846 = vmatprep.subr.bf16.mxu1 %v5363_v15  ;;  %v5353_v15 = vld [vmem:[%s7991_s1 + $0x2a4] ss:$8 sps:$4 sm:$0xff]  }
  0xae   : > { %2530 = vmatprep.subr.bf16.mxu0 %v5296_v24  ;;  %v810_v24 = vpack.c.bf16 %v330_v61, %v322_v60  ;;  %v819_v29 = vpack.c.bf16 %v347_v13, %v339_v62  ;;  %v354_v60 = vld [vmem:[%s6031_s18 + $0x290] sm:$0xff]  ;;  %v371_v13 = vld [vmem:[%s6031_s18 + $0x318] sm:$0xff] }
  0xaf   : > { %v362_v62 = vld [vmem:[%s6031_s18 + $0x2d0] sm:$0xff] }
  0xb0   : > { %2216 = vmatmul.mubr.bf16.gmra.mrb[4].mxu0 %v794_v28  ;;  %v5365_v28 = vld [vmem:[%s7991_s1 + $0xd0] ss:$8 sps:$4 sm:$0xff]  }
  0xb1   : > { %2225 = vmatprep.mubr.bf16.mxu0 %v803_v30  ;;  %2531 = vmatpush1.bf16.msra.mxu0 %v5294_v31  ;;  %v5315_v30 = vld [vmem:[%s7991_s1 + $0x260] ss:$8 sps:$4 sm:$0xff]   ;;  %v5326_v31 = vld [vmem:[%s7991_s1 + $0x274] ss:$8 sps:$4 sm:$0xff]  }
  0xb2   : > { %2532 = vmatprep.subr.bf16.mxu0 %v5299_v34  ;;  %v5366_v34 = vld [vmem:[%s7991_s1 + $0xe4] ss:$8 sps:$4 sm:$0xff]   ;;  %1847 = vmatpush1.bf16.msra.mxu1 %v5365_v28 }
  0xb3   : > { %1848 = vmatprep.subr.bf16.mxu1 %v5366_v34  ;;  %v296_v28 = vld [vmem:[%s6031_s18 + $0xc0] sm:$0xff]  ;;  %v313_v34 = vld [vmem:[%s6031_s18 + $0x148] sm:$0xff] }
  0xb5   : > { %2533 = vmatpush1.bf16.msra.mxu0 %v5297_v48  ;;  %v5372_v48 = vld [vmem:[%s7991_s1 + $0xf4] ss:$8 sps:$4 sm:$0xff]  }
  0xb6   : > { %2534 = vmatprep.subr.bf16.mxu0 %v5302_v50  ;;  %v818_v50 = vpack.c.bf16 %v346_v37, %v338_v35  ;;  %1849 = vmatpush1.bf16.msra.mxu1 %v5368_v41  ;;  %v370_v37 = vld [vmem:[%s6031_s18 + $0x310] sm:$0xff]  ;;  %v387_v41 = vld [vmem:[%s6031_s18 + $0x398] sm:$0xff] }
  0xb7   : > { %1850 = vmatprep.subr.bf16.mxu1 %v5372_v48  ;;  %v5369_v48 = vld [vmem:[%s7991_s1 + $0x2c0] ss:$8 sps:$4 sm:$0xff]  }
  0xb8   : > { %2226 = vmatmul.mubr.bf16.gmra.mrb[8].mxu0 %v802_v53  ;;  %v280_v53 = vld [vmem:[%s6031_s18 + $0x40] sm:$0xff] }
  0xb9   : > { %2235 = vmatprep.mubr.bf16.mxu0 %v811_v56  ;;  %2535 = vmatpush1.bf16.msra.mxu0 %v5300_v57  ;;  %v289_v56 = vld [vmem:[%s6031_s18 + $0x88] sm:$0xff]  ;;  %v784_v59 = vpack.c.bf16 %v280_v53, %v272_v52 }
  0xba   : > { %2536 = vmatprep.subr.bf16.mxu0 %v5308_v58  ;;  %v297_v57 = vld [vmem:[%s6031_s18 + $0xc8] sm:$0xff]  ;;  %v5344_v58 = vld [vmem:[%s7991_s1 + $0x294] ss:$8 sps:$4 sm:$0xff]   ;;  %1851 = vmatpush1.bf16.msra.mxu1 %v5374_v51  ;;  %v843_v51 = vpack.c.bf16 %v395_v43, %v387_v41  ;;  %v352_v43 = vld [vmem:[%s6031_s18 + $0x280] sm:$0xff] }
  0xbb   : > { %v793_v61 = vpack.c.bf16 %v297_v57, %v289_v56  ;;  %4585 = vmatprep.subr.bf16.mxu1 %v6044_v0  ;;  %v5362_v0 = vld [vmem:[%s7991_s1 + $0x2b4] ss:$8 sps:$4 sm:$0xff]   ;;  %v321_v52 = vld [vmem:[%s6031_s18 + $0x188] sm:$0xff] }
  0xbc   : > { %v329_v53 = vld [vmem:[%s6031_s18 + $0x1c8] sm:$0xff]  ;;  %v394_v56 = vld [vmem:[%s6031_s18 + $0x3d0] sm:$0xff]  ;;  %v403_v57 = vld [vmem:[%s6031_s18 + $0x418] sm:$0xff] }
  0xbd   : > { %2537 = vmatpush1.bf16.msra.mxu0 %v5306_v14  ;;  %v379_v14 = vld [vmem:[%s6031_s18 + $0x358] sm:$0xff]  ;;  %1853 = vmatmul.mubr.bf16.vlgmr.msra.gmra.mrb[0].mxu1 %v784_v59 }
  0xbe   : > { %2538 = vmatprep.subr.bf16.mxu0 %v5317_v23  ;;  %v826_v23 = vpack.c.bf16 %v362_v62, %v354_v60  ;;  %1862 = vmatprep.mubr.bf16.mxu1 %v793_v61  ;;  %v5375_v59 = vld [vmem:[%s7991_s1 + $0x2d0] ss:$8 sps:$4 sm:$0xff]   ;;  %v320_v60 = vld [vmem:[%s6031_s18 + $0x180] sm:$0xff]  ;;  %v337_v62 = vld [vmem:[%s6031_s18 + $0x208] sm:$0xff] }
  0xbf   : > { %4601 = vmatpush1.bf16.msra.mxu1 %v6049_v1  ;;  %v328_v61 = vld [vmem:[%s6031_s18 + $0x1c0] sm:$0xff]  ;;  %v435_v41 = vld [vmem:[%s6031_s18 + $0x518] sm:$0xff] }
  0xc0   : > { %2236 = vmatmul.mubr.bf16.gmra.mrb[12].mxu0 %v810_v24  ;;  %v288_v24 = vld [vmem:[%s6031_s18 + $0x80] sm:$0xff]  ;;  %4586 = vmatprep.subr.bf16.mxu1 %v6055_v2  ;;  %v5360_v2 = vld [vmem:[%s7991_s1 + $0x2b0] ss:$8 sps:$4 sm:$0xff]  }
  0xc1   : > { %2245 = vmatprep.mubr.bf16.mxu0 %v819_v29  ;;  %2539 = vmatpush1.bf16.msra.mxu0 %v5315_v30  ;;  %v835_v29 = vpack.c.bf16 %v379_v14, %v371_v13  ;;  %v5351_v30 = vld [vmem:[%s7991_s1 + $0x2a0] ss:$8 sps:$4 sm:$0xff]   ;;  %v792_v35 = vpack.c.bf16 %v296_v28, %v288_v24  ;;  %v5383_v14 = vld [vmem:[%s7991_s1 + $0x2f4] ss:$8 sps:$4 sm:$0xff]  }
  0xc2   : > { %2540 = vmatprep.subr.bf16.mxu0 %v5326_v31  ;;  %v305_v31 = vld [vmem:[%s6031_s18 + $0x108] sm:$0xff]  ;;  %v410_v24 = vld [vmem:[%s6031_s18 + $0x450] sm:$0xff]  ;;  %v419_v28 = vld [vmem:[%s6031_s18 + $0x498] sm:$0xff] }
  0xc3   : > { %v801_v1 = vpack.c.bf16 %v313_v34, %v305_v31  ;;  %4602 = vmatpush1.bf16.msra.mxu1 %v6061_v3  ;;  %v834_v3 = vpack.c.bf16 %v378_v39, %v370_v37  ;;  %v336_v31 = vld [vmem:[%s6031_s18 + $0x200] sm:$0xff]  ;;  %v418_v39 = vld [vmem:[%s6031_s18 + $0x490] sm:$0xff] }
  0xc4   : > { %4587 = vmatprep.subr.bf16.mxu1 %v6067_v4  ;;  %v5377_v4 = vld [vmem:[%s7991_s1 + $0x2d4] ss:$8 sps:$4 sm:$0xff]   ;;  %v344_v34 = vld [vmem:[%s6031_s18 + $0x240] sm:$0xff] }
  0xc5   : > { %2541 = vmatpush1.bf16.msra.mxu0 %v5324_v45  ;;  %v5371_v45 = vld [vmem:[%s7991_s1 + $0x2c4] ss:$8 sps:$4 sm:$0xff]   ;;  %1863 = vmatmul.mubr.bf16.gmra.mrb[4].mxu1 %v792_v35 }
  0xc6   : > { %2542 = vmatprep.subr.bf16.mxu0 %v5335_v49  ;;  %1872 = vmatprep.mubr.bf16.mxu1 %v801_v1  ;;  %v304_v49 = vld [vmem:[%s6031_s18 + $0x100] sm:$0xff] }
  0xc7   : > { %4603 = vmatpush1.bf16.msra.mxu1 %v6073_v5  ;;  %v809_v5 = vpack.c.bf16 %v329_v53, %v321_v52  ;;  %v459_v52 = vld [vmem:[%s6031_s18 + $0x5d8] sm:$0xff]  ;;  %v368_v53 = vld [vmem:[%s6031_s18 + $0x300] sm:$0xff] }
  0xc8   : > { %2246 = vmatmul.mubr.bf16.gmra.mrb[16].mxu0 %v818_v50  ;;  %v312_v50 = vld [vmem:[%s6031_s18 + $0x140] sm:$0xff]  ;;  %4588 = vmatprep.subr.bf16.mxu1 %v6079_v6 }
  0xc9   : > { %2255 = vmatprep.mubr.bf16.mxu0 %v827_v54  ;;  %2543 = vmatpush1.bf16.msra.mxu0 %v5333_v55  ;;  %v800_v54 = vpack.c.bf16 %v312_v50, %v304_v49  ;;  %v386_v55 = vld [vmem:[%s6031_s18 + $0x390] sm:$0xff]  ;;  %v5380_v6 = vld [vmem:[%s7991_s1 + $0x2e4] ss:$8 sps:$4 sm:$0xff]  }
  0xca   : > { %2544 = vmatprep.subr.bf16.mxu0 %v5344_v58  ;;  %v411_v58 = vld [vmem:[%s6031_s18 + $0x458] sm:$0xff]  ;;  %v842_v13 = vpack.c.bf16 %v394_v56, %v386_v55  ;;  %v385_v55 = vld [vmem:[%s6031_s18 + $0x388] sm:$0xff] }
  0xcb   : > { %4604 = vmatpush1.bf16.msra.mxu1 %v6085_v7  ;;  %v5378_v7 = vld [vmem:[%s7991_s1 + $0x2e0] ss:$8 sps:$4 sm:$0xff]  }
  0xcc   : > { %4589 = vmatprep.subr.bf16.mxu1 %v6091_v8  ;;  %v808_v8 = vpack.c.bf16 %v328_v61, %v320_v60  ;;  %v409_v61 = vld [vmem:[%s6031_s18 + $0x448] sm:$0xff] }
  0xcd   : > { %2545 = vmatpush1.bf16.msra.mxu0 %v5342_v63  ;;  %1873 = vmatmul.mubr.bf16.gmra.mrb[8].mxu1 %v800_v54  ;;  %v345_v63 = vld [vmem:[%s6031_s18 + $0x248] sm:$0xff] }
  0xce   : > { %2546 = vmatprep.subr.bf16.mxu0 %v5353_v15  ;;  %1882 = vmatprep.mubr.bf16.mxu1 %v809_v5  ;;  %v851_v15 = vpack.c.bf16 %v411_v58, %v403_v57  ;;  %v450_v5 = vld [vmem:[%s6031_s18 + $0x590] sm:$0xff]  ;;  %v475_v58 = vld [vmem:[%s6031_s18 + $0x658] sm:$0xff] }
  0xcf   : > { %4605 = vmatpush1.bf16.msra.mxu1 %v6097_v9  ;;  %v5381_v9 = vld [vmem:[%s7991_s1 + $0x2f0] ss:$8 sps:$4 sm:$0xff]  }
  0xd0   : > { %2256 = vmatmul.mubr.bf16.gmra.mrb[20].mxu0 %v826_v23  ;;  %4590 = vmatprep.subr.bf16.mxu1 %v6103_v10  ;;  %v402_v23 = vld [vmem:[%s6031_s18 + $0x410] sm:$0xff]  ;;  %v5386_v10 = vld [vmem:[%s7991_s1 + $0x304] ss:$8 sps:$4 sm:$0xff]  }
  0xd1   : > { %2265 = vmatprep.mubr.bf16.mxu0 %v835_v29  ;;  %2547 = vmatpush1.bf16.msra.mxu0 %v5351_v30  ;;  %v817_v29 = vpack.c.bf16 %v345_v63, %v337_v62  ;;  %v427_v30 = vld [vmem:[%s6031_s18 + $0x4d8] sm:$0xff]  ;;  %v850_v35 = vpack.c.bf16 %v410_v24, %v402_v23  ;;  %v458_v57 = vld [vmem:[%s6031_s18 + $0x5d0] sm:$0xff]  ;;  %v425_v23 = vld [vmem:[%s6031_s18 + $0x4c8] sm:$0xff] }
  0xd2   : > { %2548 = vmatprep.subr.bf16.mxu0 %v5362_v0  ;;  %v361_v0 = vld [vmem:[%s6031_s18 + $0x2c8] sm:$0xff]  ;;  %v859_v1 = vpack.c.bf16 %v427_v30, %v419_v28  ;;  %v466_v62 = vld [vmem:[%s6031_s18 + $0x610] sm:$0xff]  ;;  %v507_v30 = vld [vmem:[%s6031_s18 + $0x758] sm:$0xff] }
  0xd3   : > { %4606 = vmatpush1.bf16.msra.mxu1 %v6109_v11  ;;  %v353_v11 = vld [vmem:[%s6031_s18 + $0x288] sm:$0xff]  ;;  %v474_v63 = vld [vmem:[%s6031_s18 + $0x650] sm:$0xff] }
  0xd4   : > { %4591 = vmatprep.subr.bf16.mxu1 %v6115_v12  ;;  %v816_v12 = vpack.c.bf16 %v344_v34, %v336_v31  ;;  %v825_v37 = vpack.c.bf16 %v361_v0, %v353_v11  ;;  %v482_v28 = vld [vmem:[%s6031_s18 + $0x690] sm:$0xff]  ;;  %v433_v34 = vld [vmem:[%s6031_s18 + $0x508] sm:$0xff] }
  0xd5   : > { %2549 = vmatpush1.bf16.msra.mxu0 %v5360_v2  ;;  %1883 = vmatmul.mubr.bf16.gmra.mrb[12].mxu1 %v808_v8  ;;  %v426_v2 = vld [vmem:[%s6031_s18 + $0x4d0] sm:$0xff] }
  0xd6   : > { %2550 = vmatprep.subr.bf16.mxu0 %v5371_v45  ;;  %1892 = vmatprep.mubr.bf16.mxu1 %v817_v29  ;;  %v360_v45 = vld [vmem:[%s6031_s18 + $0x2c0] sm:$0xff]  ;;  %v490_v29 = vld [vmem:[%s6031_s18 + $0x6d0] sm:$0xff] }
  0xd7   : > { %4607 = vmatpush1.bf16.msra.mxu1 %v6123_v16  ;;  %v443_v16 = vld [vmem:[%s6031_s18 + $0x558] sm:$0xff]  ;;  %v824_v49 = vpack.c.bf16 %v360_v45, %v352_v43  ;;  %v449_v43 = vld [vmem:[%s6031_s18 + $0x588] sm:$0xff] }
  0xd8   : > { %2266 = vmatmul.mubr.bf16.gmra.mrb[24].mxu0 %v834_v3  ;;  %4592 = vmatprep.subr.bf16.mxu1 %v6129_v17  ;;  %v369_v17 = vld [vmem:[%s6031_s18 + $0x308] sm:$0xff] }
  0xd9   : > { %2275 = vmatprep.mubr.bf16.mxu0 %v843_v51  ;;  %2551 = vmatpush1.bf16.msra.mxu0 %v5369_v48  ;;  %v377_v3 = vld [vmem:[%s6031_s18 + $0x348] sm:$0xff]  ;;  %v858_v48 = vpack.c.bf16 %v426_v2, %v418_v39  ;;  %v442_v51 = vld [vmem:[%s6031_s18 + $0x550] sm:$0xff]  ;;  %v432_v2 = vld [vmem:[%s6031_s18 + $0x500] sm:$0xff] }
  0xda   : > { %2552 = vmatprep.subr.bf16.mxu0 %v5377_v4  ;;  %v833_v50 = vpack.c.bf16 %v377_v3, %v369_v17  ;;  %v451_v4 = vld [vmem:[%s6031_s18 + $0x598] sm:$0xff]  ;;  %v457_v45 = vld [vmem:[%s6031_s18 + $0x5c8] sm:$0xff] }
  0xdb   : > { %4608 = vmatpush1.bf16.msra.mxu1 %v6135_v18  ;;  %v867_v18 = vpack.c.bf16 %v443_v16, %v435_v41  ;;  %v875_v54 = vpack.c.bf16 %v459_v52, %v451_v4  ;;  %v440_v41 = vld [vmem:[%s6031_s18 + $0x540] sm:$0xff]  ;;  %v873_v3 = vpack.c.bf16 %v457_v45, %v449_v43  ;;  %v5399_v43 = vld [vmem:[%s7991_s1 + $0x350] ss:$8 sps:$4 sm:$0xff]   ;;  %v341_v45 = vld [vmem:[%s6031_s18 + $0x228] sm:$0xff] }
  0xdc   : > { %4593 = vmatprep.subr.bf16.mxu1 %v6141_v19  ;;  %v434_v19 = vld [vmem:[%s6031_s18 + $0x510] sm:$0xff]  ;;  %v864_v17 = vpack.c.bf16 %v440_v41, %v432_v2  ;;  %v456_v4 = vld [vmem:[%s6031_s18 + $0x5c0] sm:$0xff] }
  0xdd   : > { %2553 = vmatpush1.bf16.msra.mxu0 %v5375_v59  ;;  %1893 = vmatmul.mubr.bf16.gmra.mrb[16].mxu1 %v816_v12  ;;  %v874_v59 = vpack.c.bf16 %v458_v57, %v450_v5  ;;  %v515_v12 = vld [vmem:[%s6031_s18 + $0x798] sm:$0xff]  ;;  %v464_v57 = vld [vmem:[%s6031_s18 + $0x600] sm:$0xff] }
  0xde   : > { %2554 = vmatprep.subr.bf16.mxu0 %v5380_v6  ;;  %1902 = vmatprep.mubr.bf16.mxu1 %v825_v37  ;;  %v392_v6 = vld [vmem:[%s6031_s18 + $0x3c0] sm:$0xff]  ;;  %v523_v37 = vld [vmem:[%s6031_s18 + $0x7d8] sm:$0xff] }
  0xdf   : > { %4609 = vmatpush1.bf16.msra.mxu1 %v6147_v20  ;;  %v376_v20 = vld [vmem:[%s6031_s18 + $0x340] sm:$0xff]  ;;  %v907_v16 = vpack.c.bf16 %v523_v37, %v515_v12  ;;  %v521_v12 = vld [vmem:[%s6031_s18 + $0x7c8] sm:$0xff]  ;;  %v5401_v37 = vld [vmem:[%s7991_s1 + $0x354] ss:$8 sps:$4 sm:$0xff]  }
  0xe0   : > { %2276 = vmatmul.mubr.bf16.gmra.mrb[28].mxu0 %v842_v13  ;;  %4594 = vmatprep.subr.bf16.mxu1 %v6153_v21  ;;  %v866_v21 = vpack.c.bf16 %v442_v51, %v434_v19  ;;  %v832_v56 = vpack.c.bf16 %v376_v20, %v368_v53  ;;  %v491_v13 = vld [vmem:[%s6031_s18 + $0x6d8] sm:$0xff]  ;;  %v285_v19 = vld [vmem:[%s6031_s18 + $0x68] sm:$0xff]  ;;  %v448_v51 = vld [vmem:[%s6031_s18 + $0x580] sm:$0xff] }
  0xe1   : > { %2285 = vmatprep.mubr.bf16.mxu0 %v851_v15  ;;  %2555 = vmatpush1.bf16.msra.mxu0 %v5378_v7  ;;  %v408_v15 = vld [vmem:[%s6031_s18 + $0x440] sm:$0xff]  ;;  %v465_v53 = vld [vmem:[%s6031_s18 + $0x608] sm:$0xff] }
  0xe2   : > { %2556 = vmatprep.subr.bf16.mxu0 %v5383_v14  ;;  %v882_v14 = vpack.c.bf16 %v474_v63, %v466_v62  ;;  %v473_v20 = vld [vmem:[%s6031_s18 + $0x648] sm:$0xff]  ;;  %v5387_v62 = vld [vmem:[%s7991_s1 + $0x310] ss:$8 sps:$4 sm:$0xff]   ;;  %v324_v41 = vld [vmem:[%s6031_s18 + $0x1a0] sm:$0xff] }
  0xe3   : > { %4610 = vmatpush1.bf16.msra.mxu1 %v6158_v22  ;;  %v393_v22 = vld [vmem:[%s6031_s18 + $0x3c8] sm:$0xff] }
  0xe4   : > { %4595 = vmatprep.subr.bf16.mxu1 %v6171_v25  ;;  %v841_v25 = vpack.c.bf16 %v393_v22, %v385_v55  ;;  %v276_v55 = vld [vmem:[%s6031_s18 + $0x20] sm:$0xff]  ;;  %v309_v63 = vld [vmem:[%s6031_s18 + $0x128] sm:$0xff] }
  0xe5   : > { %2557 = vmatpush1.bf16.msra.mxu0 %v5381_v9  ;;  %1903 = vmatmul.mubr.bf16.gmra.mrb[20].mxu1 %v824_v49  ;;  %v890_v9 = vpack.c.bf16 %v490_v29, %v482_v28  ;;  %v277_v49 = vld [vmem:[%s6031_s18 + $0x28] sm:$0xff]  ;;  %v284_v22 = vld [vmem:[%s6031_s18 + $0x60] sm:$0xff] }
  0xe6   : > { %2879 = vmatprep.subr.bf16.mxu0 %v5386_v10  ;;  %1912 = vmatprep.mubr.bf16.mxu1 %v833_v50  ;;  %v424_v10 = vld [vmem:[%s6031_s18 + $0x4c0] sm:$0xff]  ;;  %v789_v52 = vpack.c.bf16 %v285_v19, %v277_v49  ;;  %v788_v5 = vpack.c.bf16 %v284_v22, %v276_v55  ;;  %v5405_v55 = vld [vmem:[%s7991_s1 + $0x370] ss:$8 sps:$4 sm:$0xff]   ;;  %v357_v22 = vld [vmem:[%s6031_s18 + $0x2a8] sm:$0xff] }
  0xe7   : > { %4611 = vmatpush1.bf16.msra.mxu1 %v6176_v26  ;;  %v467_v26 = vld [vmem:[%s6031_s18 + $0x618] sm:$0xff]  ;;  %v520_v49 = vld [vmem:[%s6031_s18 + $0x7c0] sm:$0xff] }
  0xe8   : > { %2286 = vmatmul.mubr.bf16.gmra.mrb[32].mxu0 %v850_v35  ;;  %4596 = vmatprep.subr.bf16.mxu1 %v6181_v27  ;;  %v384_v27 = vld [vmem:[%s6031_s18 + $0x380] sm:$0xff]  ;;  %v883_v60 = vpack.c.bf16 %v475_v58, %v467_v26  ;;  %v498_v35 = vld [vmem:[%s6031_s18 + $0x710] sm:$0xff] }
  0xe9   : > { %2295 = vmatprep.mubr.bf16.mxu0 %v859_v1  ;;  %v506_v1 = vld [vmem:[%s6031_s18 + $0x750] sm:$0xff]  ;;  %v472_v26 = vld [vmem:[%s6031_s18 + $0x640] sm:$0xff] }
  0xea   : > { %v898_v39 = vpack.c.bf16 %v506_v1, %v498_v35  ;;  %v5384_v58 = vld [vmem:[%s7991_s1 + $0x300] ss:$8 sps:$4 sm:$0xff]  }
  0xeb   : > { %4612 = vmatpush1.bf16.msra.mxu1 %v6201_v32  ;;  %v401_v32 = vld [vmem:[%s6031_s18 + $0x408] sm:$0xff] }
  0xec   : > { %4597 = vmatprep.subr.bf16.mxu1 %v6206_v33  ;;  %v840_v33 = vpack.c.bf16 %v392_v6, %v384_v27  ;;  %v849_v7 = vpack.c.bf16 %v409_v61, %v401_v32  ;;  %v481_v27 = vld [vmem:[%s6031_s18 + $0x688] sm:$0xff]  ;;  %v880_v32 = vpack.c.bf16 %v472_v26, %v464_v57  ;;  %v528_v57 = vld [vmem:[%s6031_s18 + $0x800] sm:$0xff] }
  0xed   : > { %1913 = vmatmul.mubr.bf16.gmra.mrb[24].mxu1 %v832_v56  ;;  %v293_v56 = vld [vmem:[%s6031_s18 + $0xa8] sm:$0xff]  ;;  %v536_v26 = vld [vmem:[%s6031_s18 + $0x840] sm:$0xff] }
  0xee   : > { %1922 = vmatprep.mubr.bf16.mxu1 %v841_v25  ;;  %v301_v25 = vld [vmem:[%s6031_s18 + $0xe8] sm:$0xff] }
  0xef   : > { %4613 = vmatpush1.bf16.msra.mxu1 %v6219_v36  ;;  %v483_v36 = vld [vmem:[%s6031_s18 + $0x698] sm:$0xff]  ;;  %v489_v6 = vld [vmem:[%s6031_s18 + $0x6c8] sm:$0xff] }
  0xf0   : > { %2296 = vmatmul.mubr.bf16.gmra.mrb[36].mxu0 %v858_v48  ;;  %4598 = vmatprep.subr.bf16.mxu1 %v6228_v38  ;;  %v400_v38 = vld [vmem:[%s6031_s18 + $0x400] sm:$0xff]  ;;  %v891_v8 = vpack.c.bf16 %v491_v13, %v483_v36  ;;  %v514_v48 = vld [vmem:[%s6031_s18 + $0x790] sm:$0xff]  ;;  %v889_v61 = vpack.c.bf16 %v489_v6, %v481_v27  ;;  %v317_v36 = vld [vmem:[%s6031_s18 + $0x168] sm:$0xff] }
  0xf1   : > { %2305 = vmatprep.mubr.bf16.mxu0 %v867_v18  ;;  %v522_v18 = vld [vmem:[%s6031_s18 + $0x7d0] sm:$0xff]  ;;  %v5392_v13 = vld [vmem:[%s7991_s1 + $0x324] ss:$8 sps:$4 sm:$0xff]   ;;  %v5396_v35 = vld [vmem:[%s7991_s1 + $0x340] ss:$8 sps:$4 sm:$0xff]  }
  0xf2   : > { %v906_v50 = vpack.c.bf16 %v522_v18, %v514_v48  ;;  %v513_v1 = vld [vmem:[%s6031_s18 + $0x788] sm:$0xff]  ;;  %v512_v18 = vld [vmem:[%s6031_s18 + $0x780] sm:$0xff] }
  0xf3   : > { %4614 = vmatpush1.bf16.msra.mxu1 %v6237_v40  ;;  %v417_v40 = vld [vmem:[%s6031_s18 + $0x488] sm:$0xff]  ;;  %v905_v2 = vpack.c.bf16 %v521_v12, %v513_v1  ;;  %v5417_v1 = vld [vmem:[%s7991_s1 + $0x3b0] ss:$8 sps:$4 sm:$0xff]   ;;  %v5419_v12 = vld [vmem:[%s7991_s1 + $0x3b4] ss:$8 sps:$4 sm:$0xff]  }
  0xf4   : > { %4599 = vmatprep.subr.bf16.mxu1 %v6246_v42  ;;  %v848_v42 = vpack.c.bf16 %v408_v15, %v400_v38  ;;  %v857_v24 = vpack.c.bf16 %v425_v23, %v417_v40  ;;  %v480_v38 = vld [vmem:[%s6031_s18 + $0x680] sm:$0xff]  ;;  %v497_v23 = vld [vmem:[%s6031_s18 + $0x708] sm:$0xff] }
  0xf5   : > { %1923 = vmatmul.mubr.bf16.gmra.mrb[28].mxu1 %v840_v33  ;;  %v292_v33 = vld [vmem:[%s6031_s18 + $0xa0] sm:$0xff]  ;;  %v553_v27 = vld [vmem:[%s6031_s18 + $0x8c8] sm:$0xff] }
  0xf6   : > { %1932 = vmatprep.mubr.bf16.mxu1 %v849_v7  ;;  %v300_v7 = vld [vmem:[%s6031_s18 + $0xe0] sm:$0xff] }
  0xf7   : > { %4615 = vmatpush1.bf16.msra.mxu1 %v6255_v44  ;;  %v499_v44 = vld [vmem:[%s6031_s18 + $0x718] sm:$0xff]  ;;  %v488_v15 = vld [vmem:[%s6031_s18 + $0x6c0] sm:$0xff] }
  0xf8   : > { %2306 = vmatmul.mubr.bf16.gmra.mrb[40].mxu0 %v866_v21  ;;  %4600 = vmatprep.subr.bf16.mxu1 %v6264_v46  ;;  %v416_v46 = vld [vmem:[%s6031_s18 + $0x480] sm:$0xff]  ;;  %v899_v31 = vpack.c.bf16 %v507_v30, %v499_v44  ;;  %v872_v21 = vpack.c.bf16 %v456_v4, %v448_v51  ;;  %v888_v28 = vpack.c.bf16 %v488_v15, %v480_v38  ;;  %v529_v51 = vld [vmem:[%s6031_s18 + $0x808] sm:$0xff] }
  0xf9   : > { %2315 = vmatprep.mubr.bf16.mxu0 %v875_v54  ;;  %v856_v11 = vpack.c.bf16 %v424_v10, %v416_v46  ;;  %v881_v54 = vpack.c.bf16 %v473_v20, %v465_v53  ;;  %v5390_v40 = vld [vmem:[%s7991_s1 + $0x320] ss:$8 sps:$4 sm:$0xff]   ;;  %v904_v53 = vpack.c.bf16 %v520_v49, %v512_v18 }
  0xfa   : > { %v308_v44 = vld [vmem:[%s6031_s18 + $0x120] sm:$0xff]  ;;  %v325_v46 = vld [vmem:[%s6031_s18 + $0x1a8] sm:$0xff] }
  0xfb   : > { %4616 = vmatpush1.bf16.msra.mxu1 %v6269_v47  ;;  %v441_v47 = vld [vmem:[%s6031_s18 + $0x548] sm:$0xff]  ;;  %v316_v30 = vld [vmem:[%s6031_s18 + $0x160] sm:$0xff] }
  0xfc   : > { %v865_v0 = vpack.c.bf16 %v441_v47, %v433_v34  ;;  %v333_v10 = vld [vmem:[%s6031_s18 + $0x1e8] sm:$0xff]  ;;  %v804_v34 = vpack.c.bf16 %v316_v30, %v308_v44  ;;  %v496_v47 = vld [vmem:[%s6031_s18 + $0x700] sm:$0xff] }
  0xfd   : > { %1933 = vmatmul.mubr.bf16.gmra.mrb[32].mxu1 %v848_v42  ;;  %v505_v42 = vld [vmem:[%s6031_s18 + $0x748] sm:$0xff]  ;;  %v544_v38 = vld [vmem:[%s6031_s18 + $0x880] sm:$0xff] }
  0xfe   : > { %1942 = vmatprep.mubr.bf16.mxu1 %v857_v24  ;;  %v5395_v24 = vld [vmem:[%s7991_s1 + $0x334] ss:$8 sps:$4 sm:$0xff]   ;;  %v897_v29 = vpack.c.bf16 %v505_v42, %v497_v23  ;;  %v537_v4 = vld [vmem:[%s6031_s18 + $0x848] sm:$0xff]  ;;  %v552_v15 = vld [vmem:[%s6031_s18 + $0x8c0] sm:$0xff] }
  0xff   : > { %v913_v20 = vpack.c.bf16 %v537_v4, %v529_v51  ;;  %v5408_v6 = vld [vmem:[%s7991_s1 + $0x380] ss:$8 sps:$4 sm:$0xff]  }
 0x100   : > { %2316 = vmatmul.mubr.bf16.gmra.mrb[44].mxu0 %v874_v59  ;;  %v797_v59 = vpack.c.bf16 %v301_v25, %v293_v56  ;;  %v365_v56 = vld [vmem:[%s6031_s18 + $0x2e8] sm:$0xff]  ;;  %v380_v44 = vld [vmem:[%s6031_s18 + $0x360] sm:$0xff] }
 0x101   : > { %2325 = vmatprep.mubr.bf16.mxu0 %v883_v60  ;;  %v5389_v60 = vld [vmem:[%s7991_s1 + $0x314] ss:$8 sps:$4 sm:$0xff]   ;;  %v5410_v25 = vld [vmem:[%s7991_s1 + $0x384] ss:$8 sps:$4 sm:$0xff]   ;;  %v5414_v42 = vld [vmem:[%s7991_s1 + $0x3a0] ss:$8 sps:$4 sm:$0xff]  }
 0x102   : > { %v569_v23 = vld [vmem:[%s6031_s18 + $0x948] sm:$0xff] }
 0x103   : > { %v389_v30 = vld [vmem:[%s6031_s18 + $0x3a8] sm:$0xff] }
 0x104   : > { %v421_v51 = vld [vmem:[%s6031_s18 + $0x4a8] sm:$0xff] }
 0x105   : > { %1943 = vmatmul.mubr.bf16.gmra.mrb[36].mxu1 %v856_v11  ;;  %v504_v11 = vld [vmem:[%s6031_s18 + $0x740] sm:$0xff]  ;;  %v429_v4 = vld [vmem:[%s6031_s18 + $0x4e8] sm:$0xff] }
 0x106   : > { %1952 = vmatprep.mubr.bf16.mxu1 %v865_v0  ;;  %v813_v0 = vpack.c.bf16 %v333_v10, %v325_v46  ;;  %v560_v10 = vld [vmem:[%s6031_s18 + $0x900] sm:$0xff] }
 0x108   : > { %2326 = vmatmul.mubr.bf16.gmra.mrb[48].mxu0 %v882_v14  ;;  %v796_v14 = vpack.c.bf16 %v300_v7, %v292_v33  ;;  %v356_v33 = vld [vmem:[%s6031_s18 + $0x2a0] sm:$0xff] }
 0x109   : > { %2335 = vmatprep.mubr.bf16.mxu0 %v891_v8  ;;  %v805_v8 = vpack.c.bf16 %v317_v36, %v309_v63  ;;  %v364_v7 = vld [vmem:[%s6031_s18 + $0x2e0] sm:$0xff]  ;;  %v373_v63 = vld [vmem:[%s6031_s18 + $0x328] sm:$0xff] }
 0x10a   : > { %v381_v36 = vld [vmem:[%s6031_s18 + $0x368] sm:$0xff] }
 0x10d   : > { %1953 = vmatmul.mubr.bf16.gmra.mrb[40].mxu1 %v864_v17  ;;  %v349_v17 = vld [vmem:[%s6031_s18 + $0x268] sm:$0xff] }
 0x10e   : > { %1962 = vmatprep.mubr.bf16.mxu1 %v873_v3  ;;  %v5404_v3 = vld [vmem:[%s7991_s1 + $0x364] ss:$8 sps:$4 sm:$0xff]   ;;  %v821_v19 = vpack.c.bf16 %v349_v17, %v341_v45 }
 0x10f   : > { %v584_v45 = vld [vmem:[%s6031_s18 + $0x9c0] sm:$0xff] }
 0x110   : > { %2336 = vmatmul.mubr.bf16.gmra.mrb[52].mxu0 %v890_v9  ;;  %v5393_v9 = vld [vmem:[%s7991_s1 + $0x330] ss:$8 sps:$4 sm:$0xff]  }
 0x111   : > { %2345 = vmatprep.mubr.bf16.mxu0 %v899_v31  ;;  %v5398_v31 = vld [vmem:[%s7991_s1 + $0x344] ss:$8 sps:$4 sm:$0xff]  }
 0x115   : > { %1963 = vmatmul.mubr.bf16.gmra.mrb[44].mxu1 %v872_v21  ;;  %v340_v21 = vld [vmem:[%s6031_s18 + $0x220] sm:$0xff] }
 0x116   : > { %1972 = vmatprep.mubr.bf16.mxu1 %v881_v54  ;;  %v348_v54 = vld [vmem:[%s6031_s18 + $0x260] sm:$0xff] }
 0x118   : > { %2346 = vmatmul.mubr.bf16.gmra.mrb[56].mxu0 %v898_v39  ;;  %v896_v39 = vpack.c.bf16 %v504_v11, %v496_v47  ;;  %v577_v47 = vld [vmem:[%s6031_s18 + $0x988] sm:$0xff] }
 0x119   : > { %2355 = vmatprep.mubr.bf16.mxu0 %v907_v16  ;;  %v332_v16 = vld [vmem:[%s6031_s18 + $0x1e0] sm:$0xff]  ;;  %v585_v11 = vld [vmem:[%s6031_s18 + $0x9c8] sm:$0xff] }
 0x11a   : > { %v812_v48 = vpack.c.bf16 %v332_v16, %v324_v41  ;;  %v413_v41 = vld [vmem:[%s6031_s18 + $0x468] sm:$0xff] }
 0x11d   : > { %1973 = vmatmul.mubr.bf16.gmra.mrb[48].mxu1 %v880_v32  ;;  %v912_v32 = vpack.c.bf16 %v536_v26, %v528_v57  ;;  %v420_v57 = vld [vmem:[%s6031_s18 + $0x4a0] sm:$0xff] }
 0x11e   : > { %1982 = vmatprep.mubr.bf16.mxu1 %v889_v61  ;;  %v428_v26 = vld [vmem:[%s6031_s18 + $0x4e0] sm:$0xff] }
 0x120   : > { %2356 = vmatmul.mubr.bf16.gmra.mrb[60].mxu0 %v906_v50  ;;  %v5402_v50 = vld [vmem:[%s7991_s1 + $0x360] ss:$8 sps:$4 sm:$0xff]  }
 0x121   : > { %2558 = vmatprep.mubr.bf16.mxu0 %v789_v52  ;;  %v5407_v52 = vld [vmem:[%s7991_s1 + $0x374] ss:$8 sps:$4 sm:$0xff]  }
 0x125   : > { %1983 = vmatmul.mubr.bf16.gmra.mrb[52].mxu1 %v888_v28 }
 0x126   : > { %1992 = vmatprep.mubr.bf16.mxu1 %v897_v29  ;;  %v372_v29 = vld [vmem:[%s6031_s18 + $0x320] sm:$0xff] }
 0x127   : > { %v836_v46 = vpack.c.bf16 %v380_v44, %v372_v29  ;;  %v5423_v29 = vld [vmem:[%s7991_s1 + $0x3d0] ss:$8 sps:$4 sm:$0xff]   ;;  %v5425_v44 = vld [vmem:[%s7991_s1 + $0x3d4] ss:$8 sps:$4 sm:$0xff]  }
 0x128   : > { %2559 = vmatmul.mubr.bf16.vlgmr.msra.gmra.mrb[0].mxu0 %v788_v5  ;;  %v820_v5 = vpack.c.bf16 %v348_v54, %v340_v21  ;;  %v861_v21 = vpack.c.bf16 %v429_v4, %v421_v51  ;;  %v609_v54 = vld [vmem:[%s6031_s18 + $0xa88] sm:$0xff]  ;;  %v484_v51 = vld [vmem:[%s6031_s18 + $0x6a0] sm:$0xff] }
 0x129   : > { %2880 = vmatpush1.bf16.msra.mxu0 %v5384_v58  ;;  %2568 = vmatprep.mubr.bf16.mxu0 %v797_v59  ;;  %v829_v58 = vpack.c.bf16 %v365_v56, %v357_v22  ;;  %v545_v59 = vld [vmem:[%s6031_s18 + $0x888] sm:$0xff]  ;;  %v492_v4 = vld [vmem:[%s6031_s18 + $0x6e0] sm:$0xff] }
 0x12a   : > { %2881 = vmatprep.subr.bf16.mxu0 %v5389_v60  ;;  %v5413_v60 = vld [vmem:[%s7991_s1 + $0x394] ss:$8 sps:$4 sm:$0xff]   ;;  %v921_v61 = vpack.c.bf16 %v553_v27, %v545_v59  ;;  %v445_v59 = vld [vmem:[%s6031_s18 + $0x568] sm:$0xff]  ;;  %v860_v27 = vpack.c.bf16 %v428_v26, %v420_v57  ;;  %v500_v57 = vld [vmem:[%s6031_s18 + $0x720] sm:$0xff] }
 0x12b   : > { %v508_v26 = vld [vmem:[%s6031_s18 + $0x760] sm:$0xff] }
 0x12d   : > { %2882 = vmatpush1.bf16.msra.mxu0 %v5387_v62  ;;  %1993 = vmatmul.mubr.bf16.gmra.mrb[56].mxu1 %v896_v39  ;;  %v5411_v62 = vld [vmem:[%s7991_s1 + $0x390] ss:$8 sps:$4 sm:$0xff]   ;;  %v396_v39 = vld [vmem:[%s6031_s18 + $0x3e0] sm:$0xff] }
 0x12e   : > { %2883 = vmatprep.subr.bf16.mxu0 %v5392_v13  ;;  %2002 = vmatprep.mubr.bf16.mxu1 %v905_v2  ;;  %v5416_v13 = vld [vmem:[%s7991_s1 + $0x3a4] ss:$8 sps:$4 sm:$0xff]  }
 0x12f   : > { %v405_v2 = vld [vmem:[%s6031_s18 + $0x428] sm:$0xff] }
 0x130   : > { %2569 = vmatmul.mubr.bf16.gmra.mrb[4].mxu0 %v796_v14  ;;  %v828_v14 = vpack.c.bf16 %v364_v7, %v356_v33  ;;  %v853_v17 = vpack.c.bf16 %v413_v41, %v405_v2  ;;  %v633_v33 = vld [vmem:[%s6031_s18 + $0xb48] sm:$0xff] }
 0x131   : > { %2578 = vmatprep.mubr.bf16.mxu0 %v805_v8  ;;  %2884 = vmatpush1.bf16.msra.mxu0 %v5390_v40  ;;  %v837_v8 = vpack.c.bf16 %v381_v36, %v373_v63  ;;  %v561_v40 = vld [vmem:[%s6031_s18 + $0x908] sm:$0xff]  ;;  %v436_v63 = vld [vmem:[%s6031_s18 + $0x520] sm:$0xff] }
 0x132   : > { %2885 = vmatprep.subr.bf16.mxu0 %v5395_v24  ;;  %v920_v24 = vpack.c.bf16 %v552_v15, %v544_v38  ;;  %v929_v28 = vpack.c.bf16 %v569_v23, %v561_v40  ;;  %v444_v36 = vld [vmem:[%s6031_s18 + $0x560] sm:$0xff]  ;;  %v641_v23 = vld [vmem:[%s6031_s18 + $0xb88] sm:$0xff] }
 0x133   : > { %v868_v38 = vpack.c.bf16 %v444_v36, %v436_v63  ;;  %v624_v15 = vld [vmem:[%s6031_s18 + $0xb00] sm:$0xff]  ;;  %v485_v2 = vld [vmem:[%s6031_s18 + $0x6a8] sm:$0xff]  ;;  %v5429_v63 = vld [vmem:[%s7991_s1 + $0x3f0] ss:$8 sps:$4 sm:$0xff]  }
 0x134   : > { %v493_v41 = vld [vmem:[%s6031_s18 + $0x6e8] sm:$0xff]  ;;  %v5431_v36 = vld [vmem:[%s7991_s1 + $0x3f4] ss:$8 sps:$4 sm:$0xff]  }
 0x135   : > { %2886 = vmatpush1.bf16.msra.mxu0 %v5393_v9  ;;  %2003 = vmatmul.mubr.bf16.gmra.mrb[60].mxu1 %v904_v53  ;;  %v397_v9 = vld [vmem:[%s6031_s18 + $0x3e8] sm:$0xff]  ;;  %v592_v53 = vld [vmem:[%s6031_s18 + $0xa00] sm:$0xff] }
 0x136   : > { %2887 = vmatprep.subr.bf16.mxu0 %v5398_v31  ;;  %2012 = vmatprep.mubr.bf16.mxu1 %v913_v20  ;;  %v568_v31 = vld [vmem:[%s6031_s18 + $0x940] sm:$0xff] }
 0x137   : > { %v600_v20 = vld [vmem:[%s6031_s18 + $0xa40] sm:$0xff] }
 0x138   : > { %2579 = vmatmul.mubr.bf16.gmra.mrb[8].mxu0 %v804_v34  ;;  %v845_v34 = vpack.c.bf16 %v397_v9, %v389_v30  ;;  %v944_v22 = vpack.c.bf16 %v600_v20, %v592_v53  ;;  %v452_v30 = vld [vmem:[%s6031_s18 + $0x5a0] sm:$0xff]  ;;  %v509_v53 = vld [vmem:[%s6031_s18 + $0x768] sm:$0xff]  ;;  %v892_v20 = vpack.c.bf16 %v492_v4, %v484_v51 }
 0x139   : > { %2588 = vmatprep.mubr.bf16.mxu0 %v813_v0  ;;  %2888 = vmatpush1.bf16.msra.mxu0 %v5396_v35  ;;  %v928_v0 = vpack.c.bf16 %v568_v31, %v560_v10  ;;  %v937_v35 = vpack.c.bf16 %v585_v11, %v577_v47  ;;  %v460_v9 = vld [vmem:[%s6031_s18 + $0x5e0] sm:$0xff]  ;;  %v477_v10 = vld [vmem:[%s6031_s18 + $0x668] sm:$0xff] }
 0x13a   : > { %2889 = vmatprep.subr.bf16.mxu0 %v5401_v37  ;;  %v388_v37 = vld [vmem:[%s6031_s18 + $0x3a0] sm:$0xff]  ;;  %v876_v31 = vpack.c.bf16 %v460_v9, %v452_v30  ;;  %v581_v51 = vld [vmem:[%s6031_s18 + $0x9a8] sm:$0xff] }
 0x13b   : > { %v844_v16 = vpack.c.bf16 %v396_v39, %v388_v37  ;;  %v648_v47 = vld [vmem:[%s6031_s18 + $0xbc0] sm:$0xff]  ;;  %v589_v4 = vld [vmem:[%s6031_s18 + $0x9e8] sm:$0xff] }
 0x13c   : > { %v468_v37 = vld [vmem:[%s6031_s18 + $0x620] sm:$0xff] }
 0x13d   : > { %2890 = vmatpush1.bf16.msra.mxu0 %v5399_v43  ;;  %2013 = vmatmul.mubr.bf16.gmra.mrb[64].mxu1 %v912_v32  ;;  %v576_v43 = vld [vmem:[%s6031_s18 + $0x980] sm:$0xff] }
 0x13e   : > { %2891 = vmatprep.subr.bf16.mxu0 %v5404_v3  ;;  %2022 = vmatprep.mubr.bf16.mxu1 %v921_v61  ;;  %v593_v3 = vld [vmem:[%s6031_s18 + $0xa08] sm:$0xff]  ;;  %v936_v18 = vpack.c.bf16 %v584_v45, %v576_v43  ;;  %v476_v39 = vld [vmem:[%s6031_s18 + $0x660] sm:$0xff] }
 0x13f   : > { %v625_v61 = vld [vmem:[%s6031_s18 + $0xb08] sm:$0xff]  ;;  %v656_v43 = vld [vmem:[%s6031_s18 + $0xc00] sm:$0xff] }
 0x140   : > { %2589 = vmatmul.mubr.bf16.gmra.mrb[12].mxu0 %v812_v48  ;;  %v601_v48 = vld [vmem:[%s6031_s18 + $0xa48] sm:$0xff]  ;;  %v664_v45 = vld [vmem:[%s6031_s18 + $0xc40] sm:$0xff] }
 0x141   : > { %2598 = vmatprep.mubr.bf16.mxu0 %v821_v19  ;;  %2892 = vmatpush1.bf16.msra.mxu0 %v5402_v50  ;;  %v945_v49 = vpack.c.bf16 %v601_v48, %v593_v3  ;;  %v404_v19 = vld [vmem:[%s6031_s18 + $0x420] sm:$0xff]  ;;  %v673_v3 = vld [vmem:[%s6031_s18 + $0xc88] sm:$0xff] }
 0x142   : > { %2893 = vmatprep.subr.bf16.mxu0 %v5407_v52  ;;  %v412_v50 = vld [vmem:[%s6031_s18 + $0x460] sm:$0xff]  ;;  %v681_v48 = vld [vmem:[%s6031_s18 + $0xcc8] sm:$0xff] }
 0x143   : > { %v852_v52 = vpack.c.bf16 %v412_v50, %v404_v19  ;;  %v5426_v19 = vld [vmem:[%s7991_s1 + $0x3e0] ss:$8 sps:$4 sm:$0xff]   ;;  %v5428_v50 = vld [vmem:[%s7991_s1 + $0x3e4] ss:$8 sps:$4 sm:$0xff]  }
 0x144   : > { %v532_v30 = vld [vmem:[%s6031_s18 + $0x820] sm:$0xff] }
 0x145   : > { %2894 = vmatpush1.bf16.msra.mxu0 %v5405_v55  ;;  %2023 = vmatmul.mubr.bf16.gmra.mrb[68].mxu1 %v920_v24  ;;  %v617_v55 = vld [vmem:[%s6031_s18 + $0xac8] sm:$0xff]  ;;  %v540_v9 = vld [vmem:[%s6031_s18 + $0x860] sm:$0xff] }
 0x146   : > { %2895 = vmatprep.subr.bf16.mxu0 %v5410_v25  ;;  %2032 = vmatprep.mubr.bf16.mxu1 %v929_v28  ;;  %v953_v56 = vpack.c.bf16 %v617_v55, %v609_v54  ;;  %v5420_v25 = vld [vmem:[%s7991_s1 + $0x3c0] ss:$8 sps:$4 sm:$0xff]  }
 0x147   : > { %v680_v54 = vld [vmem:[%s6031_s18 + $0xcc0] sm:$0xff] }
 0x148   : > { %2599 = vmatmul.mubr.bf16.gmra.mrb[16].mxu0 %v820_v5  ;;  %v5422_v5 = vld [vmem:[%s7991_s1 + $0x3c4] ss:$8 sps:$4 sm:$0xff]  }
 0x149   : > { %2608 = vmatprep.mubr.bf16.mxu0 %v829_v58  ;;  %2896 = vmatpush1.bf16.msra.mxu0 %v5408_v6  ;;  %v437_v58 = vld [vmem:[%s6031_s18 + $0x528] sm:$0xff]  ;;  %v608_v6 = vld [vmem:[%s6031_s18 + $0xa80] sm:$0xff] }
 0x14a   : > { %2897 = vmatprep.subr.bf16.mxu0 %v5413_v60  ;;  %v616_v60 = vld [vmem:[%s6031_s18 + $0xac0] sm:$0xff]  ;;  %v869_v32 = vpack.c.bf16 %v445_v59, %v437_v58  ;;  %v517_v58 = vld [vmem:[%s6031_s18 + $0x7a8] sm:$0xff] }
 0x14b   : > { %v952_v7 = vpack.c.bf16 %v616_v60, %v608_v6  ;;  %v525_v59 = vld [vmem:[%s6031_s18 + $0x7e8] sm:$0xff]  ;;  %v688_v6 = vld [vmem:[%s6031_s18 + $0xd00] sm:$0xff] }
 0x14c   : > { %v696_v60 = vld [vmem:[%s6031_s18 + $0xd40] sm:$0xff] }
 0x14d   : > { %2898 = vmatpush1.bf16.msra.mxu0 %v5411_v62  ;;  %2033 = vmatmul.mubr.bf16.gmra.mrb[72].mxu1 %v928_v0  ;;  %v961_v62 = vpack.c.bf16 %v633_v33, %v625_v61  ;;  %v657_v0 = vld [vmem:[%s6031_s18 + $0xc08] sm:$0xff] }
 0x14e   : > { %2899 = vmatprep.subr.bf16.mxu0 %v5416_v13  ;;  %2042 = vmatprep.mubr.bf16.mxu1 %v937_v35  ;;  %v453_v13 = vld [vmem:[%s6031_s18 + $0x5a8] sm:$0xff] }
 0x14f   : > { %v665_v35 = vld [vmem:[%s6031_s18 + $0xc48] sm:$0xff] }
 0x150   : > { %2609 = vmatmul.mubr.bf16.gmra.mrb[20].mxu0 %v828_v14  ;;  %v461_v14 = vld [vmem:[%s6031_s18 + $0x5e8] sm:$0xff] }
 0x151   : > { %2618 = vmatprep.mubr.bf16.mxu0 %v837_v8  ;;  %2900 = vmatpush1.bf16.msra.mxu0 %v5414_v42  ;;  %v632_v8 = vld [vmem:[%s6031_s18 + $0xb40] sm:$0xff]  ;;  %v877_v40 = vpack.c.bf16 %v461_v14, %v453_v13  ;;  %v649_v42 = vld [vmem:[%s6031_s18 + $0xbc8] sm:$0xff] }
 0x152   : > { %2901 = vmatprep.subr.bf16.mxu0 %v5419_v12  ;;  %v960_v24 = vpack.c.bf16 %v632_v8, %v624_v15  ;;  %v969_v28 = vpack.c.bf16 %v649_v42, %v641_v23  ;;  %v977_v12 = vpack.c.bf16 %v665_v35, %v657_v0  ;;  %v705_v61 = vld [vmem:[%s6031_s18 + $0xd88] sm:$0xff]  ;;  %v516_v13 = vld [vmem:[%s6031_s18 + $0x7a0] sm:$0xff] }
 0x153   : > { %v713_v33 = vld [vmem:[%s6031_s18 + $0xdc8] sm:$0xff]  ;;  %v524_v14 = vld [vmem:[%s6031_s18 + $0x7e0] sm:$0xff] }
 0x154   : > { %v541_v15 = vld [vmem:[%s6031_s18 + $0x868] sm:$0xff]  ;;  %v908_v8 = vpack.c.bf16 %v524_v14, %v516_v13  ;;  %v712_v23 = vld [vmem:[%s6031_s18 + $0xdc0] sm:$0xff]  ;;  %v530_v14 = vld [vmem:[%s6031_s18 + $0x810] sm:$0xff] }
 0x155   : > { %2902 = vmatpush1.bf16.msra.mxu0 %v5417_v1  ;;  %2043 = vmatmul.mubr.bf16.gmra.mrb[76].mxu1 %v936_v18  ;;  %v976_v18 = vpack.c.bf16 %v664_v45, %v656_v43  ;;  %v737_v0 = vld [vmem:[%s6031_s18 + $0xe88] sm:$0xff]  ;;  %v736_v43 = vld [vmem:[%s6031_s18 + $0xe80] sm:$0xff] }
 0x156   : > { %2052 = vmatprep.mubr.bf16.mxu1 %v945_v49  ;;  %2903 = vmatprep.subr.bf16.mxu0 %v5422_v5  ;;  %v985_v49 = vpack.c.bf16 %v681_v48, %v673_v3  ;;  %v745_v35 = vld [vmem:[%s6031_s18 + $0xec8] sm:$0xff]  ;;  %v744_v45 = vld [vmem:[%s6031_s18 + $0xec0] sm:$0xff] }
 0x157   : > { %v753_v3 = vld [vmem:[%s6031_s18 + $0xf08] sm:$0xff] }
 0x158   : > { %2619 = vmatmul.mubr.bf16.gmra.mrb[24].mxu0 %v836_v46  ;;  %v469_v46 = vld [vmem:[%s6031_s18 + $0x628] sm:$0xff] }
 0x159   : > { %2628 = vmatprep.mubr.bf16.mxu0 %v845_v34  ;;  %2904 = vmatpush1.bf16.msra.mxu0 %v5420_v25  ;;  %v640_v34 = vld [vmem:[%s6031_s18 + $0xb80] sm:$0xff]  ;;  %v885_v11 = vpack.c.bf16 %v477_v10, %v469_v46  ;;  %v549_v46 = vld [vmem:[%s6031_s18 + $0x8a8] sm:$0xff] }
 0x15a   : > { %2905 = vmatprep.subr.bf16.mxu0 %v5425_v44  ;;  %v968_v1 = vpack.c.bf16 %v648_v47, %v640_v34  ;;  %v557_v10 = vld [vmem:[%s6031_s18 + $0x8e8] sm:$0xff]  ;;  %v720_v34 = vld [vmem:[%s6031_s18 + $0xe00] sm:$0xff] }
 0x15b   : > { %v728_v47 = vld [vmem:[%s6031_s18 + $0xe40] sm:$0xff]  ;;  %v761_v48 = vld [vmem:[%s6031_s18 + $0xf48] sm:$0xff] }
 0x15d   : > { %2053 = vmatmul.mubr.bf16.gmra.mrb[80].mxu1 %v944_v22  ;;  %2906 = vmatpush1.bf16.msra.mxu0 %v5423_v29  ;;  %v689_v22 = vld [vmem:[%s6031_s18 + $0xd08] sm:$0xff] }
 0x15e   : > { %2062 = vmatprep.mubr.bf16.mxu1 %v953_v56  ;;  %2907 = vmatprep.subr.bf16.mxu0 %v5428_v50  ;;  %v697_v56 = vld [vmem:[%s6031_s18 + $0xd48] sm:$0xff]  ;;  %v572_v50 = vld [vmem:[%s6031_s18 + $0x960] sm:$0xff] }
 0x15f   : > { %v993_v5 = vpack.c.bf16 %v697_v56, %v689_v22 }
 0x160   : > { %2629 = vmatmul.mubr.bf16.gmra.mrb[28].mxu0 %v844_v16  ;;  %v884_v16 = vpack.c.bf16 %v476_v39, %v468_v37  ;;  %v548_v37 = vld [vmem:[%s6031_s18 + $0x8a0] sm:$0xff] }
 0x161   : > { %2638 = vmatprep.mubr.bf16.mxu0 %v853_v17  ;;  %v893_v17 = vpack.c.bf16 %v493_v41, %v485_v2  ;;  %2908 = vmatpush1.bf16.msra.mxu0 %v5426_v19  ;;  %v556_v39 = vld [vmem:[%s6031_s18 + $0x8e0] sm:$0xff]  ;;  %v565_v2 = vld [vmem:[%s6031_s18 + $0x928] sm:$0xff] }
 0x162   : > { %2909 = vmatprep.subr.bf16.mxu0 %v5431_v36  ;;  %v573_v41 = vld [vmem:[%s6031_s18 + $0x968] sm:$0xff]  ;;  %v564_v19 = vld [vmem:[%s6031_s18 + $0x920] sm:$0xff] }
 0x163   : > { %v621_v36 = vld [vmem:[%s6031_s18 + $0xae8] sm:$0xff] }
 0x165   : > { %2063 = vmatmul.mubr.bf16.gmra.mrb[84].mxu1 %v952_v7  ;;  %v992_v7 = vpack.c.bf16 %v696_v60, %v688_v6  ;;  %2910 = vmatpush1.bf16.msra.mxu0 %v5429_v63  ;;  %v531_v60 = vld [vmem:[%s6031_s18 + $0x818] sm:$0xff]  ;;  %v613_v63 = vld [vmem:[%s6031_s18 + $0xaa8] sm:$0xff] }
 0x166   : > { %2072 = vmatprep.mubr.bf16.mxu1 %v961_v62  ;;  %v1001_v62 = vpack.c.bf16 %v713_v33, %v705_v61 }
 0x168   : > { %2639 = vmatmul.mubr.bf16.gmra.mrb[32].mxu0 %v852_v52  ;;  %v501_v52 = vld [vmem:[%s6031_s18 + $0x728] sm:$0xff] }
 0x169   : > { %2648 = vmatprep.mubr.bf16.mxu0 %v861_v21  ;;  %v672_v21 = vld [vmem:[%s6031_s18 + $0xc80] sm:$0xff]  ;;  %v901_v55 = vpack.c.bf16 %v509_v53, %v501_v52  ;;  %v932_v52 = vpack.c.bf16 %v572_v50, %v564_v19  ;;  %v669_v19 = vld [vmem:[%s6031_s18 + $0xc68] sm:$0xff] }
 0x16a   : > { %v984_v25 = vpack.c.bf16 %v680_v54, %v672_v21  ;;  %v752_v53 = vld [vmem:[%s6031_s18 + $0xf00] sm:$0xff]  ;;  %v941_v21 = vpack.c.bf16 %v589_v4, %v581_v51  ;;  %v769_v54 = vld [vmem:[%s6031_s18 + $0xf88] sm:$0xff]  ;;  %v578_v51 = vld [vmem:[%s6031_s18 + $0x990] sm:$0xff] }
 0x16b   : > { %v586_v4 = vld [vmem:[%s6031_s18 + $0x9d0] sm:$0xff] }
 0x16d   : > { %2073 = vmatmul.mubr.bf16.gmra.mrb[88].mxu1 %v960_v24  ;;  %v721_v24 = vld [vmem:[%s6031_s18 + $0xe08] sm:$0xff] }
 0x16e   : > { %2082 = vmatprep.mubr.bf16.mxu1 %v969_v28  ;;  %v729_v28 = vld [vmem:[%s6031_s18 + $0xe48] sm:$0xff] }
 0x16f   : > { %v1009_v44 = vpack.c.bf16 %v729_v28, %v721_v24  ;;  %v612_v24 = vld [vmem:[%s6031_s18 + $0xaa0] sm:$0xff] }
 0x170   : > { %2649 = vmatmul.mubr.bf16.gmra.mrb[36].mxu0 %v860_v27  ;;  %v900_v27 = vpack.c.bf16 %v508_v26, %v500_v57  ;;  %v597_v57 = vld [vmem:[%s6031_s18 + $0xa28] sm:$0xff]  ;;  %v620_v28 = vld [vmem:[%s6031_s18 + $0xae0] sm:$0xff] }
 0x171   : > { %2658 = vmatprep.mubr.bf16.mxu0 %v869_v32  ;;  %v909_v32 = vpack.c.bf16 %v525_v59, %v517_v58  ;;  %v605_v26 = vld [vmem:[%s6031_s18 + $0xa68] sm:$0xff]  ;;  %v768_v59 = vld [vmem:[%s6031_s18 + $0xf80] sm:$0xff] }
 0x172   : > { %v949_v6 = vpack.c.bf16 %v605_v26, %v597_v57  ;;  %v685_v57 = vld [vmem:[%s6031_s18 + $0xce8] sm:$0xff] }
 0x175   : > { %2083 = vmatmul.mubr.bf16.gmra.mrb[92].mxu1 %v968_v1  ;;  %v1008_v1 = vpack.c.bf16 %v728_v47, %v720_v34  ;;  %v571_v34 = vld [vmem:[%s6031_s18 + $0x958] sm:$0xff] }
 0x176   : > { %2092 = vmatprep.mubr.bf16.mxu1 %v977_v12  ;;  %v1017_v12 = vpack.c.bf16 %v745_v35, %v737_v0  ;;  %v628_v0 = vld [vmem:[%s6031_s18 + $0xb20] sm:$0xff] }
 0x177   : > { %v636_v35 = vld [vmem:[%s6031_s18 + $0xb60] sm:$0xff] }
 0x178   : > { %2659 = vmatmul.mubr.bf16.gmra.mrb[40].mxu0 %v868_v38  ;;  %v533_v38 = vld [vmem:[%s6031_s18 + $0x828] sm:$0xff] }
 0x179   : > { %2668 = vmatprep.mubr.bf16.mxu0 %v877_v40  ;;  %v704_v40 = vld [vmem:[%s6031_s18 + $0xd80] sm:$0xff]  ;;  %v917_v42 = vpack.c.bf16 %v541_v15, %v533_v38  ;;  %v538_v38 = vld [vmem:[%s6031_s18 + $0x850] sm:$0xff]  ;;  %v957_v15 = vpack.c.bf16 %v621_v36, %v613_v63 }
 0x17a   : > { %v1000_v29 = vpack.c.bf16 %v712_v23, %v704_v40  ;;  %v555_v40 = vld [vmem:[%s6031_s18 + $0x8d8] sm:$0xff]  ;;  %v914_v23 = vpack.c.bf16 %v538_v38, %v530_v14  ;;  %v676_v63 = vld [vmem:[%s6031_s18 + $0xca0] sm:$0xff]  ;;  %v693_v14 = vld [vmem:[%s6031_s18 + $0xd28] sm:$0xff] }
 0x17b   : > { %v684_v36 = vld [vmem:[%s6031_s18 + $0xce0] sm:$0xff]  ;;  %v701_v38 = vld [vmem:[%s6031_s18 + $0xd68] sm:$0xff] }
 0x17d   : > { %2093 = vmatmul.mubr.bf16.gmra.mrb[96].mxu1 %v976_v18  ;;  %v1016_v18 = vpack.c.bf16 %v744_v45, %v736_v43  ;;  %v587_v43 = vld [vmem:[%s6031_s18 + $0x9d8] sm:$0xff] }
 0x17e   : > { %2102 = vmatprep.mubr.bf16.mxu1 %v985_v49  ;;  %v1025_v49 = vpack.c.bf16 %v761_v48, %v753_v3  ;;  %v644_v3 = vld [vmem:[%s6031_s18 + $0xba0] sm:$0xff] }
 0x17f   : > { %v652_v48 = vld [vmem:[%s6031_s18 + $0xbe0] sm:$0xff] }
 0x180   : > { %2669 = vmatmul.mubr.bf16.gmra.mrb[44].mxu0 %v876_v31  ;;  %v916_v31 = vpack.c.bf16 %v540_v9, %v532_v30  ;;  %v956_v30 = vpack.c.bf16 %v620_v28, %v612_v24  ;;  %v546_v9 = vld [vmem:[%s6031_s18 + $0x890] sm:$0xff]  ;;  %v972_v50 = vpack.c.bf16 %v652_v48, %v644_v3  ;;  %v997_v24 = vpack.c.bf16 %v701_v38, %v693_v14  ;;  %v627_v28 = vld [vmem:[%s6031_s18 + $0xb18] sm:$0xff]  ;;  %v725_v48 = vld [vmem:[%s6031_s18 + $0xe28] sm:$0xff] }
 0x181   : > { %2678 = vmatprep.mubr.bf16.mxu0 %v885_v11  ;;  %v925_v11 = vpack.c.bf16 %v557_v10, %v549_v46  ;;  %v554_v46 = vld [vmem:[%s6031_s18 + $0x8d0] sm:$0xff]  ;;  %v683_v14 = vld [vmem:[%s6031_s18 + $0xcd8] sm:$0xff] }
 0x182   : > { %v922_v47 = vpack.c.bf16 %v554_v46, %v546_v9  ;;  %v692_v46 = vld [vmem:[%s6031_s18 + $0xd20] sm:$0xff] }
 0x185   : > { %2103 = vmatmul.mubr.bf16.gmra.mrb[100].mxu1 %v984_v25  ;;  %v580_v25 = vld [vmem:[%s6031_s18 + $0x9a0] sm:$0xff] }
 0x186   : > { %2112 = vmatprep.mubr.bf16.mxu1 %v993_v5  ;;  %v588_v5 = vld [vmem:[%s6031_s18 + $0x9e0] sm:$0xff] }
 0x187   : > { %v940_v58 = vpack.c.bf16 %v588_v5, %v580_v25  ;;  %v677_v5 = vld [vmem:[%s6031_s18 + $0xca8] sm:$0xff] }
 0x188   : > { %2679 = vmatmul.mubr.bf16.gmra.mrb[48].mxu0 %v884_v16  ;;  %v924_v16 = vpack.c.bf16 %v556_v39, %v548_v37  ;;  %v964_v37 = vpack.c.bf16 %v636_v35, %v628_v0  ;;  %v562_v39 = vld [vmem:[%s6031_s18 + $0x910] sm:$0xff] }
 0x189   : > { %2688 = vmatprep.mubr.bf16.mxu0 %v893_v17  ;;  %v933_v17 = vpack.c.bf16 %v573_v41, %v565_v2  ;;  %v570_v2 = vld [vmem:[%s6031_s18 + $0x950] sm:$0xff] }
 0x18a   : > { %v930_v45 = vpack.c.bf16 %v570_v2, %v562_v39  ;;  %v643_v39 = vld [vmem:[%s6031_s18 + $0xb98] sm:$0xff] }
 0x18b   : > { %v651_v2 = vld [vmem:[%s6031_s18 + $0xbd8] sm:$0xff] }
 0x18d   : > { %2113 = vmatmul.mubr.bf16.gmra.mrb[104].mxu1 %v992_v7  ;;  %v596_v7 = vld [vmem:[%s6031_s18 + $0xa20] sm:$0xff] }
 0x18e   : > { %2122 = vmatprep.mubr.bf16.mxu1 %v1001_v62  ;;  %v604_v62 = vld [vmem:[%s6031_s18 + $0xa60] sm:$0xff] }
 0x18f   : > { %v948_v13 = vpack.c.bf16 %v604_v62, %v596_v7 }
 0x190   : > { %2689 = vmatmul.mubr.bf16.gmra.mrb[52].mxu0 %v892_v20  ;;  %v760_v20 = vld [vmem:[%s6031_s18 + $0xf40] sm:$0xff] }
 0x191   : > { %2698 = vmatprep.mubr.bf16.mxu0 %v901_v55  ;;  %v777_v55 = vld [vmem:[%s6031_s18 + $0xfc8] sm:$0xff]  ;;  %v1024_v22 = vpack.c.bf16 %v760_v20, %v752_v53  ;;  %v595_v53 = vld [vmem:[%s6031_s18 + $0xa18] sm:$0xff] }
 0x192   : > { %v1033_v56 = vpack.c.bf16 %v777_v55, %v769_v54  ;;  %v603_v20 = vld [vmem:[%s6031_s18 + $0xa58] sm:$0xff] }
 0x193   : > { %v947_v54 = vpack.c.bf16 %v603_v20, %v595_v53  ;;  %v659_v20 = vld [vmem:[%s6031_s18 + $0xc18] sm:$0xff] }
 0x195   : > { %2123 = vmatmul.mubr.bf16.gmra.mrb[108].mxu1 %v1000_v29  ;;  %v629_v29 = vld [vmem:[%s6031_s18 + $0xb28] sm:$0xff] }
 0x196   : > { %2132 = vmatprep.mubr.bf16.mxu1 %v1009_v44  ;;  %v637_v44 = vld [vmem:[%s6031_s18 + $0xb68] sm:$0xff] }
 0x197   : > { %v965_v10 = vpack.c.bf16 %v637_v44, %v629_v29  ;;  %v635_v29 = vld [vmem:[%s6031_s18 + $0xb58] sm:$0xff] }
 0x198   : > { %2699 = vmatmul.mubr.bf16.gmra.mrb[56].mxu0 %v900_v27  ;;  %v776_v27 = vld [vmem:[%s6031_s18 + $0xfc0] sm:$0xff] }
 0x199   : > { %2708 = vmatprep.mubr.bf16.mxu0 %v909_v32  ;;  %v539_v32 = vld [vmem:[%s6031_s18 + $0x858] sm:$0xff]  ;;  %v1032_v61 = vpack.c.bf16 %v776_v27, %v768_v59  ;;  %v594_v27 = vld [vmem:[%s6031_s18 + $0xa10] sm:$0xff] }
 0x19a   : > { %v915_v33 = vpack.c.bf16 %v539_v32, %v531_v60  ;;  %v989_v60 = vpack.c.bf16 %v685_v57, %v677_v5  ;;  %v611_v32 = vld [vmem:[%s6031_s18 + $0xa98] sm:$0xff]  ;;  %v724_v5 = vld [vmem:[%s6031_s18 + $0xe20] sm:$0xff] }
 0x19b   : > { %v732_v57 = vld [vmem:[%s6031_s18 + $0xe60] sm:$0xff] }
 0x19d   : > { %2133 = vmatmul.mubr.bf16.gmra.mrb[112].mxu1 %v1008_v1  ;;  %v645_v1 = vld [vmem:[%s6031_s18 + $0xba8] sm:$0xff] }
 0x19e   : > { %2142 = vmatprep.mubr.bf16.mxu1 %v1017_v12  ;;  %v653_v12 = vld [vmem:[%s6031_s18 + $0xbe8] sm:$0xff] }
 0x19f   : > { %v973_v41 = vpack.c.bf16 %v653_v12, %v645_v1  ;;  %v626_v1 = vld [vmem:[%s6031_s18 + $0xb10] sm:$0xff] }
 0x1a0   : > { %2709 = vmatmul.mubr.bf16.gmra.mrb[60].mxu0 %v908_v8  ;;  %v547_v8 = vld [vmem:[%s6031_s18 + $0x898] sm:$0xff]  ;;  %v634_v12 = vld [vmem:[%s6031_s18 + $0xb50] sm:$0xff] }
 0x1a1   : > { %2718 = vmatprep.mubr.bf16.mxu0 %v917_v42  ;;  %v923_v42 = vpack.c.bf16 %v555_v40, %v547_v8  ;;  %v988_v40 = vpack.c.bf16 %v684_v36, %v676_v63  ;;  %v675_v36 = vld [vmem:[%s6031_s18 + $0xc98] sm:$0xff] }
 0x1a5   : > { %2143 = vmatmul.mubr.bf16.gmra.mrb[116].mxu1 %v1016_v18  ;;  %v6855_v18 = vpop.f32.mrb[0].mxu1 }
 0x1a6   : > { %2152 = vmatprep.mubr.bf16.mxu1 %v1025_v49  ;;  %v661_v49 = vld [vmem:[%s6031_s18 + $0xc28] sm:$0xff]  ;;  %v6863_v55 = vpop.f32.mrb[1].mxu1 }
 0x1a7   : > { %v6867_v25 = vpop.f32.mrb[2].mxu1 }
 0x1a8   : > { %2719 = vmatmul.mubr.bf16.gmra.mrb[64].mxu0 %v916_v31  ;;  %v563_v31 = vld [vmem:[%s6031_s18 + $0x918] sm:$0xff]  ;;  %v6871_v26 = vpop.f32.mrb[3].mxu1 }
 0x1a9   : > { %2728 = vmatprep.mubr.bf16.mxu0 %v925_v11  ;;  %v931_v11 = vpack.c.bf16 %v571_v34, %v563_v31  ;;  %v709_v34 = vld [vmem:[%s6031_s18 + $0xda8] sm:$0xff] }
 0x1ad   : > { %2153 = vmatmul.mubr.bf16.gmra.mrb[120].mxu1 %v1024_v22  ;;  %v660_v22 = vld [vmem:[%s6031_s18 + $0xc20] sm:$0xff] }
 0x1ae   : > { %2162 = vmatprep.mubr.bf16.mxu1 %v1033_v56  ;;  %v668_v56 = vld [vmem:[%s6031_s18 + $0xc60] sm:$0xff] }
 0x1af   : > { %v980_v59 = vpack.c.bf16 %v668_v56, %v660_v22 }
 0x1b0   : > { %2729 = vmatmul.mubr.bf16.gmra.mrb[68].mxu0 %v924_v16  ;;  %v579_v16 = vld [vmem:[%s6031_s18 + $0x998] sm:$0xff] }
 0x1b1   : > { %2738 = vmatprep.mubr.bf16.mxu0 %v933_v17  ;;  %v939_v17 = vpack.c.bf16 %v587_v43, %v579_v16  ;;  %v971_v16 = vpack.c.bf16 %v651_v2, %v643_v39 }
 0x1b5   : > { %2163 = vmatmul.mubr.bf16.gmra.mrb[124].mxu1 %v1032_v61  ;;  %v619_v61 = vld [vmem:[%s6031_s18 + $0xad8] sm:$0xff] }
 0x1b6   : > { %2365 = vmatprep.mubr.bf16.mxu1 %v915_v33  ;;  %v955_v7 = vpack.c.bf16 %v619_v61, %v611_v32  ;;  %v1012_v61 = vpack.c.bf16 %v732_v57, %v724_v5  ;;  %v715_v5 = vld [vmem:[%s6031_s18 + $0xdd8] sm:$0xff] }
 0x1b8   : > { %2739 = vmatmul.mubr.bf16.gmra.mrb[72].mxu0 %v932_v52  ;;  %v981_v52 = vpack.c.bf16 %v669_v19, %v661_v49  ;;  %v733_v49 = vld [vmem:[%s6031_s18 + $0xe68] sm:$0xff] }
 0x1b9   : > { %2748 = vmatprep.mubr.bf16.mxu0 %v941_v21  ;;  %v938_v21 = vpack.c.bf16 %v586_v4, %v578_v51  ;;  %v642_v4 = vld [vmem:[%s6031_s18 + $0xb90] sm:$0xff]  ;;  %v1013_v53 = vpack.c.bf16 %v733_v49, %v725_v48  ;;  %v773_v49 = vld [vmem:[%s6031_s18 + $0xfa8] sm:$0xff] }
 0x1bd   : > { %2366 = vmatmul.mubr.bf16.vlgmr.msra.gmra.mrb[64].mxu1 %v914_v23  ;;  %v610_v23 = vld [vmem:[%s6031_s18 + $0xa90] sm:$0xff] }
 0x1be   : > { %2375 = vmatprep.mubr.bf16.mxu1 %v923_v42  ;;  %v618_v42 = vld [vmem:[%s6031_s18 + $0xad0] sm:$0xff] }
 0x1bf   : > { %v954_v44 = vpack.c.bf16 %v618_v42, %v610_v23  ;;  %v740_v42 = vld [vmem:[%s6031_s18 + $0xea0] sm:$0xff] }
 0x1c0   : > { %2749 = vmatmul.mubr.bf16.gmra.mrb[76].mxu0 %v940_v58  ;;  %v6873_v58 = vpop.f32.mrb[4].mxu1 }
 0x1c1   : > { %2758 = vmatprep.mubr.bf16.mxu0 %v949_v6  ;;  %v602_v6 = vld [vmem:[%s6031_s18 + $0xa50] sm:$0xff]  ;;  %v6879_v62 = vpop.f32.mrb[5].mxu1 }
 0x1c2   : > { %v946_v33 = vpack.c.bf16 %v602_v6, %v594_v27  ;;  %v741_v27 = vld [vmem:[%s6031_s18 + $0xea8] sm:$0xff] }
 0x1c3   : > { %v749_v6 = vld [vmem:[%s6031_s18 + $0xee8] sm:$0xff] }
 0x1c4   : > { %v1021_v63 = vpack.c.bf16 %v749_v6, %v741_v27  ;;  %v5433_v6 = vld [vmem:[%s7993_s3 + $0x8] sm:$0xff]  }
 0x1c5   : > { %2376 = vmatmul.mubr.bf16.gmra.mrb[68].mxu1 %v922_v47  ;;  %v717_v47 = vld [vmem:[%s6031_s18 + $0xde8] sm:$0xff] }
 0x1c6   : > { %2385 = vmatprep.mubr.bf16.mxu1 %v931_v11 }
 0x1c8   : > { %2759 = vmatmul.mubr.bf16.gmra.mrb[80].mxu0 %v948_v13  ;;  %v6883_v13 = vpop.f32.mrb[6].mxu1 }
 0x1c9   : > { %2768 = vmatprep.mubr.bf16.mxu0 %v957_v15  ;;  %v6887_v15 = vpop.f32.mrb[7].mxu1 }
 0x1ca   : > { %v6889_v8 = vpop.f32.mrb[8].mxu1 }
 0x1cb   : > { %v6895_v9 = vpop.f32.mrb[9].mxu1 }
 0x1cc   : > { %v6899_v31 = vpop.f32.mrb[10].mxu1 }
 0x1cd   : > { %2386 = vmatmul.mubr.bf16.gmra.mrb[72].mxu1 %v930_v45  ;;  %v6903_v11 = vpop.f32.mrb[11].mxu1  ;;  %v708_v45 = vld [vmem:[%s6031_s18 + $0xda0] sm:$0xff] }
 0x1ce   : > { %2395 = vmatprep.mubr.bf16.mxu1 %v939_v17  ;;  %v6905_v0 = vpop.f32.mrb[12].mxu1  ;;  %v716_v17 = vld [vmem:[%s6031_s18 + $0xde0] sm:$0xff] }
 0x1cf   : > { %v6911_v43 = vpop.f32.mrb[13].mxu1  ;;  %v1004_v51 = vpack.c.bf16 %v716_v17, %v708_v45  ;;  %v756_v45 = vld [vmem:[%s6031_s18 + $0xf20] sm:$0xff] }
 0x1d0   : > { %2769 = vmatmul.mubr.bf16.gmra.mrb[84].mxu0 %v956_v30  ;;  %v963_v30 = vpack.c.bf16 %v635_v29, %v627_v28  ;;  %v6915_v3 = vpop.f32.mrb[14].mxu1  ;;  %v757_v29 = vld [vmem:[%s6031_s18 + $0xf28] sm:$0xff]  ;;  %v764_v17 = vld [vmem:[%s6031_s18 + $0xf60] sm:$0xff] }
 0x1d1   : > { %2778 = vmatprep.mubr.bf16.mxu0 %v965_v10  ;;  %v700_v10 = vld [vmem:[%s6031_s18 + $0xd60] sm:$0xff]  ;;  %v6919_v19 = vpop.f32.mrb[15].mxu1 }
 0x1d2   : > { %v996_v35 = vpack.c.bf16 %v700_v10, %v692_v46  ;;  %v7999_v46 = vmov 0  }
 0x1d3   : > { %3559 = vmatprep.subr.bf16.mxu1 %v7999_v46 }
 0x1d5   : > { %2396 = vmatmul.mubr.bf16.gmra.mrb[76].mxu1 %v938_v21  ;;  %v667_v21 = vld [vmem:[%s6031_s18 + $0xc58] sm:$0xff] }
 0x1d6   : > { %2405 = vmatprep.mubr.bf16.mxu1 %v947_v54  ;;  %v979_v22 = vpack.c.bf16 %v667_v21, %v659_v20  ;;  %v690_v20 = vld [vmem:[%s6031_s18 + $0xd10] sm:$0xff] }
 0x1d7   : > { %v698_v21 = vld [vmem:[%s6031_s18 + $0xd50] sm:$0xff] }
 0x1d8   : > { %2779 = vmatmul.mubr.bf16.gmra.mrb[88].mxu0 %v964_v37  ;;  %v1005_v37 = vpack.c.bf16 %v717_v47, %v709_v34  ;;  %v674_v47 = vld [vmem:[%s6031_s18 + $0xc90] sm:$0xff]  ;;  %v994_v57 = vpack.c.bf16 %v698_v21, %v690_v20 }
 0x1d9   : > { %2788 = vmatprep.mubr.bf16.mxu0 %v973_v41  ;;  %v962_v41 = vpack.c.bf16 %v634_v12, %v626_v1  ;;  %v691_v12 = vld [vmem:[%s6031_s18 + $0xd18] sm:$0xff]  ;;  %v722_v20 = vld [vmem:[%s6031_s18 + $0xe10] sm:$0xff] }
 0x1da   : > { %v730_v21 = vld [vmem:[%s6031_s18 + $0xe50] sm:$0xff] }
 0x1dd   : > { %2406 = vmatmul.mubr.bf16.gmra.mrb[80].mxu1 %v946_v33  ;;  %v658_v33 = vld [vmem:[%s6031_s18 + $0xc10] sm:$0xff] }
 0x1de   : > { %2415 = vmatprep.mubr.bf16.mxu1 %v955_v7  ;;  %v666_v7 = vld [vmem:[%s6031_s18 + $0xc50] sm:$0xff] }
 0x1df   : > { %v978_v38 = vpack.c.bf16 %v666_v7, %v658_v33  ;;  %v772_v33 = vld [vmem:[%s6031_s18 + $0xfa0] sm:$0xff] }
 0x1e0   : > { %2789 = vmatmul.mubr.bf16.gmra.mrb[92].mxu0 %v972_v50  ;;  %v6921_v50 = vpop.f32.mrb[16].mxu1  ;;  %v780_v7 = vld [vmem:[%s6031_s18 + $0xfe0] sm:$0xff] }
 0x1e1   : > { %2798 = vmatprep.mubr.bf16.mxu0 %v981_v52  ;;  %v650_v52 = vld [vmem:[%s6031_s18 + $0xbd0] sm:$0xff]  ;;  %v6927_v56 = vpop.f32.mrb[17].mxu1 }
 0x1e2   : > { %v970_v54 = vpack.c.bf16 %v650_v52, %v642_v4 }
 0x1e5   : > { %2416 = vmatmul.mubr.bf16.gmra.mrb[84].mxu1 %v954_v44  ;;  %v765_v44 = vld [vmem:[%s6031_s18 + $0xf68] sm:$0xff] }
 0x1e6   : > { %2425 = vmatprep.mubr.bf16.mxu1 %v963_v30  ;;  %v1029_v1 = vpack.c.bf16 %v765_v44, %v757_v29  ;;  %v714_v29 = vld [vmem:[%s6031_s18 + $0xdd0] sm:$0xff] }
 0x1e8   : > { %2799 = vmatmul.mubr.bf16.gmra.mrb[96].mxu0 %v980_v59  ;;  %v6931_v59 = vpop.f32.mrb[18].mxu1 }
 0x1e9   : > { %2808 = vmatprep.mubr.bf16.mxu0 %v989_v60  ;;  %v6935_v60 = vpop.f32.mrb[19].mxu1 }
 0x1ea   : > { %v6937_v32 = vpop.f32.mrb[20].mxu1 }
 0x1eb   : > { %v6943_v23 = vpop.f32.mrb[21].mxu1 }
 0x1ec   : > { %v6947_v28 = vpop.f32.mrb[22].mxu1 }
 0x1ed   : > { %2426 = vmatmul.mubr.bf16.gmra.mrb[88].mxu1 %v962_v41  ;;  %v6951_v30 = vpop.f32.mrb[23].mxu1  ;;  %v5432_v41 = vld [vmem:[%s7993_s3] sm:$0xff]  }
 0x1ee   : > { %2435 = vmatprep.mubr.bf16.mxu1 %v971_v16  ;;  %v6954_v10 = vpop.f32.mrb[24].mxu1  ;;  %3560 = vmatpush1.bf16.msra.mxu1 %v5432_v41 }
 0x1ef   : > { %v6963_v16 = vpop.f32.mrb[25].mxu1  ;;  %3561 = vmatprep.subr.bf16.mxu1 %v7999_v46 }
 0x1f0   : > { %2809 = vmatmul.mubr.bf16.gmra.mrb[100].mxu0 %v988_v40  ;;  %v987_v40 = vpack.c.bf16 %v683_v14, %v675_v36  ;;  %v6967_v48 = vpop.f32.mrb[26].mxu1  ;;  %v279_v36 = vld [vmem:[%s6031_s18 + $0x38] sm:$0xff] }
 0x1f1   : > { %2818 = vmatprep.mubr.bf16.mxu0 %v997_v24  ;;  %v748_v24 = vld [vmem:[%s6031_s18 + $0xee0] sm:$0xff]  ;;  %v6971_v4 = vpop.f32.mrb[27].mxu1  ;;  %v287_v14 = vld [vmem:[%s6031_s18 + $0x78] sm:$0xff] }
 0x1f2   : > { %v1020_v34 = vpack.c.bf16 %v748_v24, %v740_v42  ;;  %v6974_v52 = vpop.f32.mrb[28].mxu1  ;;  %3562 = vmatpush1.bf16.msra.mxu1 %v5433_v6  ;;  %v1036_v42 = vpack.c.bf16 %v780_v7, %v772_v33  ;;  %v706_v24 = vld [vmem:[%s6031_s18 + $0xd90] sm:$0xff]  ;;  %v791_v44 = vpack.c.bf16 %v287_v14, %v279_v36  ;;  %v5435_v6 = vld [vmem:[%s7993_s3 + $0x18] sm:$0xff]  }
 0x1f3   : > { %3563 = vmatprep.subr.bf16.mxu1 %v7999_v46  ;;  %v294_v7 = vld [vmem:[%s6031_s18 + $0xb0] sm:$0xff] }
 0x1f4   : > { %v302_v36 = vld [vmem:[%s6031_s18 + $0xf0] sm:$0xff] }
 0x1f5   : > { %2436 = vmatmul.mubr.bf16.gmra.mrb[92].mxu1 %v970_v54 }
 0x1f6   : > { %2445 = vmatprep.mubr.bf16.mxu1 %v979_v22  ;;  %v707_v22 = vld [vmem:[%s6031_s18 + $0xd98] sm:$0xff] }
 0x1f7   : > { %v1003_v27 = vpack.c.bf16 %v715_v5, %v707_v22  ;;  %v739_v22 = vld [vmem:[%s6031_s18 + $0xe98] sm:$0xff] }
 0x1f8   : > { %2819 = vmatmul.mubr.bf16.gmra.mrb[104].mxu0 %v996_v35  ;;  %v682_v35 = vld [vmem:[%s6031_s18 + $0xcd0] sm:$0xff]  ;;  %v747_v5 = vld [vmem:[%s6031_s18 + $0xed8] sm:$0xff] }
 0x1f9   : > { %2828 = vmatprep.mubr.bf16.mxu0 %v1005_v37  ;;  %v699_v37 = vld [vmem:[%s6031_s18 + $0xd58] sm:$0xff]  ;;  %v986_v39 = vpack.c.bf16 %v682_v35, %v674_v47  ;;  %v1002_v35 = vpack.c.bf16 %v714_v29, %v706_v24 }
 0x1fa   : > { %v995_v2 = vpack.c.bf16 %v699_v37, %v691_v12  ;;  %v731_v47 = vld [vmem:[%s6031_s18 + $0xe58] sm:$0xff]  ;;  %v5434_v12 = vld [vmem:[%s7993_s3 + $0x10] sm:$0xff]  }
 0x1fb   : > { %3564 = vmatpush1.bf16.msra.mxu1 %v5434_v12  ;;  %v319_v24 = vld [vmem:[%s6031_s18 + $0x178] sm:$0xff] }
 0x1fc   : > { %3565 = vmatprep.subr.bf16.mxu1 %v7999_v46  ;;  %v755_v12 = vld [vmem:[%s6031_s18 + $0xf18] sm:$0xff] }
 0x1fd   : > { %2446 = vmatmul.mubr.bf16.gmra.mrb[96].mxu1 %v978_v38 }
 0x1fe   : > { %2455 = vmatprep.mubr.bf16.mxu1 %v987_v40 }
 0x1ff   : > { %3566 = vmatpush1.bf16.msra.mxu1 %v5435_v6 }
 0x200   : > { %2829 = vmatmul.mubr.bf16.gmra.mrb[108].mxu0 %v1004_v51  ;;  %v781_v51 = vld [vmem:[%s6031_s18 + $0xfe8] sm:$0xff]  ;;  %3567 = vmatprep.subr.bf16.mxu1 %v7999_v46 }
 0x201   : > { %2838 = vmatprep.mubr.bf16.mxu0 %v1013_v53  ;;  %v1028_v53 = vpack.c.bf16 %v764_v17, %v756_v45  ;;  %v1037_v54 = vpack.c.bf16 %v781_v51, %v773_v49  ;;  %v295_v45 = vld [vmem:[%s6031_s18 + $0xb8] sm:$0xff] }
 0x202   : > { %v303_v17 = vld [vmem:[%s6031_s18 + $0xf8] sm:$0xff] }
 0x205   : > { %2456 = vmatmul.mubr.bf16.gmra.mrb[100].mxu1 %v986_v39  ;;  %v278_v39 = vld [vmem:[%s6031_s18 + $0x30] sm:$0xff] }
 0x206   : > { %2465 = vmatprep.mubr.bf16.mxu1 %v995_v2  ;;  %v286_v2 = vld [vmem:[%s6031_s18 + $0x70] sm:$0xff] }
 0x208   : > { %2839 = vmatmul.mubr.bf16.gmra.mrb[112].mxu0 %v1012_v61  ;;  %v6983_v61 = vpop.f32.mrb[29].mxu1 }
 0x209   : > { %2848 = vmatprep.mubr.bf16.mxu0 %v1021_v63  ;;  %v6987_v63 = vpop.f32.mrb[30].mxu1 }
 0x20a   : > { %v6991_v38 = vpop.f32.mrb[31].mxu1 }
 0x20b   : > { %v6994_v40 = vpop.f32.mrb[32].mxu1 }
 0x20c   : > { %v7003_v37 = vpop.f32.mrb[33].mxu1 }
 0x20d   : > { %2466 = vmatmul.mubr.bf16.gmra.mrb[104].mxu1 %v994_v57  ;;  %v7007_v41 = vpop.f32.mrb[34].mxu1  ;;  %v1010_v57 = vpack.c.bf16 %v730_v21, %v722_v20  ;;  %v310_v20 = vld [vmem:[%s6031_s18 + $0x130] sm:$0xff] }
 0x20e   : > { %2475 = vmatprep.mubr.bf16.mxu1 %v1003_v27  ;;  %v7011_v49 = vpop.f32.mrb[35].mxu1  ;;  %v1019_v27 = vpack.c.bf16 %v747_v5, %v739_v22  ;;  %v318_v21 = vld [vmem:[%s6031_s18 + $0x170] sm:$0xff]  ;;  %v327_v22 = vld [vmem:[%s6031_s18 + $0x1b8] sm:$0xff] }
 0x20f   : > { %v7014_v51 = vpop.f32.mrb[36].mxu1  ;;  %v335_v5 = vld [vmem:[%s6031_s18 + $0x1f8] sm:$0xff]  ;;  %v806_v6 = vpack.c.bf16 %v318_v21, %v310_v20 }
 0x210   : > { %2849 = vmatmul.mubr.bf16.gmra.mrb[116].mxu0 %v1020_v34  ;;  %v723_v34 = vld [vmem:[%s6031_s18 + $0xe18] sm:$0xff]  ;;  %v7023_v33 = vpop.f32.mrb[37].mxu1 }
 0x211   : > { %2858 = vmatprep.mubr.bf16.mxu0 %v1029_v1  ;;  %v1011_v1 = vpack.c.bf16 %v731_v47, %v723_v34  ;;  %v7027_v14 = vpop.f32.mrb[38].mxu1  ;;  %v798_v34 = vpack.c.bf16 %v302_v36, %v294_v7  ;;  %v738_v47 = vld [vmem:[%s6031_s18 + $0xe90] sm:$0xff]  ;;  %v351_v20 = vld [vmem:[%s6031_s18 + $0x278] sm:$0xff] }
 0x212   : > { %v7031_v29 = vpop.f32.mrb[39].mxu1  ;;  %v754_v7 = vld [vmem:[%s6031_s18 + $0xf10] sm:$0xff] }
 0x213   : > { %v762_v36 = vld [vmem:[%s6031_s18 + $0xf50] sm:$0xff] }
 0x215   : > { %2476 = vmatmul.mubr.bf16.gmra.mrb[108].mxu1 %v1002_v35  ;;  %v746_v35 = vld [vmem:[%s6031_s18 + $0xed0] sm:$0xff] }
 0x216   : > { %2485 = vmatprep.mubr.bf16.mxu1 %v1011_v1 }
 0x218   : > { %2859 = vmatmul.mubr.bf16.gmra.mrb[120].mxu0 %v1028_v53  ;;  %v790_v53 = vpack.c.bf16 %v286_v2, %v278_v39  ;;  %v763_v39 = vld [vmem:[%s6031_s18 + $0xf58] sm:$0xff]  ;;  %v1018_v2 = vpack.c.bf16 %v746_v35, %v738_v47  ;;  %v1026_v47 = vpack.c.bf16 %v762_v36, %v754_v7  ;;  %v778_v7 = vld [vmem:[%s6031_s18 + $0xfd0] sm:$0xff] }
 0x219   : > { %2868 = vmatprep.mubr.bf16.mxu0 %v1037_v54  ;;  %v799_v54 = vpack.c.bf16 %v303_v17, %v295_v45  ;;  %v1027_v45 = vpack.c.bf16 %v763_v39, %v755_v12  ;;  %v5436_v17 = vld [vmem:[%s7993_s3 + $0x20] sm:$0xff]   ;;  %v326_v39 = vld [vmem:[%s6031_s18 + $0x1b0] sm:$0xff] }
 0x21a   : > { %3568 = vmatpush1.bf16.msra.mxu1 %v5436_v17  ;;  %v343_v17 = vld [vmem:[%s6031_s18 + $0x238] sm:$0xff] }
 0x21b   : > { %3569 = vmatprep.subr.bf16.mxu1 %v7999_v46  ;;  %v823_v36 = vpack.c.bf16 %v351_v20, %v343_v17  ;;  %v8017_v17 = vmov 0  }
 0x21d   : > { %2486 = vmatmul.mubr.bf16.gmra.mrb[112].mxu1 %v1010_v57 }
 0x21e   : > { %2495 = vmatprep.mubr.bf16.mxu1 %v1019_v27 }
 0x220   : > { %2869 = vmatmul.mubr.bf16.gmra.mrb[124].mxu0 %v1036_v42  ;;  %v311_v42 = vld [vmem:[%s6031_s18 + $0x138] sm:$0xff] }
 0x221   : > { %2911 = vmatprep.mubr.bf16.mxu0 %v791_v44  ;;  %v7034_v44 = vpop.f32.mrb[40].mxu1  ;;  %v807_v1 = vpack.c.bf16 %v319_v24, %v311_v42  ;;  %v815_v42 = vpack.c.bf16 %v335_v5, %v327_v22  ;;  %v771_v24 = vld [vmem:[%s6031_s18 + $0xf98] sm:$0xff] }
 0x225   : > { %2496 = vmatmul.mubr.bf16.gmra.mrb[116].mxu1 %v1018_v2  ;;  %v334_v2 = vld [vmem:[%s6031_s18 + $0x1f0] sm:$0xff] }
 0x226   : > { %2505 = vmatprep.mubr.bf16.mxu1 %v1027_v45  ;;  %v814_v5 = vpack.c.bf16 %v334_v2, %v326_v39  ;;  %v359_v39 = vld [vmem:[%s6031_s18 + $0x2b8] sm:$0xff] }
 0x228   : > { %2912 = vmatmul.mubr.bf16.vlgmr.msra.gmra.mrb[0].mxu0 %v790_v53  ;;  %v7043_v53 = vpop.f32.mrb[41].mxu1 }
 0x229   : > { %2921 = vmatprep.mubr.bf16.mxu0 %v799_v54  ;;  %v7047_v54 = vpop.f32.mrb[42].mxu1 }
 0x22a   : > { %v7051_v57 = vpop.f32.mrb[43].mxu1 }
 0x22b   : > { %v7054_v27 = vpop.f32.mrb[44].mxu1 }
 0x22c   : > { %v7063_v12 = vpop.f32.mrb[45].mxu1 }
 0x22d   : > { %v7067_v45 = vpop.f32.mrb[46].mxu1  ;;  %2506 = vmatmul.mubr.bf16.gmra.mrb[120].mxu1 %v1026_v47  ;;  %v342_v47 = vld [vmem:[%s6031_s18 + $0x230] sm:$0xff] }
 0x22e   : > { %8011 = vst [vmem:[#allocation9_spill] sm:$0xff] %v7067_v45  ;;  %v7071_v21 = vpop.f32.mrb[47].mxu1 }
 0x22f   : > { %8012 = vst [vmem:[#allocation10_spill] sm:$0xff] %v7071_v21  ;;  %v7074_v22 = vpop.f32.mrb[48].mxu1  ;;  %v719_v21 = vld [vmem:[%s6031_s18 + $0xdf8] sm:$0xff] }
 0x230   : > { %2922 = vmatmul.mubr.bf16.gmra.mrb[4].mxu0 %v798_v34  ;;  %v779_v34 = vld [vmem:[%s6031_s18 + $0xfd8] sm:$0xff]  ;;  %8013 = vst [vmem:[#allocation11_spill] sm:$0xff] %v7074_v22 }
 0x231   : > { %2931 = vmatprep.mubr.bf16.mxu0 %v807_v1  ;;  %v1035_v35 = vpack.c.bf16 %v779_v34, %v771_v24  ;;  %v5437_v1 = vld [vmem:[%s7993_s3 + $0x28] sm:$0xff]   ;;  %v5438_v24 = vld [vmem:[%s7993_s3 + $0x30] sm:$0xff]   ;;  %v7081_v34 = vpop.f32.mrb[49].mxu1  ;;  %v543_v22 = vld [vmem:[%s6031_s18 + $0x878] sm:$0xff] }
 0x232   : > { %3570 = vmatpush1.bf16.msra.mxu1 %v5437_v1  ;;  %8014 = vst [vmem:[#allocation12_spill] sm:$0xff] %v7081_v34  ;;  %v350_v1 = vld [vmem:[%s6031_s18 + $0x270] sm:$0xff] }
 0x233   : > { %3571 = vmatprep.subr.bf16.mxu1 %v7999_v46  ;;  %2515 = vmatprep.mubr.bf16.mxu1 %v1035_v35  ;;  %v7085_v46 = vpop.f32.mrb[50].mxu1  ;;  %v367_v35 = vld [vmem:[%s6031_s18 + $0x2f8] sm:$0xff]  ;;  %v526_v34 = vld [vmem:[%s6031_s18 + $0x7f0] sm:$0xff] }
 0x234   : > { %8015 = vst [vmem:[#allocation13_spill] sm:$0xff] %v7085_v46  ;;  %v7089_v2 = vpop.f32.mrb[51].mxu1  ;;  %v358_v46 = vld [vmem:[%s6031_s18 + $0x2b0] sm:$0xff] }
 0x235   : > { %8016 = vst [vmem:[#allocation14_spill] sm:$0xff] %v7089_v2  ;;  %v7092_v20 = vpop.f32.mrb[52].mxu1 }
 0x236   : > { %3572 = vmatpush1.bf16.msra.mxu1 %v5438_v24  ;;  %8018 = vst [vmem:[#allocation15_spill] sm:$0xff] %v7092_v20  ;;  %v366_v24 = vld [vmem:[%s6031_s18 + $0x2f0] sm:$0xff]  ;;  %v383_v20 = vld [vmem:[%s6031_s18 + $0x378] sm:$0xff] }
 0x237   : > { %3573 = vmatprep.subr.bf16.mxu1 %v8017_v17 }
 0x238   : > { %2932 = vmatmul.mubr.bf16.gmra.mrb[8].mxu0 %v806_v6  ;;  %v770_v6 = vld [vmem:[%s6031_s18 + $0xf90] sm:$0xff] }
 0x239   : > { %2941 = vmatprep.mubr.bf16.mxu0 %v815_v42  ;;  %v1034_v42 = vpack.c.bf16 %v778_v7, %v770_v6  ;;  %v831_v6 = vpack.c.bf16 %v367_v35, %v359_v39  ;;  %v5439_v7 = vld [vmem:[%s7993_s3 + $0x38] sm:$0xff]   ;;  %v830_v39 = vpack.c.bf16 %v366_v24, %v358_v46 }
 0x23a   : > { %3574 = vmatpush1.bf16.msra.mxu1 %v5439_v7  ;;  %v382_v7 = vld [vmem:[%s6031_s18 + $0x370] sm:$0xff] }
 0x23b   : > { %2516 = vmatmul.mubr.bf16.gmra.mrb[124].mxu1 %v1034_v42  ;;  %v375_v42 = vld [vmem:[%s6031_s18 + $0x338] sm:$0xff]  ;;  %3575 = vmatprep.subr.bf16.mxu1 %v8017_v17 }
 0x23c   : > { %v839_v35 = vpack.c.bf16 %v383_v20, %v375_v42 }
 0x240   : > { %2942 = vmatmul.mubr.bf16.gmra.mrb[12].mxu0 %v814_v5  ;;  %v822_v5 = vpack.c.bf16 %v350_v1, %v342_v47 }
 0x241   : > { %2951 = vmatprep.mubr.bf16.mxu0 %v823_v36  ;;  %v7097_v36 = vpop.f32.mrb[53].mxu1 }
 0x242   : > { %8019 = vst [vmem:[#allocation16_spill] sm:$0xff] %v7097_v36  ;;  %v7101_v2 = vpop.f32.mrb[54].mxu1 }
 0x243   : > { %8020 = vst [vmem:[#allocation17_spill] sm:$0xff] %v7101_v2  ;;  %v7105_v47 = vpop.f32.mrb[55].mxu1  ;;  %v374_v2 = vld [vmem:[%s6031_s18 + $0x330] sm:$0xff] }
 0x244   : > { %8021 = vst [vmem:[#allocation18_spill] sm:$0xff] %v7105_v47  ;;  %v7108_v1 = vpop.f32.mrb[56].mxu1  ;;  %v391_v47 = vld [vmem:[%s6031_s18 + $0x3b8] sm:$0xff]  ;;  %v838_v24 = vpack.c.bf16 %v382_v7, %v374_v2  ;;  %v5442_v7 = vld [vmem:[%s7993_s3 + $0x50] sm:$0xff]  }
 0x245   : > { %8022 = vst [vmem:[#allocation19_spill] sm:$0xff] %v7108_v1  ;;  %v399_v1 = vld [vmem:[%s6031_s18 + $0x3f8] sm:$0xff] }
 0x246   : > { %v847_v42 = vpack.c.bf16 %v399_v1, %v391_v47 }
 0x248   : > { %2952 = vmatmul.mubr.bf16.gmra.mrb[16].mxu0 %v822_v5  ;;  %v5440_v5 = vld [vmem:[%s7993_s3 + $0x40] sm:$0xff]  }
 0x249   : > { %2961 = vmatprep.mubr.bf16.mxu0 %v831_v6  ;;  %v7113_v6 = vpop.f32.mrb[57].mxu1  ;;  %3576 = vmatpush1.bf16.msra.mxu1 %v5440_v5  ;;  %v390_v5 = vld [vmem:[%s6031_s18 + $0x3b0] sm:$0xff] }
 0x24a   : > { %8023 = vst [vmem:[#allocation20_spill] sm:$0xff] %v7113_v6  ;;  %v7117_v36 = vpop.f32.mrb[58].mxu1  ;;  %3577 = vmatprep.subr.bf16.mxu1 %v8017_v17  ;;  %v407_v6 = vld [vmem:[%s6031_s18 + $0x438] sm:$0xff] }
 0x24b   : > { %8024 = vst [vmem:[#allocation21_spill] sm:$0xff] %v7117_v36  ;;  %v7121_v46 = vpop.f32.mrb[59].mxu1 }
 0x24c   : > { %8025 = vst [vmem:[#allocation22_spill] sm:$0xff] %v7121_v46  ;;  %v7124_v20 = vpop.f32.mrb[60].mxu1  ;;  %v398_v46 = vld [vmem:[%s6031_s18 + $0x3f0] sm:$0xff] }
 0x24d   : > { %8026 = vst [vmem:[#allocation23_spill] sm:$0xff] %v7124_v20  ;;  %v415_v20 = vld [vmem:[%s6031_s18 + $0x478] sm:$0xff]  ;;  %v846_v47 = vpack.c.bf16 %v398_v46, %v390_v5  ;;  %v430_v5 = vld [vmem:[%s6031_s18 + $0x4f0] sm:$0xff] }
 0x24e   : > { %v855_v1 = vpack.c.bf16 %v415_v20, %v407_v6  ;;  %v5443_v6 = vld [vmem:[%s7993_s3 + $0x58] sm:$0xff]   ;;  %v422_v20 = vld [vmem:[%s6031_s18 + $0x4b0] sm:$0xff] }
 0x250   : > { %2962 = vmatmul.mubr.bf16.gmra.mrb[20].mxu0 %v830_v39  ;;  %v5441_v39 = vld [vmem:[%s7993_s3 + $0x48] sm:$0xff]  }
 0x251   : > { %2971 = vmatprep.mubr.bf16.mxu0 %v839_v35  ;;  %v7129_v35 = vpop.f32.mrb[61].mxu1  ;;  %3578 = vmatpush1.bf16.msra.mxu1 %v5441_v39  ;;  %v431_v39 = vld [vmem:[%s6031_s18 + $0x4f8] sm:$0xff] }
 0x252   : > { %8027 = vst [vmem:[#allocation24_spill] sm:$0xff] %v7129_v35  ;;  %v7133_v36 = vpop.f32.mrb[62].mxu1  ;;  %3579 = vmatprep.subr.bf16.mxu1 %v8017_v17  ;;  %v518_v35 = vld [vmem:[%s6031_s18 + $0x7b0] sm:$0xff] }
 0x253   : > { %8028 = vst [vmem:[#allocation25_spill] sm:$0xff] %v7133_v36  ;;  %v7137_v2 = vpop.f32.mrb[63].mxu1  ;;  %v423_v36 = vld [vmem:[%s6031_s18 + $0x4b8] sm:$0xff] }
 0x254   : > { %8029 = vst [vmem:[#allocation26_spill] sm:$0xff] %v7137_v2  ;;  %v863_v46 = vpack.c.bf16 %v431_v39, %v423_v36  ;;  %v5444_v36 = vld [vmem:[%s7993_s3 + $0x60] sm:$0xff]   ;;  %v455_v39 = vld [vmem:[%s6031_s18 + $0x5b8] sm:$0xff] }
 0x255   : > { %3580 = vmatpush1.bf16.msra.mxu1 %v5442_v7  ;;  %v862_v7 = vpack.c.bf16 %v430_v5, %v422_v20  ;;  %v5445_v5 = vld [vmem:[%s7993_s3 + $0x68] sm:$0xff]  }
 0x256   : > { %3581 = vmatprep.subr.bf16.mxu1 %v8017_v17 }
 0x258   : > { %2972 = vmatmul.mubr.bf16.gmra.mrb[24].mxu0 %v838_v24  ;;  %v406_v24 = vld [vmem:[%s6031_s18 + $0x430] sm:$0xff] }
 0x259   : > { %2981 = vmatprep.mubr.bf16.mxu0 %v847_v42  ;;  %v414_v42 = vld [vmem:[%s6031_s18 + $0x470] sm:$0xff]  ;;  %3582 = vmatpush1.bf16.msra.mxu1 %v5443_v6 }
 0x25a   : > { %v854_v2 = vpack.c.bf16 %v414_v42, %v406_v24  ;;  %3583 = vmatprep.subr.bf16.mxu1 %v8017_v17  ;;  %v446_v42 = vld [vmem:[%s6031_s18 + $0x570] sm:$0xff] }
 0x25d   : > { %3584 = vmatpush1.bf16.msra.mxu1 %v5444_v36 }
 0x25e   : > { %3585 = vmatprep.subr.bf16.mxu1 %v8017_v17 }
 0x260   : > { %2982 = vmatmul.mubr.bf16.gmra.mrb[28].mxu0 %v846_v47  ;;  %v439_v47 = vld [vmem:[%s6031_s18 + $0x538] sm:$0xff] }
 0x261   : > { %2991 = vmatprep.mubr.bf16.mxu0 %v855_v1  ;;  %v447_v1 = vld [vmem:[%s6031_s18 + $0x578] sm:$0xff]  ;;  %3586 = vmatpush1.bf16.msra.mxu1 %v5445_v5 }
 0x262   : > { %v871_v24 = vpack.c.bf16 %v447_v1, %v439_v47  ;;  %v454_v47 = vld [vmem:[%s6031_s18 + $0x5b0] sm:$0xff]  ;;  %3587 = vmatprep.subr.bf16.mxu1 %v8017_v17 }
 0x263   : > { %v462_v1 = vld [vmem:[%s6031_s18 + $0x5f0] sm:$0xff] }
 0x264   : > { %v878_v36 = vpack.c.bf16 %v462_v1, %v454_v47  ;;  %v486_v1 = vld [vmem:[%s6031_s18 + $0x6b0] sm:$0xff] }
 0x268   : > { %2992 = vmatmul.mubr.bf16.gmra.mrb[32].mxu0 %v854_v2  ;;  %v438_v2 = vld [vmem:[%s6031_s18 + $0x530] sm:$0xff] }
 0x269   : > { %3001 = vmatprep.mubr.bf16.mxu0 %v863_v46  ;;  %v463_v46 = vld [vmem:[%s6031_s18 + $0x5f8] sm:$0xff]  ;;  %v870_v6 = vpack.c.bf16 %v446_v42, %v438_v2  ;;  %v470_v42 = vld [vmem:[%s6031_s18 + $0x630] sm:$0xff] }
 0x26a   : > { %v879_v20 = vpack.c.bf16 %v463_v46, %v455_v39  ;;  %v478_v39 = vld [vmem:[%s6031_s18 + $0x670] sm:$0xff] }
 0x26b   : > { %v5446_v46 = vld [vmem:[%s7993_s3 + $0x70] sm:$0xff]   ;;  %v886_v5 = vpack.c.bf16 %v478_v39, %v470_v42 }
 0x26c   : > { %3588 = vmatpush1.bf16.msra.mxu1 %v5446_v46  ;;  %v502_v39 = vld [vmem:[%s6031_s18 + $0x730] sm:$0xff] }
 0x26d   : > { %3589 = vmatprep.subr.bf16.mxu1 %v8017_v17  ;;  %v510_v46 = vld [vmem:[%s6031_s18 + $0x770] sm:$0xff] }
 0x270   : > { %3002 = vmatmul.mubr.bf16.gmra.mrb[36].mxu0 %v862_v7  ;;  %v471_v7 = vld [vmem:[%s6031_s18 + $0x638] sm:$0xff] }
 0x271   : > { %3011 = vmatprep.mubr.bf16.mxu0 %v871_v24  ;;  %v479_v24 = vld [vmem:[%s6031_s18 + $0x678] sm:$0xff] }
 0x272   : > { %v887_v2 = vpack.c.bf16 %v479_v24, %v471_v7  ;;  %v494_v7 = vld [vmem:[%s6031_s18 + $0x6f0] sm:$0xff]  ;;  %v5447_v24 = vld [vmem:[%s7993_s3 + $0x78] sm:$0xff]  }
 0x273   : > { %3590 = vmatpush1.bf16.msra.mxu1 %v5447_v24  ;;  %v894_v42 = vpack.c.bf16 %v494_v7, %v486_v1  ;;  %v535_v24 = vld [vmem:[%s6031_s18 + $0x838] sm:$0xff]  ;;  %v910_v1 = vpack.c.bf16 %v526_v34, %v518_v35 }
 0x274   : > { %v919_v7 = vpack.c.bf16 %v543_v22, %v535_v24  ;;  %v550_v24 = vld [vmem:[%s6031_s18 + $0x8b0] sm:$0xff] }
 0x278   : > { %3012 = vmatmul.mubr.bf16.gmra.mrb[40].mxu0 %v870_v6  ;;  %v487_v6 = vld [vmem:[%s6031_s18 + $0x6b8] sm:$0xff] }
 0x279   : > { %3021 = vmatprep.mubr.bf16.mxu0 %v879_v20  ;;  %v495_v20 = vld [vmem:[%s6031_s18 + $0x6f8] sm:$0xff] }
 0x27a   : > { %v895_v47 = vpack.c.bf16 %v495_v20, %v487_v6  ;;  %v519_v6 = vld [vmem:[%s6031_s18 + $0x7b8] sm:$0xff] }
 0x27b   : > { %v527_v20 = vld [vmem:[%s6031_s18 + $0x7f8] sm:$0xff] }
 0x280   : > { %3022 = vmatmul.mubr.bf16.gmra.mrb[44].mxu0 %v878_v36  ;;  %v503_v36 = vld [vmem:[%s6031_s18 + $0x738] sm:$0xff] }
 0x281   : > { %3031 = vmatprep.mubr.bf16.mxu0 %v887_v2  ;;  %v511_v2 = vld [vmem:[%s6031_s18 + $0x778] sm:$0xff] }
 0x282   : > { %v903_v17 = vpack.c.bf16 %v511_v2, %v503_v36 }
 0x288   : > { %3032 = vmatmul.mubr.bf16.gmra.mrb[48].mxu0 %v886_v5  ;;  %v902_v5 = vpack.c.bf16 %v510_v46, %v502_v39  ;;  %v542_v39 = vld [vmem:[%s6031_s18 + $0x870] sm:$0xff] }
 0x289   : > { %3041 = vmatprep.mubr.bf16.mxu0 %v895_v47  ;;  %v911_v47 = vpack.c.bf16 %v527_v20, %v519_v6  ;;  %v551_v6 = vld [vmem:[%s6031_s18 + $0x8b8] sm:$0xff] }
 0x28a   : > { %v559_v20 = vld [vmem:[%s6031_s18 + $0x8f8] sm:$0xff] }
 0x28b   : > { %v927_v22 = vpack.c.bf16 %v559_v20, %v551_v6 }
 0x290   : > { %3042 = vmatmul.mubr.bf16.gmra.mrb[52].mxu0 %v894_v42  ;;  %v7195_v36 = vpop.f32.mrb[64].mxu1 }
 0x291   : > { %3051 = vmatprep.mubr.bf16.mxu0 %v903_v17  ;;  %8030 = vst [vmem:[#allocation27_spill] sm:$0xff] %v7195_v36  ;;  %v7197_v2 = vpop.f32.mrb[65].mxu1  ;;  %v534_v17 = vld [vmem:[%s6031_s18 + $0x830] sm:$0xff]  ;;  %v711_v36 = vld [vmem:[%s6031_s18 + $0xdb8] sm:$0xff] }
 0x292   : > { %8031 = vst [vmem:[#allocation28_spill] sm:$0xff] %v7197_v2  ;;  %v7199_v42 = vpop.f32.mrb[66].mxu1  ;;  %v918_v34 = vpack.c.bf16 %v542_v39, %v534_v17 }
 0x293   : > { %8032 = vst [vmem:[#allocation29_spill] sm:$0xff] %v7199_v42  ;;  %v7203_v46 = vpop.f32.mrb[67].mxu1  ;;  %v575_v42 = vld [vmem:[%s6031_s18 + $0x978] sm:$0xff] }
 0x294   : > { %8033 = vst [vmem:[#allocation30_spill] sm:$0xff] %v7203_v46  ;;  %v567_v46 = vld [vmem:[%s6031_s18 + $0x938] sm:$0xff] }
 0x295   : > { %v935_v39 = vpack.c.bf16 %v575_v42, %v567_v46 }
 0x298   : > { %3052 = vmatmul.mubr.bf16.gmra.mrb[56].mxu0 %v902_v5  ;;  %v7207_v35 = vpop.f32.mrb[68].mxu1 }
 0x299   : > { %3061 = vmatprep.mubr.bf16.mxu0 %v911_v47  ;;  %8034 = vst [vmem:[#allocation31_spill] sm:$0xff] %v7207_v35  ;;  %v7209_v5 = vpop.f32.mrb[69].mxu1  ;;  %v591_v35 = vld [vmem:[%s6031_s18 + $0x9f8] sm:$0xff] }
 0x29a   : > { %8035 = vst [vmem:[#allocation32_spill] sm:$0xff] %v7209_v5  ;;  %v7211_v47 = vpop.f32.mrb[70].mxu1 }
 0x29b   : > { %8036 = vst [vmem:[#allocation33_spill] sm:$0xff] %v7211_v47  ;;  %v574_v47 = vld [vmem:[%s6031_s18 + $0x970] sm:$0xff] }
 0x2a0   : > { %3062 = vmatmul.mubr.bf16.gmra.mrb[60].mxu0 %v910_v1  ;;  %v558_v1 = vld [vmem:[%s6031_s18 + $0x8f0] sm:$0xff] }
 0x2a1   : > { %3071 = vmatprep.mubr.bf16.mxu0 %v919_v7  ;;  %v7215_v7 = vpop.f32.mrb[71].mxu1  ;;  %v926_v17 = vpack.c.bf16 %v558_v1, %v550_v24 }
 0x2a2   : > { %8037 = vst [vmem:[#allocation34_spill] sm:$0xff] %v7215_v7  ;;  %v7219_v6 = vpop.f32.mrb[72].mxu1  ;;  %v583_v7 = vld [vmem:[%s6031_s18 + $0x9b8] sm:$0xff] }
 0x2a3   : > { %8038 = vst [vmem:[#allocation35_spill] sm:$0xff] %v7219_v6  ;;  %v7221_v20 = vpop.f32.mrb[73].mxu1  ;;  %v943_v42 = vpack.c.bf16 %v591_v35, %v583_v7  ;;  %v607_v6 = vld [vmem:[%s6031_s18 + $0xa78] sm:$0xff] }
 0x2a4   : > { %8039 = vst [vmem:[#allocation36_spill] sm:$0xff] %v7221_v20 }
 0x2a8   : > { %3072 = vmatmul.mubr.bf16.gmra.mrb[64].mxu0 %v918_v34  ;;  %v7223_v34 = vpop.f32.mrb[74].mxu1 }
 0x2a9   : > { %3081 = vmatprep.mubr.bf16.mxu0 %v927_v22  ;;  %8040 = vst [vmem:[#allocation37_spill] sm:$0xff] %v7223_v34  ;;  %v566_v22 = vld [vmem:[%s6031_s18 + $0x930] sm:$0xff]  ;;  %v7227_v5 = vpop.f32.mrb[75].mxu1 }
 0x2aa   : > { %8041 = vst [vmem:[#allocation38_spill] sm:$0xff] %v7227_v5  ;;  %v934_v24 = vpack.c.bf16 %v574_v47, %v566_v22  ;;  %v7231_v46 = vpop.f32.mrb[76].mxu1  ;;  %v590_v34 = vld [vmem:[%s6031_s18 + $0x9f0] sm:$0xff]  ;;  %v599_v5 = vld [vmem:[%s6031_s18 + $0xa38] sm:$0xff] }
 0x2ab   : > { %8042 = vst [vmem:[#allocation39_spill] sm:$0xff] %v7231_v46  ;;  %v7233_v1 = vpop.f32.mrb[77].mxu1  ;;  %v951_v35 = vpack.c.bf16 %v607_v6, %v599_v5  ;;  %v623_v46 = vld [vmem:[%s6031_s18 + $0xaf8] sm:$0xff] }
 0x2ac   : > { %8043 = vst [vmem:[#allocation40_spill] sm:$0xff] %v7233_v1 }
 0x2b0   : > { %3082 = vmatmul.mubr.bf16.gmra.mrb[68].mxu0 %v926_v17  ;;  %v7235_v17 = vpop.f32.mrb[78].mxu1 }
 0x2b1   : > { %3091 = vmatprep.mubr.bf16.mxu0 %v935_v39  ;;  %8044 = vst [vmem:[#allocation41_spill] sm:$0xff] %v7235_v17  ;;  %v582_v39 = vld [vmem:[%s6031_s18 + $0x9b0] sm:$0xff]  ;;  %v7239_v20 = vpop.f32.mrb[79].mxu1 }
 0x2b2   : > { %8045 = vst [vmem:[#allocation42_spill] sm:$0xff] %v7239_v20  ;;  %v942_v47 = vpack.c.bf16 %v590_v34, %v582_v39  ;;  %v7243_v7 = vpop.f32.mrb[80].mxu1  ;;  %v606_v17 = vld [vmem:[%s6031_s18 + $0xa70] sm:$0xff]  ;;  %v615_v20 = vld [vmem:[%s6031_s18 + $0xab8] sm:$0xff] }
 0x2b3   : > { %8046 = vst [vmem:[#allocation43_spill] sm:$0xff] %v7243_v7  ;;  %v7245_v22 = vpop.f32.mrb[81].mxu1  ;;  %v959_v5 = vpack.c.bf16 %v623_v46, %v615_v20  ;;  %v639_v7 = vld [vmem:[%s6031_s18 + $0xb78] sm:$0xff] }
 0x2b4   : > { %8047 = vst [vmem:[#allocation44_spill] sm:$0xff] %v7245_v22 }
 0x2b8   : > { %3092 = vmatmul.mubr.bf16.gmra.mrb[72].mxu0 %v934_v24  ;;  %v7247_v24 = vpop.f32.mrb[82].mxu1 }
 0x2b9   : > { %3101 = vmatprep.mubr.bf16.mxu0 %v943_v42  ;;  %8048 = vst [vmem:[#allocation45_spill] sm:$0xff] %v7247_v24  ;;  %v598_v42 = vld [vmem:[%s6031_s18 + $0xa30] sm:$0xff]  ;;  %v7251_v1 = vpop.f32.mrb[83].mxu1 }
 0x2ba   : > { %8049 = vst [vmem:[#allocation46_spill] sm:$0xff] %v7251_v1  ;;  %v950_v34 = vpack.c.bf16 %v606_v17, %v598_v42  ;;  %v7255_v6 = vpop.f32.mrb[84].mxu1  ;;  %v622_v24 = vld [vmem:[%s6031_s18 + $0xaf0] sm:$0xff]  ;;  %v631_v1 = vld [vmem:[%s6031_s18 + $0xb38] sm:$0xff] }
 0x2bb   : > { %8050 = vst [vmem:[#allocation47_spill] sm:$0xff] %v7255_v6  ;;  %v7257_v39 = vpop.f32.mrb[85].mxu1  ;;  %v967_v20 = vpack.c.bf16 %v639_v7, %v631_v1  ;;  %v655_v6 = vld [vmem:[%s6031_s18 + $0xbf8] sm:$0xff] }
 0x2bc   : > { %8051 = vst [vmem:[#allocation48_spill] sm:$0xff] %v7257_v39 }
 0x2c0   : > { %3102 = vmatmul.mubr.bf16.gmra.mrb[76].mxu0 %v942_v47  ;;  %v7259_v47 = vpop.f32.mrb[86].mxu1 }
 0x2c1   : > { %3111 = vmatprep.mubr.bf16.mxu0 %v951_v35  ;;  %8052 = vst [vmem:[#allocation49_spill] sm:$0xff] %v7259_v47  ;;  %v614_v35 = vld [vmem:[%s6031_s18 + $0xab0] sm:$0xff]  ;;  %v7263_v22 = vpop.f32.mrb[87].mxu1 }
 0x2c2   : > { %8053 = vst [vmem:[#allocation50_spill] sm:$0xff] %v7263_v22  ;;  %v958_v17 = vpack.c.bf16 %v622_v24, %v614_v35  ;;  %v7267_v46 = vpop.f32.mrb[88].mxu1  ;;  %v638_v47 = vld [vmem:[%s6031_s18 + $0xb70] sm:$0xff]  ;;  %v647_v22 = vld [vmem:[%s6031_s18 + $0xbb8] sm:$0xff] }
 0x2c3   : > { %8054 = vst [vmem:[#allocation51_spill] sm:$0xff] %v7267_v46  ;;  %v7269_v42 = vpop.f32.mrb[89].mxu1  ;;  %v975_v1 = vpack.c.bf16 %v655_v6, %v647_v22  ;;  %v671_v46 = vld [vmem:[%s6031_s18 + $0xc78] sm:$0xff] }
 0x2c4   : > { %8055 = vst [vmem:[#allocation52_spill] sm:$0xff] %v7269_v42 }
 0x2c8   : > { %3112 = vmatmul.mubr.bf16.gmra.mrb[80].mxu0 %v950_v34  ;;  %v7271_v34 = vpop.f32.mrb[90].mxu1 }
 0x2c9   : > { %3121 = vmatprep.mubr.bf16.mxu0 %v959_v5  ;;  %8056 = vst [vmem:[#allocation53_spill] sm:$0xff] %v7271_v34  ;;  %v630_v5 = vld [vmem:[%s6031_s18 + $0xb30] sm:$0xff]  ;;  %v7275_v39 = vpop.f32.mrb[91].mxu1 }
 0x2ca   : > { %8057 = vst [vmem:[#allocation54_spill] sm:$0xff] %v7275_v39  ;;  %v966_v24 = vpack.c.bf16 %v638_v47, %v630_v5  ;;  %v7279_v7 = vpop.f32.mrb[92].mxu1  ;;  %v654_v34 = vld [vmem:[%s6031_s18 + $0xbf0] sm:$0xff]  ;;  %v663_v39 = vld [vmem:[%s6031_s18 + $0xc38] sm:$0xff] }
 0x2cb   : > { %8058 = vst [vmem:[#allocation55_spill] sm:$0xff] %v7279_v7  ;;  %v7281_v35 = vpop.f32.mrb[93].mxu1  ;;  %v983_v22 = vpack.c.bf16 %v671_v46, %v663_v39  ;;  %v687_v7 = vld [vmem:[%s6031_s18 + $0xcf8] sm:$0xff] }
 0x2cc   : > { %8059 = vst [vmem:[#allocation56_spill] sm:$0xff] %v7281_v35 }
 0x2d0   : > { %3122 = vmatmul.mubr.bf16.gmra.mrb[84].mxu0 %v958_v17  ;;  %v7283_v17 = vpop.f32.mrb[94].mxu1 }
 0x2d1   : > { %3131 = vmatprep.mubr.bf16.mxu0 %v967_v20  ;;  %8060 = vst [vmem:[#allocation57_spill] sm:$0xff] %v7283_v17  ;;  %v646_v20 = vld [vmem:[%s6031_s18 + $0xbb0] sm:$0xff]  ;;  %v7287_v42 = vpop.f32.mrb[95].mxu1 }
 0x2d2   : > { %8061 = vst [vmem:[#allocation58_spill] sm:$0xff] %v7287_v42  ;;  %v974_v47 = vpack.c.bf16 %v654_v34, %v646_v20  ;;  %v7291_v6 = vpop.f32.mrb[96].mxu1  ;;  %v670_v17 = vld [vmem:[%s6031_s18 + $0xc70] sm:$0xff]  ;;  %v679_v42 = vld [vmem:[%s6031_s18 + $0xcb8] sm:$0xff] }
 0x2d3   : > { %8062 = vst [vmem:[#allocation59_spill] sm:$0xff] %v7291_v6  ;;  %v7293_v5 = vpop.f32.mrb[97].mxu1  ;;  %v991_v39 = vpack.c.bf16 %v687_v7, %v679_v42  ;;  %v695_v6 = vld [vmem:[%s6031_s18 + $0xd38] sm:$0xff] }
 0x2d4   : > { %8063 = vst [vmem:[#allocation60_spill] sm:$0xff] %v7293_v5 }
 0x2d8   : > { %3132 = vmatmul.mubr.bf16.gmra.mrb[88].mxu0 %v966_v24  ;;  %v7295_v24 = vpop.f32.mrb[98].mxu1 }
 0x2d9   : > { %3141 = vmatprep.mubr.bf16.mxu0 %v975_v1  ;;  %8064 = vst [vmem:[#allocation61_spill] sm:$0xff] %v7295_v24  ;;  %v662_v1 = vld [vmem:[%s6031_s18 + $0xc30] sm:$0xff]  ;;  %v7299_v35 = vpop.f32.mrb[99].mxu1 }
 0x2da   : > { %8065 = vst [vmem:[#allocation62_spill] sm:$0xff] %v7299_v35  ;;  %v982_v34 = vpack.c.bf16 %v670_v17, %v662_v1  ;;  %v7303_v46 = vpop.f32.mrb[100].mxu1  ;;  %v686_v24 = vld [vmem:[%s6031_s18 + $0xcf0] sm:$0xff]  ;;  %v1170_v35 = vlaneseq  ;;  %v703_v17 = vld [vmem:[%s6031_s18 + $0xd78] sm:$0xff] }
 0x2db   : > { %8066 = vst [vmem:[#allocation63_spill] sm:$0xff] %v7303_v46  ;;  %v7305_v20 = vpop.f32.mrb[101].mxu1  ;;  %v999_v7 = vpack.c.bf16 %v703_v17, %v695_v6  ;;  %v1168_v6 = vld [vmem:[#allocation4] sm:$0x3] }
 0x2dc   : > { %8067 = vst [vmem:[#allocation64_spill] sm:$0xff] %v7305_v20  ;;  %v1171_v1 = vshrl.u32 %v1170_v35, 7  ;;  %v702_v20 = vld [vmem:[%s6031_s18 + $0xd70] sm:$0xff] }
 0x2de   : > { %v1172_v2 = vsub.s32 0, %v1171_v1  ;;  %v1176_v35 = vsub.s32 1, %v1171_v1 }
 0x2e0   : > { %3142 = vmatmul.mubr.bf16.gmra.mrb[92].mxu0 %v974_v47  ;;  %v7307_v47 = vpop.f32.mrb[102].mxu1  ;;  %v7327_v17 = vrot.slane %v1168_v6, %v1172_v2 }
 0x2e1   : > { %3151 = vmatprep.mubr.bf16.mxu0 %v983_v22  ;;  %8068 = vst [vmem:[#allocation65_spill] sm:$0xff] %v7307_v47  ;;  %v678_v22 = vld [vmem:[%s6031_s18 + $0xcb0] sm:$0xff]  ;;  %v7311_v5 = vpop.f32.mrb[103].mxu1 }
 0x2e2   : > { %8069 = vst [vmem:[#allocation66_spill] sm:$0xff] %v7311_v5  ;;  %v990_v42 = vpack.c.bf16 %v686_v24, %v678_v22  ;;  %v7315_v46 = vpop.f32.mrb[104].mxu1  ;;  %v1007_v22 = vpack.c.bf16 %v719_v21, %v711_v36  ;;  %v727_v21 = vld [vmem:[%s6031_s18 + $0xe38] sm:$0xff] }
 0x2e3   : > { %8070 = vst [vmem:[#allocation67_spill] sm:$0xff] %v7315_v46  ;;  %v718_v46 = vld [vmem:[%s6031_s18 + $0xdf0] sm:$0xff]  ;;  %v735_v36 = vld [vmem:[%s6031_s18 + $0xe78] sm:$0xff] }
 0x2e8   : > { %3152 = vmatmul.mubr.bf16.gmra.mrb[96].mxu0 %v982_v34  ;;  %v7317_v34 = vpop.f32.mrb[105].mxu1 }
 0x2e9   : > { %3161 = vmatprep.mubr.bf16.mxu0 %v991_v39  ;;  %8071 = vst [vmem:[#allocation68_spill] sm:$0xff] %v7317_v34  ;;  %v7319_v47 = vpop.f32.mrb[106].mxu1  ;;  %v694_v39 = vld [vmem:[%s6031_s18 + $0xd30] sm:$0xff] }
 0x2ea   : > { %8072 = vst [vmem:[#allocation69_spill] sm:$0xff] %v7319_v47  ;;  %v7323_v5 = vpop.f32.mrb[107].mxu1  ;;  %v998_v24 = vpack.c.bf16 %v702_v20, %v694_v39  ;;  %v710_v34 = vld [vmem:[%s6031_s18 + $0xdb0] sm:$0xff]  ;;  %v1855_v20 = vadd.f32 %v6855_v18, %v7327_v17  ;;  %v1859_v39 = vadd.f32 %v6867_v25, %v7327_v17  ;;  %v1015_v18 = vpack.c.bf16 %v735_v36, %v727_v21  ;;  %v743_v36 = vld [vmem:[%s6031_s18 + $0xeb8] sm:$0xff] }
 0x2eb   : > { %8073 = vst [vmem:[#allocation70_spill] sm:$0xff] %v7323_v5 }
 0x2f0   : > { %3162 = vmatmul.mubr.bf16.gmra.mrb[100].mxu0 %v990_v42  ;;  %v7329_v42 = vpop.f32.mrb[108].mxu1 }
 0x2f1   : > { %3171 = vmatprep.mubr.bf16.mxu0 %v999_v7  ;;  %8074 = vst [vmem:[#allocation71_spill] sm:$0xff] %v7329_v42  ;;  %v7331_v7 = vrot.slane %v1168_v6, %v1176_v35  ;;  %v7333_v47 = vpop.f32.mrb[109].mxu1 }
 0x2f2   : > { %8075 = vst [vmem:[#allocation72_spill] sm:$0xff] %v7333_v47  ;;  %v7335_v5 = vpop.f32.mrb[110].mxu1 }
 0x2f3   : > { %8076 = vst [vmem:[#allocation73_spill] sm:$0xff] %v7335_v5  ;;  %v7339_v45 = vpop.f32.mrb[111].mxu1  ;;  %v1857_v2 = vadd.f32 %v6863_v55, %v7331_v7 }
 0x2f4   : > { %8077 = vst [vmem:[#allocation74_spill] sm:$0xff] %v7339_v45  ;;  %v7351_v42 = vpop.f32.mrb[112].mxu1 }
 0x2f8   : > { %3172 = vmatmul.mubr.bf16.gmra.mrb[104].mxu0 %v998_v24  ;;  %v1006_v24 = vpack.c.bf16 %v718_v46, %v710_v34  ;;  %v734_v34 = vld [vmem:[%s6031_s18 + $0xe70] sm:$0xff] }
 0x2f9   : > { %3181 = vmatprep.mubr.bf16.mxu0 %v1007_v22  ;;  %v1861_v22 = vadd.f32 %v6871_v26, %v7331_v7  ;;  %v726_v26 = vld [vmem:[%s6031_s18 + $0xe30] sm:$0xff] }
 0x2fb   : > { %v2913_v1 = vpop.f32.mrb[0].mxu0 }
 0x2fc   : > { %v4618_v6 = vadd.f32 %v2913_v1, %v1855_v20  ;;  %v2915_v35 = vpop.f32.mrb[1].mxu0  ;;  %v7353_v20 = vpop.f32.mrb[113].mxu1 }
 0x2fd   : > { %v4620_v45 = vadd.f32 %v2915_v35, %v1857_v2  ;;  %v2917_v5 = vpop.f32.mrb[2].mxu0  ;;  %v7355_v46 = vpop.f32.mrb[114].mxu1  ;;  %v751_v2 = vld [vmem:[%s6031_s18 + $0xef8] sm:$0xff]  ;;  %v1014_v35 = vpack.c.bf16 %v734_v34, %v726_v26 }
 0x2fe   : > { %5448 = vtanh.f32 %v4618_v6  ;;  %v4622_v47 = vadd.f32 %v2917_v5, %v1859_v39  ;;  %v2919_v55 = vpop.f32.mrb[3].mxu0  ;;  %v7359_v21 = vpop.f32.mrb[115].mxu1  ;;  %v1865_v5 = vadd.f32 %v6873_v58, %v7327_v17 }
 0x2ff   : > { %5450 = vtanh.f32 %v4620_v45  ;;  %v4624_v25 = vadd.f32 %v2919_v55, %v1861_v22  ;;  %8078 = vst [vmem:[#allocation75_spill] sm:$0xff] %v7359_v21  ;;  %v1867_v45 = vadd.f32 %v6879_v62, %v7331_v7  ;;  %v1023_v55 = vpack.c.bf16 %v751_v2, %v743_v36  ;;  %v7371_v21 = vpop.f32.mrb[116].mxu1  ;;  %v750_v36 = vld [vmem:[%s6031_s18 + $0xef0] sm:$0xff] }
 0x300   : > { %5452 = vtanh.f32 %v4622_v47  ;;  %3182 = vmatmul.mubr.bf16.gmra.mrb[108].mxu0 %v1006_v24  ;;  %v1869_v47 = vadd.f32 %v6883_v13, %v7327_v17  ;;  %v1871_v24 = vadd.f32 %v6887_v15, %v7331_v7  ;;  %8079 = vst [vmem:[#allocation76_spill] sm:$0xff] %v7371_v21  ;;  %v7373_v13 = vpop.f32.mrb[117].mxu1 }
 0x301   : > { %5454 = vtanh.f32 %v4624_v25  ;;  %3191 = vmatprep.mubr.bf16.mxu0 %v1015_v18  ;;  %8080 = vst [vmem:[#allocation77_spill] sm:$0xff] %v7373_v13  ;;  %v7375_v15 = vpop.f32.mrb[118].mxu1 }
 0x302   : > { %8081 = vst [vmem:[#allocation78_spill] sm:$0xff] %v7375_v15  ;;  %v7379_v2 = vpop.f32.mrb[119].mxu1 }
 0x303   : > { %v2923_v1 = vpop.f32.mrb[4].mxu0  ;;  %8082 = vst [vmem:[#allocation79_spill] sm:$0xff] %v7379_v2  ;;  %v1881_v2 = vadd.f32 %v6903_v11, %v7331_v7 }
 0x304   : > { %v4626_v39 = vadd.f32 %v2923_v1, %v1865_v5  ;;  %v2925_v6 = vpop.f32.mrb[5].mxu0  ;;  %v742_v5 = vld [vmem:[%s6031_s18 + $0xeb0] sm:$0xff]  ;;  %v1875_v1 = vadd.f32 %v6889_v8, %v7327_v17 }
 0x305   : > { %v4628_v22 = vadd.f32 %v2925_v6, %v1867_v45  ;;  %v2927_v18 = vpop.f32.mrb[6].mxu0 }
 0x306   : > { %5456 = vtanh.f32 %v4626_v39  ;;  %v4630_v58 = vadd.f32 %v2927_v18, %v1869_v47  ;;  %v2929_v25 = vpop.f32.mrb[7].mxu0  ;;  %v759_v47 = vld [vmem:[%s6031_s18 + $0xf38] sm:$0xff]  ;;  %v1879_v18 = vadd.f32 %v6899_v31, %v7327_v17 }
 0x307   : > { %5458 = vtanh.f32 %v4628_v22  ;;  %v4632_v62 = vadd.f32 %v2929_v25, %v1871_v24  ;;  %v767_v39 = vld [vmem:[%s6031_s18 + $0xf78] sm:$0xff]  ;;  %v1877_v24 = vadd.f32 %v6895_v9, %v7331_v7 }
 0x308   : > { %v5449_v26 = vpop.eup %5448  ;;  %5460 = vtanh.f32 %v4630_v58  ;;  %3192 = vmatmul.mubr.bf16.gmra.mrb[112].mxu0 %v1014_v35  ;;  %v1031_v13 = vpack.c.bf16 %v767_v39, %v759_v47 }
 0x309   : > { %v5451_v34 = vpop.eup %5450  ;;  %5462 = vtanh.f32 %v4632_v62  ;;  %3201 = vmatprep.mubr.bf16.mxu0 %v1023_v55  ;;  %v1022_v62 = vpack.c.bf16 %v750_v36, %v742_v5 }
 0x30a   : > { %v5453_v45 = vpop.eup %5452 }
 0x30b   : > { %v5455_v6 = vpop.eup %5454  ;;  %v2933_v35 = vpop.f32.mrb[8].mxu0  ;;  %v3360_v22 = vpack.c.bf16 %v5453_v45, %v5449_v26  ;;  %v758_v45 = vld [vmem:[%s6031_s18 + $0xf30] sm:$0xff] }
 0x30c   : > { %v4634_v55 = vadd.f32 %v2933_v35, %v1875_v1  ;;  %v2935_v58 = vpop.f32.mrb[9].mxu0  ;;  %v3361_v25 = vpack.c.bf16 %v5455_v6, %v5451_v34  ;;  %v7391_v26 = vpop.f32.mrb[120].mxu1  ;;  %v766_v1 = vld [vmem:[%s6031_s18 + $0xf70] sm:$0xff]  ;;  %v783_v6 = vld [vmem:[%s6031_s18 + $0xff8] sm:$0xff] }
 0x30d   : > { %v4636_v15 = vadd.f32 %v2935_v58, %v1877_v24  ;;  %v2937_v8 = vpop.f32.mrb[10].mxu0  ;;  %v7393_v34 = vpop.f32.mrb[121].mxu1 }
 0x30e   : > { %5464 = vtanh.f32 %v4634_v55  ;;  %v4638_v21 = vadd.f32 %v2937_v8, %v1879_v18  ;;  %v2939_v9 = vpop.f32.mrb[11].mxu0  ;;  %3591 = vmatprep.mubr.bf16.mxu1 %v3361_v25  ;;  %v7395_v11 = vpop.f32.mrb[122].mxu1  ;;  %v1889_v18 = vadd.f32 %v6915_v3, %v7327_v17  ;;  %v1030_v25 = vpack.c.bf16 %v766_v1, %v758_v45  ;;  %v774_v1 = vld [vmem:[%s6031_s18 + $0xfb0] sm:$0xff] }
 0x30f   : > { %5466 = vtanh.f32 %v4636_v15  ;;  %v4640_v31 = vadd.f32 %v2939_v9, %v1881_v2  ;;  %3592 = vmatmul.mubr.bf16.vlgmr.msra.gmra.mrb[128].mxu1 %v3360_v22  ;;  %v7399_v47 = vpop.f32.mrb[123].mxu1  ;;  %v1885_v15 = vadd.f32 %v6905_v0, %v7327_v17  ;;  %v775_v2 = vld [vmem:[%s6031_s18 + $0xfb8] sm:$0xff] }
 0x310   : > { %v5457_v5 = vpop.eup %5456  ;;  %5468 = vtanh.f32 %v4638_v21  ;;  %3202 = vmatmul.mubr.bf16.gmra.mrb[116].mxu0 %v1022_v62  ;;  %v1887_v21 = vadd.f32 %v6911_v43, %v7331_v7  ;;  %v1891_v62 = vadd.f32 %v6919_v19, %v7331_v7  ;;  %v1039_v9 = vpack.c.bf16 %v783_v6, %v775_v2 }
 0x311   : > { %v5459_v36 = vpop.eup %5458  ;;  %5470 = vtanh.f32 %v4640_v31  ;;  %3211 = vmatprep.mubr.bf16.mxu0 %v1031_v13 }
 0x312   : > { %v5461_v39 = vpop.eup %5460 }
 0x313   : > { %v5463_v24 = vpop.eup %5462  ;;  %v2943_v35 = vpop.f32.mrb[12].mxu0  ;;  %v3362_v22 = vpack.c.bf16 %v5461_v39, %v5457_v5 }
 0x314   : > { %v4642_v13 = vadd.f32 %v2943_v35, %v1885_v15  ;;  %v2945_v55 = vpop.f32.mrb[13].mxu0  ;;  %v3363_v58 = vpack.c.bf16 %v5463_v24, %v5459_v36  ;;  %v7411_v5 = vpop.f32.mrb[124].mxu1  ;;  %v782_v15 = vld [vmem:[%s6031_s18 + $0xff0] sm:$0xff]  ;;  %v1895_v24 = vadd.f32 %v6921_v50, %v7327_v17  ;;  %v1897_v35 = vadd.f32 %v6927_v56, %v7331_v7  ;;  %s4416_s18 = sshll.u32 %s6027_s13, 9 }
 0x315   : > { %v4644_v8 = vadd.f32 %v2945_v55, %v1887_v21  ;;  %v2947_v0 = vpop.f32.mrb[14].mxu0  ;;  %v7413_v39 = vpop.f32.mrb[125].mxu1  ;;  %s7636_s13 = scalar_lea.vmem [#allocation6], %s4416_s18  }
 0x316   : > { %5472 = vtanh.f32 %v4642_v13  ;;  %v4646_v31 = vadd.f32 %v2947_v0, %v1889_v18  ;;  %v2949_v43 = vpop.f32.mrb[15].mxu0  ;;  %3599 = vmatprep.mubr.bf16.mxu1 %v3363_v58  ;;  %v7415_v19 = vpop.f32.mrb[126].mxu1  ;;  %v1899_v13 = vadd.f32 %v6931_v59, %v7327_v17 }
 0x317   : > { %5474 = vtanh.f32 %v4644_v8  ;;  %v4648_v3 = vadd.f32 %v2949_v43, %v1891_v62  ;;  %3600 = vmatmul.mubr.bf16.gmra.mrb[132].mxu1 %v3362_v22  ;;  %v7419_v2 = vpop.f32.mrb[127].mxu1  ;;  %v1038_v62 = vpack.c.bf16 %v782_v15, %v774_v1  ;;  %v1901_v8 = vadd.f32 %v6935_v60, %v7331_v7 }
 0x318   : > { %v5465_v36 = vpop.eup %5464  ;;  %5476 = vtanh.f32 %v4646_v31  ;;  %3212 = vmatmul.mubr.bf16.gmra.mrb[120].mxu0 %v1030_v25  ;;  %v1907_v60 = vadd.f32 %v6943_v23, %v7331_v7 }
 0x319   : > { %v5467_v45 = vpop.eup %5466  ;;  %5478 = vtanh.f32 %v4648_v3  ;;  %3221 = vmatprep.mubr.bf16.mxu0 %v1039_v9 }
 0x31a   : > { %v5469_v6 = vpop.eup %5468 }
 0x31b   : > { %v5471_v21 = vpop.eup %5470  ;;  %v2953_v22 = vpop.f32.mrb[16].mxu0  ;;  %v3364_v18 = vpack.c.bf16 %v5469_v6, %v5465_v36  ;;  %v1905_v36 = vadd.f32 %v6937_v32, %v7327_v17  ;;  %v1909_v6 = vadd.f32 %v6947_v28, %v7327_v17 }
 0x31c   : > { %v4650_v55 = vadd.f32 %v2953_v22, %v1895_v24  ;;  %v2955_v58 = vpop.f32.mrb[17].mxu0  ;;  %v3365_v25 = vpack.c.bf16 %v5471_v21, %v5467_v45  ;;  %v1911_v22 = vadd.f32 %v6951_v30, %v7331_v7  ;;  %v1917_v30 = vadd.f32 %v6963_v16, %v7331_v7 }
 0x31d   : > { %v4652_v0 = vadd.f32 %v2955_v58, %v1897_v35  ;;  %v2957_v9 = vpop.f32.mrb[18].mxu0 }
 0x31e   : > { %5480 = vtanh.f32 %v4650_v55  ;;  %v4654_v50 = vadd.f32 %v2957_v9, %v1899_v13  ;;  %v2959_v31 = vpop.f32.mrb[19].mxu0  ;;  %3607 = vmatprep.mubr.bf16.mxu1 %v3365_v25 }
 0x31f   : > { %5482 = vtanh.f32 %v4652_v0  ;;  %v4656_v56 = vadd.f32 %v2959_v31, %v1901_v8  ;;  %3608 = vmatmul.mubr.bf16.gmra.mrb[136].mxu1 %v3364_v18 }
 0x320   : > { %v5473_v43 = vpop.eup %5472  ;;  %5484 = vtanh.f32 %v4654_v50  ;;  %3222 = vmatmul.mubr.bf16.gmra.mrb[124].mxu0 %v1038_v62  ;;  %v1915_v62 = vadd.f32 %v6954_v10, %v7327_v17  ;;  %v1919_v50 = vadd.f32 %v6967_v48, %v7327_v17 }
 0x321   : > { %v5475_v59 = vpop.eup %5474  ;;  %5486 = vtanh.f32 %v4656_v56 }
 0x322   : > { %v5477_v3 = vpop.eup %5476 }
 0x323   : > { %v5479_v45 = vpop.eup %5478  ;;  %v2963_v1 = vpop.f32.mrb[20].mxu0  ;;  %v3366_v15 = vpack.c.bf16 %v5477_v3, %v5473_v43 }
 0x324   : > { %v4658_v24 = vadd.f32 %v2963_v1, %v1905_v36  ;;  %v2965_v21 = vpop.f32.mrb[21].mxu0  ;;  %v3367_v35 = vpack.c.bf16 %v5479_v45, %v5475_v59  ;;  %v1921_v59 = vadd.f32 %v6971_v4, %v7331_v7  ;;  %v1927_v4 = vadd.f32 %v6983_v61, %v7331_v7 }
 0x325   : > { %v4660_v18 = vadd.f32 %v2965_v21, %v1907_v60  ;;  %v2967_v13 = vpop.f32.mrb[22].mxu0 }
 0x326   : > { %5488 = vtanh.f32 %v4658_v24  ;;  %v4662_v55 = vadd.f32 %v2967_v13, %v1909_v6  ;;  %v2969_v32 = vpop.f32.mrb[23].mxu0  ;;  %3615 = vmatprep.mubr.bf16.mxu1 %v3367_v35  ;;  %v1929_v35 = vadd.f32 %v6987_v63, %v7327_v17 }
 0x327   : > { %5490 = vtanh.f32 %v4660_v18  ;;  %v4664_v58 = vadd.f32 %v2969_v32, %v1911_v22  ;;  %3616 = vmatmul.mubr.bf16.gmra.mrb[140].mxu1 %v3366_v15  ;;  %v1925_v15 = vadd.f32 %v6974_v52, %v7327_v17 }
 0x328   : > { %v5481_v23 = vpop.eup %5480  ;;  %5492 = vtanh.f32 %v4662_v55  ;;  %v1931_v55 = vadd.f32 %v6991_v38, %v7331_v7  ;;  %v1937_v38 = vadd.f32 %v7003_v37, %v7331_v7 }
 0x329   : > { %v5483_v25 = vpop.eup %5482  ;;  %5494 = vtanh.f32 %v4664_v58 }
 0x32a   : > { %v5485_v28 = vpop.eup %5484 }
 0x32b   : > { %v5487_v8 = vpop.eup %5486  ;;  %v2973_v0 = vpop.f32.mrb[24].mxu0  ;;  %v3368_v9 = vpack.c.bf16 %v5485_v28, %v5481_v23 }
 0x32c   : > { %v4666_v31 = vadd.f32 %v2973_v0, %v1915_v62  ;;  %v2975_v56 = vpop.f32.mrb[25].mxu0  ;;  %v3369_v43 = vpack.c.bf16 %v5487_v8, %v5483_v25  ;;  %v1935_v62 = vadd.f32 %v6994_v40, %v7327_v17 }
 0x32d   : > { %v4668_v3 = vadd.f32 %v2975_v56, %v1917_v30  ;;  %v2977_v36 = vpop.f32.mrb[26].mxu0 }
 0x32e   : > { %5496 = vtanh.f32 %v4666_v31  ;;  %v4670_v45 = vadd.f32 %v2977_v36, %v1919_v50  ;;  %v2979_v10 = vpop.f32.mrb[27].mxu0  ;;  %3623 = vmatprep.mubr.bf16.mxu1 %v3369_v43  ;;  %v1941_v43 = vadd.f32 %v7011_v49, %v7331_v7  ;;  %v1947_v49 = vadd.f32 %v7023_v33, %v7331_v7 }
 0x32f   : > { %5498 = vtanh.f32 %v4668_v3  ;;  %v4672_v60 = vadd.f32 %v2979_v10, %v1921_v59  ;;  %3624 = vmatmul.mubr.bf16.gmra.mrb[144].mxu1 %v3368_v9  ;;  %v1939_v9 = vadd.f32 %v7007_v41, %v7327_v17 }
 0x330   : > { %v5489_v16 = vpop.eup %5488  ;;  %5500 = vtanh.f32 %v4670_v45 }
 0x331   : > { %v5491_v1 = vpop.eup %5490  ;;  %5502 = vtanh.f32 %v4672_v60  ;;  %v1945_v60 = vadd.f32 %v7014_v51, %v7327_v17 }
 0x332   : > { %v5493_v48 = vpop.eup %5492 }
 0x333   : > { %v5495_v6 = vpop.eup %5494  ;;  %v2983_v24 = vpop.f32.mrb[28].mxu0  ;;  %v3370_v21 = vpack.c.bf16 %v5493_v48, %v5489_v16 }
 0x334   : > { %v4674_v22 = vadd.f32 %v2983_v24, %v1925_v15  ;;  %v2985_v18 = vpop.f32.mrb[29].mxu0  ;;  %v3371_v13 = vpack.c.bf16 %v5495_v6, %v5491_v1  ;;  %v1949_v15 = vadd.f32 %v7027_v14, %v7327_v17 }
 0x335   : > { %v4676_v32 = vadd.f32 %v2985_v18, %v1927_v4  ;;  %v2987_v58 = vpop.f32.mrb[30].mxu0 }
 0x336   : > { %5504 = vtanh.f32 %v4674_v22  ;;  %v4678_v23 = vadd.f32 %v2987_v58, %v1929_v35  ;;  %v2989_v52 = vpop.f32.mrb[31].mxu0  ;;  %3631 = vmatprep.mubr.bf16.mxu1 %v3371_v13 }
 0x337   : > { %5506 = vtanh.f32 %v4676_v32  ;;  %v4680_v25 = vadd.f32 %v2989_v52, %v1931_v55  ;;  %3632 = vmatmul.mubr.bf16.gmra.mrb[148].mxu1 %v3370_v21  ;;  %v1951_v21 = vadd.f32 %v7031_v29, %v7331_v7  ;;  %v1955_v32 = vadd.f32 %v7034_v44, %v7327_v17 }
 0x338   : > { %v5497_v61 = vpop.eup %5496  ;;  %5508 = vtanh.f32 %v4678_v23  ;;  %v1957_v29 = vadd.f32 %v7043_v53, %v7331_v7 }
 0x339   : > { %v5499_v28 = vpop.eup %5498  ;;  %5510 = vtanh.f32 %v4680_v25  ;;  %v1959_v25 = vadd.f32 %v7047_v54, %v7327_v17 }
 0x33a   : > { %v5501_v63 = vpop.eup %5500 }
 0x33b   : > { %v5503_v8 = vpop.eup %5502  ;;  %v2993_v30 = vpop.f32.mrb[32].mxu0  ;;  %v3372_v0 = vpack.c.bf16 %v5501_v63, %v5497_v61 }
 0x33c   : > { %v4682_v50 = vadd.f32 %v2993_v30, %v1935_v62  ;;  %v2995_v31 = vpop.f32.mrb[33].mxu0  ;;  %v3373_v56 = vpack.c.bf16 %v5503_v8, %v5499_v28  ;;  %v1961_v62 = vadd.f32 %v7051_v57, %v7331_v7  ;;  %v1967_v57 = vadd.f32 %v7063_v12, %v7331_v7 }
 0x33d   : > { %v4684_v59 = vadd.f32 %v2995_v31, %v1937_v38  ;;  %v2997_v3 = vpop.f32.mrb[34].mxu0 }
 0x33e   : > { %5512 = vtanh.f32 %v4682_v50  ;;  %v4686_v36 = vadd.f32 %v2997_v3, %v1939_v9  ;;  %v2999_v40 = vpop.f32.mrb[35].mxu0  ;;  %3639 = vmatprep.mubr.bf16.mxu1 %v3373_v56  ;;  %v1965_v50 = vadd.f32 %v7054_v27, %v7327_v17 }
 0x33f   : > { %5514 = vtanh.f32 %v4684_v59  ;;  %v4688_v45 = vadd.f32 %v2999_v40, %v1941_v43  ;;  %3640 = vmatmul.mubr.bf16.gmra.mrb[152].mxu1 %v3372_v0  ;;  %v8083_v59 = vld [vmem:[#allocation9_spill] sm:$0xff] }
 0x340   : > { %v5505_v37 = vpop.eup %5504  ;;  %5516 = vtanh.f32 %v4686_v36  ;;  %v1969_v3 = vadd.f32 %v8083_v59, %v7327_v17 }
 0x341   : > { %v5507_v10 = vpop.eup %5506  ;;  %5518 = vtanh.f32 %v4688_v45 }
 0x342   : > { %v5509_v41 = vpop.eup %5508 }
 0x343   : > { %v5511_v16 = vpop.eup %5510  ;;  %v3003_v1 = vpop.f32.mrb[36].mxu0  ;;  %v3374_v48 = vpack.c.bf16 %v5509_v41, %v5505_v37  ;;  %v8084_v37 = vld [vmem:[#allocation10_spill] sm:$0xff] }
 0x344   : > { %v4690_v6 = vadd.f32 %v3003_v1, %v1945_v60  ;;  %v3005_v4 = vpop.f32.mrb[37].mxu0  ;;  %v3375_v24 = vpack.c.bf16 %v5511_v16, %v5507_v10  ;;  %v1971_v10 = vadd.f32 %v8084_v37, %v7331_v7 }
 0x345   : > { %v4692_v35 = vadd.f32 %v3005_v4, %v1947_v49  ;;  %v3007_v22 = vpop.f32.mrb[38].mxu0 }
 0x346   : > { %5520 = vtanh.f32 %v4690_v6  ;;  %v4694_v18 = vadd.f32 %v3007_v22, %v1949_v15  ;;  %v3009_v51 = vpop.f32.mrb[39].mxu0  ;;  %3647 = vmatprep.mubr.bf16.mxu1 %v3375_v24  ;;  %v8085_v15 = vld [vmem:[#allocation11_spill] sm:$0xff]  ;;  %v8086_v24 = vld [vmem:[#allocation12_spill] sm:$0xff] }
 0x347   : > { %5522 = vtanh.f32 %v4692_v35  ;;  %v4696_v13 = vadd.f32 %v3009_v51, %v1951_v21  ;;  %3648 = vmatmul.mubr.bf16.gmra.mrb[156].mxu1 %v3374_v48  ;;  %v1975_v6 = vadd.f32 %v8085_v15, %v7327_v17  ;;  %v1977_v21 = vadd.f32 %v8086_v24, %v7331_v7  ;;  %v8095_v15 = vld [vmem:[#allocation21_spill] sm:$0xff] }
 0x348   : > { %v5513_v33 = vpop.eup %5512  ;;  %5524 = vtanh.f32 %v4694_v18  ;;  %v8087_v18 = vld [vmem:[#allocation13_spill] sm:$0xff] }
 0x349   : > { %v5515_v55 = vpop.eup %5514  ;;  %5526 = vtanh.f32 %v4696_v13  ;;  %v1979_v51 = vadd.f32 %v8087_v18, %v7327_v17 }
 0x34a   : > { %v5517_v14 = vpop.eup %5516 }
 0x34b   : > { %v5519_v58 = vpop.eup %5518  ;;  %v3013_v23 = vpop.f32.mrb[40].mxu0  ;;  %v3376_v52 = vpack.c.bf16 %v5517_v14, %v5513_v33  ;;  %v8088_v14 = vld [vmem:[#allocation14_spill] sm:$0xff] }
 0x34c   : > { %v4698_v61 = vadd.f32 %v3013_v23, %v1955_v32  ;;  %v3015_v28 = vpop.f32.mrb[41].mxu0  ;;  %v3377_v63 = vpack.c.bf16 %v5519_v58, %v5515_v55  ;;  %v1981_v32 = vadd.f32 %v8088_v14, %v7331_v7 }
 0x34d   : > { %v4700_v8 = vadd.f32 %v3015_v28, %v1957_v29  ;;  %v3017_v38 = vpop.f32.mrb[42].mxu0 }
 0x34e   : > { %5528 = vtanh.f32 %v4698_v61  ;;  %v4702_v30 = vadd.f32 %v3017_v38, %v1959_v25  ;;  %v3019_v44 = vpop.f32.mrb[43].mxu0  ;;  %3655 = vmatprep.mubr.bf16.mxu1 %v3377_v63 }
 0x34f   : > { %5530 = vtanh.f32 %v4700_v8  ;;  %v4704_v0 = vadd.f32 %v3019_v44, %v1961_v62  ;;  %3656 = vmatmul.mubr.bf16.gmra.mrb[160].mxu1 %v3376_v52  ;;  %v8089_v62 = vld [vmem:[#allocation15_spill] sm:$0xff] }
 0x350   : > { %v5521_v53 = vpop.eup %5520  ;;  %5532 = vtanh.f32 %v4702_v30  ;;  %v1985_v8 = vadd.f32 %v8089_v62, %v7327_v17  ;;  %v8090_v30 = vld [vmem:[#allocation16_spill] sm:$0xff]  ;;  %v8099_v62 = vld [vmem:[#allocation25_spill] sm:$0xff] }
 0x351   : > { %v5523_v9 = vpop.eup %5522  ;;  %5534 = vtanh.f32 %v4704_v0  ;;  %v1987_v44 = vadd.f32 %v8090_v30, %v7331_v7 }
 0x352   : > { %v5525_v54 = vpop.eup %5524 }
 0x353   : > { %v5527_v31 = vpop.eup %5526  ;;  %v3023_v56 = vpop.f32.mrb[44].mxu0  ;;  %v3378_v43 = vpack.c.bf16 %v5525_v54, %v5521_v53 }
 0x354   : > { %v4706_v36 = vadd.f32 %v3023_v56, %v1965_v50  ;;  %v3025_v40 = vpop.f32.mrb[45].mxu0  ;;  %v3379_v45 = vpack.c.bf16 %v5527_v31, %v5523_v9  ;;  %v8091_v9 = vld [vmem:[#allocation17_spill] sm:$0xff]  ;;  %v8092_v56 = vld [vmem:[#allocation18_spill] sm:$0xff] }
 0x355   : > { %v4708_v41 = vadd.f32 %v3025_v40, %v1967_v57  ;;  %v3027_v60 = vpop.f32.mrb[46].mxu0  ;;  %v1989_v54 = vadd.f32 %v8091_v9, %v7327_v17 }
 0x356   : > { %5536 = vtanh.f32 %v4706_v36  ;;  %v4710_v16 = vadd.f32 %v3027_v60, %v1969_v3  ;;  %v3029_v27 = vpop.f32.mrb[47].mxu0  ;;  %3663 = vmatprep.mubr.bf16.mxu1 %v3379_v45  ;;  %v8093_v60 = vld [vmem:[#allocation19_spill] sm:$0xff] }
 0x357   : > { %5538 = vtanh.f32 %v4708_v41  ;;  %v4712_v49 = vadd.f32 %v3029_v27, %v1971_v10  ;;  %3664 = vmatmul.mubr.bf16.gmra.mrb[164].mxu1 %v3378_v43  ;;  %v1991_v43 = vadd.f32 %v8092_v56, %v7331_v7 }
 0x358   : > { %v5529_v12 = vpop.eup %5528  ;;  %5540 = vtanh.f32 %v4710_v16  ;;  %v1995_v16 = vadd.f32 %v8093_v60, %v7327_v17  ;;  %v8103_v60 = vld [vmem:[#allocation29_spill] sm:$0xff] }
 0x359   : > { %v5531_v1 = vpop.eup %5530  ;;  %5542 = vtanh.f32 %v4712_v49  ;;  %v8094_v49 = vld [vmem:[#allocation20_spill] sm:$0xff] }
 0x35a   : > { %v5533_v48 = vpop.eup %5532 }
 0x35b   : > { %v5535_v4 = vpop.eup %5534  ;;  %v3033_v35 = vpop.f32.mrb[48].mxu0  ;;  %v3380_v22 = vpack.c.bf16 %v5533_v48, %v5529_v12  ;;  %v1997_v12 = vadd.f32 %v8094_v49, %v7331_v7 }
 0x35c   : > { %v4714_v13 = vadd.f32 %v3033_v35, %v1975_v6  ;;  %v3035_v33 = vpop.f32.mrb[49].mxu0  ;;  %v3381_v55 = vpack.c.bf16 %v5535_v4, %v5531_v1  ;;  %v1999_v6 = vadd.f32 %v8095_v15, %v7327_v17  ;;  %v8096_v35 = vld [vmem:[#allocation22_spill] sm:$0xff] }
 0x35d   : > { %v4716_v58 = vadd.f32 %v3035_v33, %v1977_v21  ;;  %v3037_v29 = vpop.f32.mrb[50].mxu0 }
 0x35e   : > { %5544 = vtanh.f32 %v4714_v13  ;;  %v4718_v23 = vadd.f32 %v3037_v29, %v1979_v51  ;;  %v3039_v52 = vpop.f32.mrb[51].mxu0  ;;  %3671 = vmatprep.mubr.bf16.mxu1 %v3381_v55  ;;  %v8097_v29 = vld [vmem:[#allocation23_spill] sm:$0xff] }
 0x35f   : > { %5546 = vtanh.f32 %v4716_v58  ;;  %v4720_v25 = vadd.f32 %v3039_v52, %v1981_v32  ;;  %3672 = vmatmul.mubr.bf16.gmra.mrb[168].mxu1 %v3380_v22  ;;  %v2001_v22 = vadd.f32 %v8096_v35, %v7331_v7 }
 0x360   : > { %v5537_v61 = vpop.eup %5536  ;;  %5548 = vtanh.f32 %v4718_v23  ;;  %v2005_v23 = vadd.f32 %v8097_v29, %v7327_v17  ;;  %v8107_v29 = vld [vmem:[#allocation33_spill] sm:$0xff] }
 0x361   : > { %v5539_v28 = vpop.eup %5538  ;;  %5550 = vtanh.f32 %v4720_v25  ;;  %v8098_v25 = vld [vmem:[#allocation24_spill] sm:$0xff] }
 0x362   : > { %v5541_v63 = vpop.eup %5540 }
 0x363   : > { %v5543_v38 = vpop.eup %5542  ;;  %v3043_v0 = vpop.f32.mrb[52].mxu0  ;;  %v3382_v53 = vpack.c.bf16 %v5541_v63, %v5537_v61  ;;  %v2007_v61 = vadd.f32 %v8098_v25, %v7331_v7 }
 0x364   : > { %v4722_v50 = vadd.f32 %v3043_v0, %v1985_v8  ;;  %v3045_v31 = vpop.f32.mrb[53].mxu0  ;;  %v3383_v57 = vpack.c.bf16 %v5543_v38, %v5539_v28  ;;  %v2009_v8 = vadd.f32 %v8099_v62, %v7327_v17  ;;  %v8100_v0 = vld [vmem:[#allocation26_spill] sm:$0xff] }
 0x365   : > { %v4724_v59 = vadd.f32 %v3045_v31, %v1987_v44  ;;  %v3047_v3 = vpop.f32.mrb[54].mxu0 }
 0x366   : > { %5552 = vtanh.f32 %v4722_v50  ;;  %v4726_v36 = vadd.f32 %v3047_v3, %v1989_v54  ;;  %v3049_v40 = vpop.f32.mrb[55].mxu0  ;;  %3679 = vmatprep.mubr.bf16.mxu1 %v3383_v57  ;;  %v8101_v3 = vld [vmem:[#allocation27_spill] sm:$0xff] }
 0x367   : > { %5554 = vtanh.f32 %v4724_v59  ;;  %v4728_v45 = vadd.f32 %v3049_v40, %v1991_v43  ;;  %3680 = vmatmul.mubr.bf16.gmra.mrb[172].mxu1 %v3382_v53  ;;  %v2011_v53 = vadd.f32 %v8100_v0, %v7331_v7 }
 0x368   : > { %v5545_v37 = vpop.eup %5544  ;;  %5556 = vtanh.f32 %v4726_v36  ;;  %v4745_v36 = vadd.f32 %v8101_v3, %v7327_v17  ;;  %v8111_v3 = vld [vmem:[#allocation37_spill] sm:$0xff] }
 0x369   : > { %v5547_v10 = vpop.eup %5546  ;;  %5558 = vtanh.f32 %v4728_v45  ;;  %v8102_v45 = vld [vmem:[#allocation28_spill] sm:$0xff] }
 0x36a   : > { %v5549_v41 = vpop.eup %5548 }
 0x36b   : > { %v5551_v27 = vpop.eup %5550  ;;  %v3053_v1 = vpop.f32.mrb[56].mxu0  ;;  %v3384_v48 = vpack.c.bf16 %v5549_v41, %v5545_v37  ;;  %v4747_v37 = vadd.f32 %v8102_v45, %v7331_v7 }
 0x36c   : > { %v4730_v4 = vadd.f32 %v3053_v1, %v1995_v16  ;;  %v3055_v24 = vpop.f32.mrb[57].mxu0  ;;  %v3385_v21 = vpack.c.bf16 %v5551_v27, %v5547_v10  ;;  %v4749_v16 = vadd.f32 %v8103_v60, %v7327_v17  ;;  %v8104_v1 = vld [vmem:[#allocation30_spill] sm:$0xff] }
 0x36d   : > { %v4732_v18 = vadd.f32 %v3055_v24, %v1997_v12  ;;  %v3057_v51 = vpop.f32.mrb[58].mxu0 }
 0x36e   : > { %5560 = vtanh.f32 %v4730_v4  ;;  %v4734_v13 = vadd.f32 %v3057_v51, %v1999_v6  ;;  %v3059_v33 = vpop.f32.mrb[59].mxu0  ;;  %3687 = vmatprep.mubr.bf16.mxu1 %v3385_v21  ;;  %v8105_v51 = vld [vmem:[#allocation31_spill] sm:$0xff] }
 0x36f   : > { %5562 = vtanh.f32 %v4732_v18  ;;  %v4736_v55 = vadd.f32 %v3059_v33, %v2001_v22  ;;  %3688 = vmatmul.mubr.bf16.gmra.mrb[176].mxu1 %v3384_v48  ;;  %v4751_v48 = vadd.f32 %v8104_v1, %v7331_v7 }
 0x370   : > { %v5553_v14 = vpop.eup %5552  ;;  %5564 = vtanh.f32 %v4734_v13  ;;  %v4753_v13 = vadd.f32 %v8105_v51, %v7327_v17  ;;  %v8115_v51 = vld [vmem:[#allocation41_spill] sm:$0xff] }
 0x371   : > { %v5555_v32 = vpop.eup %5554  ;;  %5566 = vtanh.f32 %v4736_v55  ;;  %v8106_v55 = vld [vmem:[#allocation32_spill] sm:$0xff] }
 0x372   : > { %v5557_v58 = vpop.eup %5556 }
 0x373   : > { %v5559_v52 = vpop.eup %5558  ;;  %v3063_v28 = vpop.f32.mrb[60].mxu0  ;;  %v3386_v63 = vpack.c.bf16 %v5557_v58, %v5553_v14  ;;  %v4755_v14 = vadd.f32 %v8106_v55, %v7331_v7 }
 0x374   : > { %v4738_v38 = vadd.f32 %v3063_v28, %v2005_v23  ;;  %v3065_v30 = vpop.f32.mrb[61].mxu0  ;;  %v3387_v44 = vpack.c.bf16 %v5559_v52, %v5555_v32  ;;  %v4757_v23 = vadd.f32 %v8107_v29, %v7327_v17  ;;  %v8108_v28 = vld [vmem:[#allocation34_spill] sm:$0xff] }
 0x375   : > { %v4740_v9 = vadd.f32 %v3065_v30, %v2007_v61  ;;  %v3067_v54 = vpop.f32.mrb[62].mxu0 }
 0x376   : > { %5568 = vtanh.f32 %v4738_v38  ;;  %v4742_v50 = vadd.f32 %v3067_v54, %v2009_v8  ;;  %v3069_v31 = vpop.f32.mrb[63].mxu0  ;;  %3695 = vmatprep.mubr.bf16.mxu1 %v3387_v44  ;;  %v8109_v54 = vld [vmem:[#allocation35_spill] sm:$0xff] }
 0x377   : > { %5570 = vtanh.f32 %v4740_v9  ;;  %v4744_v57 = vadd.f32 %v3069_v31, %v2011_v53  ;;  %3696 = vmatmul.mubr.bf16.gmra.mrb[180].mxu1 %v3386_v63  ;;  %v4759_v63 = vadd.f32 %v8108_v28, %v7331_v7 }
 0x378   : > { %v5561_v56 = vpop.eup %5560  ;;  %5572 = vtanh.f32 %v4742_v50  ;;  %v4761_v50 = vadd.f32 %v8109_v54, %v7327_v17  ;;  %v8119_v54 = vld [vmem:[#allocation45_spill] sm:$0xff] }
 0x379   : > { %v5563_v43 = vpop.eup %5562  ;;  %5574 = vtanh.f32 %v4744_v57  ;;  %v8110_v57 = vld [vmem:[#allocation36_spill] sm:$0xff] }
 0x37a   : > { %v5565_v59 = vpop.eup %5564 }
 0x37b   : > { %v5567_v40 = vpop.eup %5566  ;;  %v3073_v10 = vpop.f32.mrb[64].mxu0  ;;  %v3388_v41 = vpack.c.bf16 %v5565_v59, %v5561_v56  ;;  %v4763_v56 = vadd.f32 %v8110_v57, %v7331_v7 }
 0x37c   : > { %v4746_v27 = vadd.f32 %v4745_v36, %v3073_v10  ;;  %v3075_v49 = vpop.f32.mrb[65].mxu0  ;;  %v3389_v12 = vpack.c.bf16 %v5567_v40, %v5563_v43  ;;  %v4765_v36 = vadd.f32 %v8111_v3, %v7327_v17  ;;  %v8112_v10 = vld [vmem:[#allocation38_spill] sm:$0xff] }
 0x37d   : > { %v4748_v15 = vadd.f32 %v4747_v37, %v3075_v49  ;;  %v3077_v6 = vpop.f32.mrb[66].mxu0 }
 0x37e   : > { %5576 = vtanh.f32 %v4746_v27  ;;  %v4750_v4 = vadd.f32 %v4749_v16, %v3077_v6  ;;  %v3079_v24 = vpop.f32.mrb[67].mxu0  ;;  %3703 = vmatprep.mubr.bf16.mxu1 %v3389_v12  ;;  %v8113_v6 = vld [vmem:[#allocation39_spill] sm:$0xff] }
 0x37f   : > { %5578 = vtanh.f32 %v4748_v15  ;;  %v4752_v21 = vadd.f32 %v4751_v48, %v3079_v24  ;;  %3704 = vmatmul.mubr.bf16.gmra.mrb[184].mxu1 %v3388_v41  ;;  %v4767_v41 = vadd.f32 %v8112_v10, %v7331_v7 }
 0x380   : > { %v5569_v35 = vpop.eup %5568  ;;  %5580 = vtanh.f32 %v4750_v4  ;;  %v4769_v4 = vadd.f32 %v8113_v6, %v7327_v17  ;;  %v8123_v6 = vld [vmem:[#allocation49_spill] sm:$0xff] }
 0x381   : > { %v5571_v22 = vpop.eup %5570  ;;  %5582 = vtanh.f32 %v4752_v21  ;;  %v8114_v21 = vld [vmem:[#allocation40_spill] sm:$0xff] }
 0x382   : > { %v5573_v18 = vpop.eup %5572 }
 0x383   : > { %v5575_v33 = vpop.eup %5574  ;;  %v3083_v32 = vpop.f32.mrb[68].mxu0  ;;  %v3390_v58 = vpack.c.bf16 %v5573_v18, %v5569_v35  ;;  %v4771_v35 = vadd.f32 %v8114_v21, %v7331_v7 }
 0x384   : > { %v4754_v52 = vadd.f32 %v4753_v13, %v3083_v32  ;;  %v3085_v25 = vpop.f32.mrb[69].mxu0  ;;  %v3391_v61 = vpack.c.bf16 %v5575_v33, %v5571_v22  ;;  %v4773_v13 = vadd.f32 %v8115_v51, %v7327_v17  ;;  %v8116_v32 = vld [vmem:[#allocation42_spill] sm:$0xff] }
 0x385   : > { %v4756_v62 = vadd.f32 %v4755_v14, %v3085_v25  ;;  %v3087_v8 = vpop.f32.mrb[70].mxu0 }
 0x386   : > { %5584 = vtanh.f32 %v4754_v52  ;;  %v4758_v38 = vadd.f32 %v4757_v23, %v3087_v8  ;;  %v3089_v30 = vpop.f32.mrb[71].mxu0  ;;  %3711 = vmatprep.mubr.bf16.mxu1 %v3391_v61  ;;  %v8117_v8 = vld [vmem:[#allocation43_spill] sm:$0xff] }
 0x387   : > { %5586 = vtanh.f32 %v4756_v62  ;;  %v4760_v44 = vadd.f32 %v4759_v63, %v3089_v30  ;;  %3712 = vmatmul.mubr.bf16.gmra.mrb[188].mxu1 %v3390_v58  ;;  %v4775_v58 = vadd.f32 %v8116_v32, %v7331_v7 }
 0x388   : > { %v5577_v0 = vpop.eup %5576  ;;  %5588 = vtanh.f32 %v4758_v38  ;;  %v4777_v38 = vadd.f32 %v8117_v8, %v7327_v17  ;;  %v8127_v8 = vld [vmem:[#allocation53_spill] sm:$0xff] }
 0x389   : > { %v5579_v53 = vpop.eup %5578  ;;  %5590 = vtanh.f32 %v4760_v44  ;;  %v8118_v44 = vld [vmem:[#allocation44_spill] sm:$0xff] }
 0x38a   : > { %v5581_v9 = vpop.eup %5580 }
 0x38b   : > { %v5583_v31 = vpop.eup %5582  ;;  %v3093_v43 = vpop.f32.mrb[72].mxu0  ;;  %v3392_v59 = vpack.c.bf16 %v5581_v9, %v5577_v0  ;;  %v4779_v0 = vadd.f32 %v8118_v44, %v7331_v7 }
 0x38c   : > { %v4762_v40 = vadd.f32 %v4761_v50, %v3093_v43  ;;  %v3095_v45 = vpop.f32.mrb[73].mxu0  ;;  %v3393_v37 = vpack.c.bf16 %v5583_v31, %v5579_v53  ;;  %v4781_v50 = vadd.f32 %v8119_v54, %v7327_v17  ;;  %v8120_v43 = vld [vmem:[#allocation46_spill] sm:$0xff] }
 0x38d   : > { %v4764_v60 = vadd.f32 %v4763_v56, %v3095_v45  ;;  %v3097_v16 = vpop.f32.mrb[74].mxu0 }
 0x38e   : > { %5592 = vtanh.f32 %v4762_v40  ;;  %v4766_v27 = vadd.f32 %v4765_v36, %v3097_v16  ;;  %v3099_v49 = vpop.f32.mrb[75].mxu0  ;;  %3719 = vmatprep.mubr.bf16.mxu1 %v3393_v37  ;;  %v8121_v16 = vld [vmem:[#allocation47_spill] sm:$0xff] }
 0x38f   : > { %5594 = vtanh.f32 %v4764_v60  ;;  %v4768_v12 = vadd.f32 %v4767_v41, %v3099_v49  ;;  %3720 = vmatmul.mubr.bf16.gmra.mrb[192].mxu1 %v3392_v59  ;;  %v4783_v59 = vadd.f32 %v8120_v43, %v7331_v7 }
 0x390   : > { %v5585_v1 = vpop.eup %5584  ;;  %5596 = vtanh.f32 %v4766_v27  ;;  %v4785_v27 = vadd.f32 %v8121_v16, %v7327_v17  ;;  %v8131_v16 = vld [vmem:[#allocation57_spill] sm:$0xff] }
 0x391   : > { %v5587_v48 = vpop.eup %5586  ;;  %5598 = vtanh.f32 %v4768_v12  ;;  %v8122_v12 = vld [vmem:[#allocation48_spill] sm:$0xff] }
 0x392   : > { %v5589_v15 = vpop.eup %5588 }
 0x393   : > { %v5591_v24 = vpop.eup %5590  ;;  %v3103_v22 = vpop.f32.mrb[76].mxu0  ;;  %v3394_v18 = vpack.c.bf16 %v5589_v15, %v5585_v1  ;;  %v4787_v1 = vadd.f32 %v8122_v12, %v7331_v7 }
 0x394   : > { %v4770_v33 = vadd.f32 %v4769_v4, %v3103_v22  ;;  %v3105_v55 = vpop.f32.mrb[77].mxu0  ;;  %v3395_v14 = vpack.c.bf16 %v5591_v24, %v5587_v48  ;;  %v4789_v4 = vadd.f32 %v8123_v6, %v7327_v17  ;;  %v8124_v22 = vld [vmem:[#allocation50_spill] sm:$0xff] }
 0x395   : > { %v4772_v29 = vadd.f32 %v4771_v35, %v3105_v55  ;;  %v3107_v23 = vpop.f32.mrb[78].mxu0 }
 0x396   : > { %5600 = vtanh.f32 %v4770_v33  ;;  %v4774_v52 = vadd.f32 %v4773_v13, %v3107_v23  ;;  %v3109_v25 = vpop.f32.mrb[79].mxu0  ;;  %3727 = vmatprep.mubr.bf16.mxu1 %v3395_v14  ;;  %v8125_v23 = vld [vmem:[#allocation51_spill] sm:$0xff] }
 0x397   : > { %5602 = vtanh.f32 %v4772_v29  ;;  %v4776_v61 = vadd.f32 %v4775_v58, %v3109_v25  ;;  %3728 = vmatmul.mubr.bf16.gmra.mrb[196].mxu1 %v3394_v18  ;;  %v4791_v18 = vadd.f32 %v8124_v22, %v7331_v7 }
 0x398   : > { %v5593_v28 = vpop.eup %5592  ;;  %5604 = vtanh.f32 %v4774_v52  ;;  %v4793_v52 = vadd.f32 %v8125_v23, %v7327_v17  ;;  %v8135_v23 = vld [vmem:[#allocation61_spill] sm:$0xff] }
 0x399   : > { %v5595_v63 = vpop.eup %5594  ;;  %5606 = vtanh.f32 %v4776_v61  ;;  %v8126_v61 = vld [vmem:[#allocation52_spill] sm:$0xff] }
 0x39a   : > { %v5597_v62 = vpop.eup %5596 }
 0x39b   : > { %v5599_v30 = vpop.eup %5598  ;;  %v3113_v53 = vpop.f32.mrb[80].mxu0  ;;  %v3396_v9 = vpack.c.bf16 %v5597_v62, %v5593_v28  ;;  %v4795_v28 = vadd.f32 %v8126_v61, %v7331_v7 }
 0x39c   : > { %v4778_v31 = vadd.f32 %v4777_v38, %v3113_v53  ;;  %v3115_v57 = vpop.f32.mrb[81].mxu0  ;;  %v3397_v56 = vpack.c.bf16 %v5599_v30, %v5595_v63  ;;  %v4797_v38 = vadd.f32 %v8127_v8, %v7327_v17  ;;  %v8128_v53 = vld [vmem:[#allocation54_spill] sm:$0xff] }
 0x39d   : > { %v4780_v3 = vadd.f32 %v4779_v0, %v3115_v57  ;;  %v3117_v36 = vpop.f32.mrb[82].mxu0 }
 0x39e   : > { %5608 = vtanh.f32 %v4778_v31  ;;  %v4782_v40 = vadd.f32 %v4781_v50, %v3117_v36  ;;  %v3119_v45 = vpop.f32.mrb[83].mxu0  ;;  %3735 = vmatprep.mubr.bf16.mxu1 %v3397_v56  ;;  %v8129_v36 = vld [vmem:[#allocation55_spill] sm:$0xff] }
 0x39f   : > { %5610 = vtanh.f32 %v4780_v3  ;;  %v4784_v37 = vadd.f32 %v4783_v59, %v3119_v45  ;;  %3736 = vmatmul.mubr.bf16.gmra.mrb[200].mxu1 %v3396_v9  ;;  %v4799_v9 = vadd.f32 %v8128_v53, %v7331_v7 }
 0x3a0   : > { %v5601_v10 = vpop.eup %5600  ;;  %5612 = vtanh.f32 %v4782_v40  ;;  %v4801_v40 = vadd.f32 %v8129_v36, %v7327_v17  ;;  %v8139_v36 = vld [vmem:[#allocation65_spill] sm:$0xff] }
 0x3a1   : > { %v5603_v41 = vpop.eup %5602  ;;  %5614 = vtanh.f32 %v4784_v37  ;;  %v8130_v37 = vld [vmem:[#allocation56_spill] sm:$0xff] }
 0x3a2   : > { %v5605_v60 = vpop.eup %5604 }
 0x3a3   : > { %v5607_v49 = vpop.eup %5606  ;;  %v3123_v48 = vpop.f32.mrb[84].mxu0  ;;  %v3398_v15 = vpack.c.bf16 %v5605_v60, %v5601_v10  ;;  %v4803_v10 = vadd.f32 %v8130_v37, %v7331_v7 }
 0x3a4   : > { %v4786_v24 = vadd.f32 %v4785_v27, %v3123_v48  ;;  %v3125_v21 = vpop.f32.mrb[85].mxu0  ;;  %v3399_v35 = vpack.c.bf16 %v5607_v49, %v5603_v41  ;;  %v4805_v27 = vadd.f32 %v8131_v16, %v7327_v17  ;;  %v8132_v48 = vld [vmem:[#allocation58_spill] sm:$0xff] }
 0x3a5   : > { %v4788_v51 = vadd.f32 %v4787_v1, %v3125_v21  ;;  %v3127_v13 = vpop.f32.mrb[86].mxu0 }
 0x3a6   : > { %5616 = vtanh.f32 %v4786_v24  ;;  %v4790_v33 = vadd.f32 %v4789_v4, %v3127_v13  ;;  %v3129_v55 = vpop.f32.mrb[87].mxu0  ;;  %3743 = vmatprep.mubr.bf16.mxu1 %v3399_v35  ;;  %v8133_v13 = vld [vmem:[#allocation59_spill] sm:$0xff] }
 0x3a7   : > { %5618 = vtanh.f32 %v4788_v51  ;;  %v4792_v14 = vadd.f32 %v4791_v18, %v3129_v55  ;;  %3744 = vmatmul.mubr.bf16.gmra.mrb[204].mxu1 %v3398_v15  ;;  %v4807_v15 = vadd.f32 %v8132_v48, %v7331_v7 }
 0x3a8   : > { %v5609_v32 = vpop.eup %5608  ;;  %5620 = vtanh.f32 %v4790_v33  ;;  %v4809_v33 = vadd.f32 %v8133_v13, %v7327_v17  ;;  %v8143_v13 = vld [vmem:[#allocation69_spill] sm:$0xff] }
 0x3a9   : > { %v5611_v58 = vpop.eup %5610  ;;  %5622 = vtanh.f32 %v4792_v14  ;;  %v8134_v14 = vld [vmem:[#allocation60_spill] sm:$0xff] }
 0x3aa   : > { %v5613_v29 = vpop.eup %5612 }
 0x3ab   : > { %v5615_v25 = vpop.eup %5614  ;;  %v3133_v63 = vpop.f32.mrb[88].mxu0  ;;  %v3400_v62 = vpack.c.bf16 %v5613_v29, %v5609_v32  ;;  %v4811_v32 = vadd.f32 %v8134_v14, %v7331_v7 }
 0x3ac   : > { %v4794_v30 = vadd.f32 %v4793_v52, %v3133_v63  ;;  %v3135_v44 = vpop.f32.mrb[89].mxu0  ;;  %v3401_v0 = vpack.c.bf16 %v5615_v25, %v5611_v58  ;;  %v4813_v52 = vadd.f32 %v8135_v23, %v7327_v17  ;;  %v8136_v63 = vld [vmem:[#allocation62_spill] sm:$0xff] }
 0x3ad   : > { %v4796_v54 = vadd.f32 %v4795_v28, %v3135_v44  ;;  %v3137_v50 = vpop.f32.mrb[90].mxu0 }
 0x3ae   : > { %5624 = vtanh.f32 %v4794_v30  ;;  %v4798_v31 = vadd.f32 %v4797_v38, %v3137_v50  ;;  %v3139_v57 = vpop.f32.mrb[91].mxu0  ;;  %3751 = vmatprep.mubr.bf16.mxu1 %v3401_v0  ;;  %v8137_v50 = vld [vmem:[#allocation63_spill] sm:$0xff] }
 0x3af   : > { %5626 = vtanh.f32 %v4796_v54  ;;  %v4800_v56 = vadd.f32 %v4799_v9, %v3139_v57  ;;  %3752 = vmatmul.mubr.bf16.gmra.mrb[208].mxu1 %v3400_v62  ;;  %v4815_v62 = vadd.f32 %v8136_v63, %v7331_v7 }
 0x3b0   : > { %v5617_v43 = vpop.eup %5616  ;;  %5628 = vtanh.f32 %v4798_v31  ;;  %v4817_v31 = vadd.f32 %v8137_v50, %v7327_v17  ;;  %v8147_v50 = vld [vmem:[#allocation73_spill] sm:$0xff] }
 0x3b1   : > { %v5619_v59 = vpop.eup %5618  ;;  %5630 = vtanh.f32 %v4800_v56  ;;  %v8138_v56 = vld [vmem:[#allocation64_spill] sm:$0xff] }
 0x3b2   : > { %v5621_v3 = vpop.eup %5620 }
 0x3b3   : > { %v5623_v45 = vpop.eup %5622  ;;  %v3143_v41 = vpop.f32.mrb[92].mxu0  ;;  %v3402_v60 = vpack.c.bf16 %v5621_v3, %v5617_v43  ;;  %v4819_v43 = vadd.f32 %v8138_v56, %v7331_v7 }
 0x3b4   : > { %v4802_v49 = vadd.f32 %v4801_v40, %v3143_v41  ;;  %v3145_v12 = vpop.f32.mrb[93].mxu0  ;;  %v3403_v1 = vpack.c.bf16 %v5623_v45, %v5619_v59  ;;  %v4821_v40 = vadd.f32 %v8139_v36, %v7327_v17  ;;  %v8140_v41 = vld [vmem:[#allocation66_spill] sm:$0xff] }
 0x3b5   : > { %v4804_v6 = vadd.f32 %v4803_v10, %v3145_v12  ;;  %v3147_v4 = vpop.f32.mrb[94].mxu0 }
 0x3b6   : > { %5632 = vtanh.f32 %v4802_v49  ;;  %v4806_v24 = vadd.f32 %v4805_v27, %v3147_v4  ;;  %v3149_v21 = vpop.f32.mrb[95].mxu0  ;;  %3759 = vmatprep.mubr.bf16.mxu1 %v3403_v1  ;;  %v8141_v4 = vld [vmem:[#allocation67_spill] sm:$0xff] }
 0x3b7   : > { %5634 = vtanh.f32 %v4804_v6  ;;  %v4808_v35 = vadd.f32 %v4807_v15, %v3149_v21  ;;  %3760 = vmatmul.mubr.bf16.gmra.mrb[212].mxu1 %v3402_v60  ;;  %v4823_v60 = vadd.f32 %v8140_v41, %v7331_v7 }
 0x3b8   : > { %v5625_v22 = vpop.eup %5624  ;;  %5636 = vtanh.f32 %v4806_v24  ;;  %v4825_v24 = vadd.f32 %v8141_v4, %v7327_v17 }
 0x3b9   : > { %v5627_v18 = vpop.eup %5626  ;;  %5638 = vtanh.f32 %v4808_v35  ;;  %v8142_v35 = vld [vmem:[#allocation68_spill] sm:$0xff] }
 0x3ba   : > { %v5629_v51 = vpop.eup %5628 }
 0x3bb   : > { %v5631_v55 = vpop.eup %5630  ;;  %v3153_v58 = vpop.f32.mrb[96].mxu0  ;;  %v3404_v29 = vpack.c.bf16 %v5629_v51, %v5625_v22  ;;  %v4827_v22 = vadd.f32 %v8142_v35, %v7331_v7 }
 0x3bc   : > { %v4810_v25 = vadd.f32 %v4809_v33, %v3153_v58  ;;  %v3155_v61 = vpop.f32.mrb[97].mxu0  ;;  %v3405_v28 = vpack.c.bf16 %v5631_v55, %v5627_v18  ;;  %v4829_v33 = vadd.f32 %v8143_v13, %v7327_v17  ;;  %v8144_v58 = vld [vmem:[#allocation70_spill] sm:$0xff] }
 0x3bd   : > { %v4812_v8 = vadd.f32 %v4811_v32, %v3155_v61  ;;  %v3157_v38 = vpop.f32.mrb[98].mxu0 }
 0x3be   : > { %5640 = vtanh.f32 %v4810_v25  ;;  %v4814_v30 = vadd.f32 %v4813_v52, %v3157_v38  ;;  %v3159_v44 = vpop.f32.mrb[99].mxu0  ;;  %3767 = vmatprep.mubr.bf16.mxu1 %v3405_v28  ;;  %v8145_v38 = vld [vmem:[#allocation71_spill] sm:$0xff] }
 0x3bf   : > { %5642 = vtanh.f32 %v4812_v8  ;;  %v4816_v0 = vadd.f32 %v4815_v62, %v3159_v44  ;;  %3768 = vmatmul.mubr.bf16.gmra.mrb[216].mxu1 %v3404_v29  ;;  %v4831_v29 = vadd.f32 %v8144_v58, %v7331_v7 }
 0x3c0   : > { %v5633_v53 = vpop.eup %5632  ;;  %5644 = vtanh.f32 %v4814_v30  ;;  %v4833_v30 = vadd.f32 %v8145_v38, %v7327_v17 }
 0x3c1   : > { %v5635_v9 = vpop.eup %5634  ;;  %5646 = vtanh.f32 %v4816_v0  ;;  %v8146_v0 = vld [vmem:[#allocation72_spill] sm:$0xff] }
 0x3c2   : > { %v5637_v54 = vpop.eup %5636 }
 0x3c3   : > { %v5639_v57 = vpop.eup %5638  ;;  %v3163_v59 = vpop.f32.mrb[100].mxu0  ;;  %v3406_v3 = vpack.c.bf16 %v5637_v54, %v5633_v53  ;;  %v4835_v53 = vadd.f32 %v8146_v0, %v7331_v7 }
 0x3c4   : > { %v4818_v45 = vadd.f32 %v4817_v31, %v3163_v59  ;;  %v3165_v37 = vpop.f32.mrb[101].mxu0  ;;  %v3407_v10 = vpack.c.bf16 %v5639_v57, %v5635_v9  ;;  %v4837_v31 = vadd.f32 %v8147_v50, %v7327_v17  ;;  %v8148_v59 = vld [vmem:[#allocation74_spill] sm:$0xff] }
 0x3c5   : > { %v4820_v16 = vadd.f32 %v4819_v43, %v3165_v37  ;;  %v3167_v27 = vpop.f32.mrb[102].mxu0 }
 0x3c6   : > { %5648 = vtanh.f32 %v4818_v45  ;;  %v4822_v49 = vadd.f32 %v4821_v40, %v3167_v27  ;;  %v3169_v12 = vpop.f32.mrb[103].mxu0  ;;  %3775 = vmatprep.mubr.bf16.mxu1 %v3407_v10  ;;  %v4841_v27 = vadd.f32 %v7351_v42, %v7327_v17 }
 0x3c7   : > { %5650 = vtanh.f32 %v4820_v16  ;;  %v4824_v1 = vadd.f32 %v4823_v60, %v3169_v12  ;;  %3776 = vmatmul.mubr.bf16.gmra.mrb[220].mxu1 %v3406_v3  ;;  %v4839_v3 = vadd.f32 %v8148_v59, %v7331_v7  ;;  %v4843_v12 = vadd.f32 %v7353_v20, %v7331_v7 }
 0x3c8   : > { %v5641_v48 = vpop.eup %5640  ;;  %5652 = vtanh.f32 %v4822_v49 }
 0x3c9   : > { %v5643_v15 = vpop.eup %5642  ;;  %5654 = vtanh.f32 %v4824_v1 }
 0x3ca   : > { %v5645_v6 = vpop.eup %5644 }
 0x3cb   : > { %v5647_v21 = vpop.eup %5646  ;;  %v3173_v18 = vpop.f32.mrb[104].mxu0  ;;  %v3408_v51 = vpack.c.bf16 %v5645_v6, %v5641_v48 }
 0x3cc   : > { %v4826_v55 = vadd.f32 %v4825_v24, %v3173_v18  ;;  %v3175_v14 = vpop.f32.mrb[105].mxu0  ;;  %v3409_v32 = vpack.c.bf16 %v5647_v21, %v5643_v15  ;;  %v4845_v15 = vadd.f32 %v7355_v46, %v7327_v17  ;;  %v8149_v21 = vld [vmem:[#allocation75_spill] sm:$0xff]  ;;  %v7625_v46 = vld [vmem:[%s7994_s4] ss:$0 sm:$0xff] }
 0x3cd   : > { %v4828_v23 = vadd.f32 %v4827_v22, %v3175_v14  ;;  %v3177_v52 = vpop.f32.mrb[106].mxu0  ;;  %v4847_v35 = vadd.f32 %v8149_v21, %v7331_v7  ;;  %v8150_v14 = vld [vmem:[#allocation76_spill] sm:$0xff] }
 0x3ce   : > { %5656 = vtanh.f32 %v4826_v55  ;;  %v4830_v25 = vadd.f32 %v4829_v33, %v3177_v52  ;;  %v3179_v61 = vpop.f32.mrb[107].mxu0  ;;  %3783 = vmatprep.mubr.bf16.mxu1 %v3409_v32  ;;  %v4849_v32 = vadd.f32 %v8150_v14, %v7327_v17 }
 0x3cf   : > { %5658 = vtanh.f32 %v4828_v23  ;;  %v4832_v28 = vadd.f32 %v4831_v29, %v3179_v61  ;;  %3784 = vmatmul.mubr.bf16.gmra.mrb[224].mxu1 %v3408_v51  ;;  %v8151_v23 = vld [vmem:[#allocation77_spill] sm:$0xff] }
 0x3d0   : > { %v5649_v63 = vpop.eup %5648  ;;  %5660 = vtanh.f32 %v4830_v25  ;;  %v4851_v52 = vadd.f32 %v8151_v23, %v7331_v7 }
 0x3d1   : > { %v5651_v62 = vpop.eup %5650  ;;  %5662 = vtanh.f32 %v4832_v28 }
 0x3d2   : > { %v5653_v8 = vpop.eup %5652 }
 0x3d3   : > { %v5655_v44 = vpop.eup %5654  ;;  %v3183_v9 = vpop.f32.mrb[108].mxu0  ;;  %v3410_v54 = vpack.c.bf16 %v5653_v8, %v5649_v63 }
 0x3d4   : > { %v4834_v57 = vadd.f32 %v4833_v30, %v3183_v9  ;;  %v3185_v56 = vpop.f32.mrb[109].mxu0  ;;  %v3411_v43 = vpack.c.bf16 %v5655_v44, %v5651_v62  ;;  %v8152_v62 = vld [vmem:[#allocation78_spill] sm:$0xff] }
 0x3d5   : > { %v4836_v36 = vadd.f32 %v4835_v53, %v3185_v56  ;;  %v3187_v40 = vpop.f32.mrb[110].mxu0  ;;  %v4853_v8 = vadd.f32 %v8152_v62, %v7327_v17  ;;  %v8153_v53 = vld [vmem:[#allocation79_spill] sm:$0xff] }
 0x3d6   : > { %5664 = vtanh.f32 %v4834_v57  ;;  %v4838_v45 = vadd.f32 %v4837_v31, %v3187_v40  ;;  %v3189_v37 = vpop.f32.mrb[111].mxu0  ;;  %3791 = vmatprep.mubr.bf16.mxu1 %v3411_v43  ;;  %v4855_v9 = vadd.f32 %v8153_v53, %v7331_v7 }
 0x3d7   : > { %5666 = vtanh.f32 %v4836_v36  ;;  %v4840_v10 = vadd.f32 %v4839_v3, %v3189_v37  ;;  %3792 = vmatmul.mubr.bf16.gmra.mrb[228].mxu1 %v3410_v54 }
 0x3d8   : > { %v5657_v41 = vpop.eup %5656  ;;  %5668 = vtanh.f32 %v4838_v45  ;;  %v4857_v45 = vadd.f32 %v7391_v26, %v7327_v17  ;;  %v4863_v26 = vadd.f32 %v7399_v47, %v7331_v7 }
 0x3d9   : > { %v5659_v60 = vpop.eup %5658  ;;  %5670 = vtanh.f32 %v4840_v10 }
 0x3da   : > { %v5661_v16 = vpop.eup %5660 }
 0x3db   : > { %v5663_v49 = vpop.eup %5662  ;;  %v3193_v1 = vpop.f32.mrb[112].mxu0  ;;  %v3412_v48 = vpack.c.bf16 %v5661_v16, %v5657_v41  ;;  %v4859_v41 = vadd.f32 %v7393_v34, %v7331_v7 }
 0x3dc   : > { %v4842_v6 = vadd.f32 %v4841_v27, %v3193_v1  ;;  %v3195_v4 = vpop.f32.mrb[113].mxu0  ;;  %v3413_v24 = vpack.c.bf16 %v5663_v49, %v5659_v60 }
 0x3dd   : > { %v4844_v22 = vadd.f32 %v4843_v12, %v3195_v4  ;;  %v3197_v18 = vpop.f32.mrb[114].mxu0  ;;  %v4861_v12 = vadd.f32 %v7395_v11, %v7327_v17 }
 0x3de   : > { %5672 = vtanh.f32 %v4842_v6  ;;  %v4846_v42 = vadd.f32 %v4845_v15, %v3197_v18  ;;  %v3199_v51 = vpop.f32.mrb[115].mxu0  ;;  %3799 = vmatprep.mubr.bf16.mxu1 %v3413_v24 }
 0x3df   : > { %5674 = vtanh.f32 %v4844_v22  ;;  %v4848_v20 = vadd.f32 %v4847_v35, %v3199_v51  ;;  %3800 = vmatmul.mubr.bf16.gmra.mrb[232].mxu1 %v3412_v48  ;;  %v4865_v51 = vadd.f32 %v7411_v5, %v7327_v17  ;;  %v4871_v5 = vadd.f32 %v7419_v2, %v7331_v7 }
 0x3e0   : > { %v5665_v13 = vpop.eup %5664  ;;  %5676 = vtanh.f32 %v4846_v42 }
 0x3e1   : > { %v5667_v33 = vpop.eup %5666  ;;  %5678 = vtanh.f32 %v4848_v20 }
 0x3e2   : > { %v5669_v55 = vpop.eup %5668  ;;  %v3593_v58 = vpop.f32.mrb[128].mxu1 }
 0x3e3   : > { %v5671_v29 = vpop.eup %5670  ;;  %v3594_v25 = vadd.f32 %v7625_v46, %v3593_v58  ;;  %v3203_v61 = vpop.f32.mrb[116].mxu0  ;;  %v3414_v63 = vpack.c.bf16 %v5669_v55, %v5665_v13 }
 0x3e4   : > { %v3595_v28 = vpop.f32.mrb[129].mxu1  ;;  %v4850_v38 = vadd.f32 %v4849_v32, %v3203_v61  ;;  %v3205_v30 = vpop.f32.mrb[117].mxu0  ;;  %v3415_v0 = vpack.c.bf16 %v5671_v29, %v5667_v33  ;;  %v4867_v33 = vadd.f32 %v7413_v39, %v7331_v7  ;;  %v4869_v29 = vadd.f32 %v7415_v19, %v7327_v17 }
 0x3e5   : > { %v3596_v44 = vpop.f32.mrb[130].mxu1  ;;  %3848 = vst [vmem:[%s7636_s13] sm:$0xff] %v3594_v25  ;;  %v4852_v54 = vadd.f32 %v4851_v52, %v3205_v30  ;;  %v3207_v31 = vpop.f32.mrb[118].mxu0 }
 0x3e6   : > { %v3597_v50 = vadd.f32 %v7625_v46, %v3596_v44  ;;  %v3598_v57 = vpop.f32.mrb[131].mxu1  ;;  %5680 = vtanh.f32 %v4850_v38  ;;  %v4854_v56 = vadd.f32 %v4853_v8, %v3207_v31  ;;  %v3209_v43 = vpop.f32.mrb[119].mxu0  ;;  %3807 = vmatprep.mubr.bf16.mxu1 %v3415_v0 }
 0x3e7   : > { %5682 = vtanh.f32 %v4852_v54  ;;  %v4856_v59 = vadd.f32 %v4855_v9, %v3209_v43  ;;  %3808 = vmatmul.mubr.bf16.gmra.mrb[236].mxu1 %v3414_v63 }
 0x3e8   : > { %3849 = vst [vmem:[%s7636_s13 + $0x8] sm:$0xff] %v3597_v50  ;;  %v5673_v3 = vpop.eup %5672  ;;  %5684 = vtanh.f32 %v4854_v56 }
 0x3e9   : > { %v5675_v36 = vpop.eup %5674  ;;  %5686 = vtanh.f32 %v4856_v59 }
 0x3ea   : > { %v5677_v40 = vpop.eup %5676  ;;  %v3601_v37 = vpop.f32.mrb[132].mxu1 }
 0x3eb   : > { %v5679_v10 = vpop.eup %5678  ;;  %v3602_v60 = vadd.f32 %v7625_v46, %v3601_v37  ;;  %v3213_v16 = vpop.f32.mrb[120].mxu0  ;;  %v3416_v49 = vpack.c.bf16 %v5677_v40, %v5673_v3 }
 0x3ec   : > { %v3603_v27 = vpop.f32.mrb[133].mxu1  ;;  %v4858_v1 = vadd.f32 %v4857_v45, %v3213_v16  ;;  %v3215_v48 = vpop.f32.mrb[121].mxu0  ;;  %v3417_v6 = vpack.c.bf16 %v5679_v10, %v5675_v36 }
 0x3ed   : > { %v3604_v15 = vpop.f32.mrb[134].mxu1  ;;  %3850 = vst [vmem:[%s7636_s13 + $0x10] sm:$0xff] %v3602_v60  ;;  %v4860_v4 = vadd.f32 %v4859_v41, %v3215_v48  ;;  %v3217_v24 = vpop.f32.mrb[122].mxu0 }
 0x3ee   : > { %v3605_v34 = vadd.f32 %v7625_v46, %v3604_v15  ;;  %v3606_v21 = vpop.f32.mrb[135].mxu1  ;;  %5688 = vtanh.f32 %v4858_v1  ;;  %v4862_v35 = vadd.f32 %v4861_v12, %v3217_v24  ;;  %v3219_v22 = vpop.f32.mrb[123].mxu0  ;;  %3815 = vmatprep.mubr.bf16.mxu1 %v3417_v6 }
 0x3ef   : > { %5690 = vtanh.f32 %v4860_v4  ;;  %v4864_v11 = vadd.f32 %v4863_v26, %v3219_v22  ;;  %3816 = vmatmul.mubr.bf16.gmra.mrb[240].mxu1 %v3416_v49 }
 0x3f0   : > { %3851 = vst [vmem:[%s7636_s13 + $0x18] sm:$0xff] %v3605_v34  ;;  %v5681_v18 = vpop.eup %5680  ;;  %5692 = vtanh.f32 %v4862_v35 }
 0x3f1   : > { %v5683_v42 = vpop.eup %5682  ;;  %5694 = vtanh.f32 %v4864_v11 }
 0x3f2   : > { %v5685_v47 = vpop.eup %5684  ;;  %v3609_v20 = vpop.f32.mrb[136].mxu1 }
 0x3f3   : > { %v5687_v13 = vpop.eup %5686  ;;  %v3610_v55 = vadd.f32 %v7625_v46, %v3609_v20  ;;  %v3223_v14 = vpop.f32.mrb[124].mxu0  ;;  %v3418_v58 = vpack.c.bf16 %v5685_v47, %v5681_v18 }
 0x3f4   : > { %v3611_v32 = vpop.f32.mrb[137].mxu1  ;;  %v4866_v23 = vadd.f32 %v4865_v51, %v3223_v14  ;;  %v3225_v52 = vpop.f32.mrb[125].mxu0  ;;  %v3419_v61 = vpack.c.bf16 %v5687_v13, %v5683_v42 }
 0x3f5   : > { %v3612_v25 = vpop.f32.mrb[138].mxu1  ;;  %3852 = vst [vmem:[%s7636_s13 + $0x20] sm:$0xff] %v3610_v55  ;;  %v4868_v28 = vadd.f32 %v4867_v33, %v3225_v52  ;;  %v3227_v63 = vpop.f32.mrb[126].mxu0 }
 0x3f6   : > { %v3613_v39 = vadd.f32 %v7625_v46, %v3612_v25  ;;  %v3614_v62 = vpop.f32.mrb[139].mxu1  ;;  %5696 = vtanh.f32 %v4866_v23  ;;  %v4870_v8 = vadd.f32 %v4869_v29, %v3227_v63  ;;  %v3229_v38 = vpop.f32.mrb[127].mxu0  ;;  %3823 = vmatprep.mubr.bf16.mxu1 %v3419_v61 }
 0x3f7   : > { %5698 = vtanh.f32 %v4868_v28  ;;  %v4872_v17 = vadd.f32 %v4871_v5, %v3229_v38  ;;  %3824 = vmatmul.mubr.bf16.gmra.mrb[244].mxu1 %v3418_v58 }
 0x3f8   : > { %3853 = vst [vmem:[%s7636_s13 + $0x28] sm:$0xff] %v3613_v39  ;;  %v5689_v19 = vpop.eup %5688  ;;  %5700 = vtanh.f32 %v4870_v8 }
 0x3f9   : > { %v5691_v30 = vpop.eup %5690  ;;  %5702 = vtanh.f32 %v4872_v17 }
 0x3fa   : > { %v5693_v7 = vpop.eup %5692  ;;  %v3617_v2 = vpop.f32.mrb[140].mxu1 }
 0x3fb   : > { %v5695_v44 = vpop.eup %5694  ;;  %v3618_v0 = vadd.f32 %v7625_v46, %v3617_v2  ;;  %v3619_v53 = vpop.f32.mrb[141].mxu1  ;;  %v3420_v9 = vpack.c.bf16 %v5693_v7, %v5689_v19 }
 0x3fc   : > { %v3620_v54 = vpop.f32.mrb[142].mxu1  ;;  %v3421_v50 = vpack.c.bf16 %v5695_v44, %v5691_v30 }
 0x3fd   : > { %3854 = vst [vmem:[%s7636_s13 + $0x30] sm:$0xff] %v3618_v0  ;;  %v3621_v31 = vadd.f32 %v7625_v46, %v3620_v54  ;;  %v3622_v57 = vpop.f32.mrb[143].mxu1 }
 0x3fe   : > { %3831 = vmatprep.mubr.bf16.mxu1 %v3421_v50 }
 0x3ff   : > { %3855 = vst [vmem:[%s7636_s13 + $0x38] sm:$0xff] %v3621_v31  ;;  %3832 = vmatmul.mubr.bf16.gmra.mrb[248].mxu1 %v3420_v9 }
 0x400   : > { %v5697_v56 = vpop.eup %5696 }
 0x401   : > { %v5699_v43 = vpop.eup %5698 }
 0x402   : > { %v5701_v59 = vpop.eup %5700  ;;  %v3625_v3 = vpop.f32.mrb[144].mxu1 }
 0x403   : > { %v5703_v36 = vpop.eup %5702  ;;  %v3626_v40 = vadd.f32 %v7625_v46, %v3625_v3  ;;  %v3627_v45 = vpop.f32.mrb[145].mxu1  ;;  %v3422_v37 = vpack.c.bf16 %v5701_v59, %v5697_v56 }
 0x404   : > { %v3628_v10 = vpop.f32.mrb[146].mxu1  ;;  %v3423_v41 = vpack.c.bf16 %v5703_v36, %v5699_v43 }
 0x405   : > { %3856 = vst [vmem:[%s7636_s13 + $0x40] sm:$0xff] %v3626_v40  ;;  %v3629_v60 = vadd.f32 %v7625_v46, %v3628_v10  ;;  %v3630_v16 = vpop.f32.mrb[147].mxu1 }
 0x406   : > { %3839 = vmatprep.mubr.bf16.mxu1 %v3423_v41 }
 0x407   : > { %3857 = vst [vmem:[%s7636_s13 + $0x48] sm:$0xff] %v3629_v60  ;;  %3840 = vmatmul.mubr.bf16.gmra.mrb[252].mxu1 %v3422_v37 }
 0x40a   : > { %v3633_v27 = vpop.f32.mrb[148].mxu1 }
 0x40b   : > { %v3634_v49 = vadd.f32 %v7625_v46, %v3633_v27  ;;  %v3635_v12 = vpop.f32.mrb[149].mxu1 }
 0x40c   : > { %v3636_v1 = vpop.f32.mrb[150].mxu1 }
 0x40d   : > { %3858 = vst [vmem:[%s7636_s13 + $0x50] sm:$0xff] %v3634_v49  ;;  %v3637_v48 = vadd.f32 %v7625_v46, %v3636_v1  ;;  %v3638_v15 = vpop.f32.mrb[151].mxu1 }
 0x40f   : > { %3859 = vst [vmem:[%s7636_s13 + $0x58] sm:$0xff] %v3637_v48 }
 0x412   : > { %v3641_v6 = vpop.f32.mrb[152].mxu1 }
 0x413   : > { %v3642_v26 = vadd.f32 %v7625_v46, %v3641_v6  ;;  %v3643_v4 = vpop.f32.mrb[153].mxu1 }
 0x414   : > { %v3644_v34 = vpop.f32.mrb[154].mxu1 }
 0x415   : > { %3860 = vst [vmem:[%s7636_s13 + $0x60] sm:$0xff] %v3642_v26  ;;  %v3645_v24 = vadd.f32 %v7625_v46, %v3644_v34  ;;  %v3646_v21 = vpop.f32.mrb[155].mxu1 }
 0x417   : > { %3861 = vst [vmem:[%s7636_s13 + $0x68] sm:$0xff] %v3645_v24 }
 0x41a   : > { %v3649_v35 = vpop.f32.mrb[156].mxu1 }
 0x41b   : > { %v3650_v22 = vadd.f32 %v7625_v46, %v3649_v35  ;;  %v3651_v11 = vpop.f32.mrb[157].mxu1 }
 0x41c   : > { %v3652_v18 = vpop.f32.mrb[158].mxu1 }
 0x41d   : > { %3862 = vst [vmem:[%s7636_s13 + $0x70] sm:$0xff] %v3650_v22  ;;  %v3653_v42 = vadd.f32 %v7625_v46, %v3652_v18  ;;  %v3654_v47 = vpop.f32.mrb[159].mxu1 }
 0x41f   : > { %3863 = vst [vmem:[%s7636_s13 + $0x78] sm:$0xff] %v3653_v42 }
 0x422   : > { %v3657_v51 = vpop.f32.mrb[160].mxu1 }
 0x423   : > { %v3658_v20 = vadd.f32 %v7625_v46, %v3657_v51  ;;  %v3659_v13 = vpop.f32.mrb[161].mxu1 }
 0x424   : > { %v3660_v33 = vpop.f32.mrb[162].mxu1 }
 0x425   : > { %3864 = vst [vmem:[%s7636_s13 + $0x80] sm:$0xff] %v3658_v20  ;;  %v3661_v55 = vadd.f32 %v7625_v46, %v3660_v33  ;;  %v3662_v14 = vpop.f32.mrb[163].mxu1 }
 0x427   : > { %3865 = vst [vmem:[%s7636_s13 + $0x88] sm:$0xff] %v3661_v55 }
 0x42a   : > { %v3665_v32 = vpop.f32.mrb[164].mxu1 }
 0x42b   : > { %v3666_v58 = vadd.f32 %v7625_v46, %v3665_v32  ;;  %v3667_v29 = vpop.f32.mrb[165].mxu1 }
 0x42c   : > { %v3668_v23 = vpop.f32.mrb[166].mxu1 }
 0x42d   : > { %3866 = vst [vmem:[%s7636_s13 + $0x90] sm:$0xff] %v3666_v58  ;;  %v3669_v52 = vadd.f32 %v7625_v46, %v3668_v23  ;;  %v3670_v25 = vpop.f32.mrb[167].mxu1 }
 0x42f   : > { %3867 = vst [vmem:[%s7636_s13 + $0x98] sm:$0xff] %v3669_v52 }
 0x432   : > { %v3673_v61 = vpop.f32.mrb[168].mxu1 }
 0x433   : > { %v3674_v5 = vadd.f32 %v7625_v46, %v3673_v61  ;;  %v3675_v28 = vpop.f32.mrb[169].mxu1 }
 0x434   : > { %v3676_v39 = vpop.f32.mrb[170].mxu1 }
 0x435   : > { %3868 = vst [vmem:[%s7636_s13 + $0xa0] sm:$0xff] %v3674_v5  ;;  %v3677_v63 = vadd.f32 %v7625_v46, %v3676_v39  ;;  %v3678_v62 = vpop.f32.mrb[171].mxu1 }
 0x437   : > { %3869 = vst [vmem:[%s7636_s13 + $0xa8] sm:$0xff] %v3677_v63 }
 0x43a   : > { %v3681_v8 = vpop.f32.mrb[172].mxu1 }
 0x43b   : > { %v3682_v38 = vadd.f32 %v7625_v46, %v3681_v8  ;;  %v3683_v17 = vpop.f32.mrb[173].mxu1 }
 0x43c   : > { %v3684_v19 = vpop.f32.mrb[174].mxu1 }
 0x43d   : > { %3870 = vst [vmem:[%s7636_s13 + $0xb0] sm:$0xff] %v3682_v38  ;;  %v3685_v30 = vadd.f32 %v7625_v46, %v3684_v19  ;;  %v3686_v7 = vpop.f32.mrb[175].mxu1 }
 0x43f   : > { %3871 = vst [vmem:[%s7636_s13 + $0xb8] sm:$0xff] %v3685_v30 }
 0x442   : > { %v3689_v2 = vpop.f32.mrb[176].mxu1 }
 0x443   : > { %v3690_v44 = vadd.f32 %v7625_v46, %v3689_v2  ;;  %v3691_v0 = vpop.f32.mrb[177].mxu1 }
 0x444   : > { %v3692_v53 = vpop.f32.mrb[178].mxu1 }
 0x445   : > { %3872 = vst [vmem:[%s7636_s13 + $0xc0] sm:$0xff] %v3690_v44  ;;  %v3693_v9 = vadd.f32 %v7625_v46, %v3692_v53  ;;  %v3694_v54 = vpop.f32.mrb[179].mxu1 }
 0x447   : > { %3873 = vst [vmem:[%s7636_s13 + $0xc8] sm:$0xff] %v3693_v9 }
 0x44a   : > { %v3697_v50 = vpop.f32.mrb[180].mxu1 }
 0x44b   : > { %v3698_v31 = vadd.f32 %v7625_v46, %v3697_v50  ;;  %v3699_v57 = vpop.f32.mrb[181].mxu1 }
 0x44c   : > { %v3700_v56 = vpop.f32.mrb[182].mxu1 }
 0x44d   : > { %3874 = vst [vmem:[%s7636_s13 + $0xd0] sm:$0xff] %v3698_v31  ;;  %v3701_v43 = vadd.f32 %v7625_v46, %v3700_v56  ;;  %v3702_v59 = vpop.f32.mrb[183].mxu1 }
 0x44f   : > { %3875 = vst [vmem:[%s7636_s13 + $0xd8] sm:$0xff] %v3701_v43 }
 0x452   : > { %v3705_v3 = vpop.f32.mrb[184].mxu1 }
 0x453   : > { %v3706_v36 = vadd.f32 %v7625_v46, %v3705_v3  ;;  %v3707_v40 = vpop.f32.mrb[185].mxu1 }
 0x454   : > { %v3708_v45 = vpop.f32.mrb[186].mxu1 }
 0x455   : > { %3876 = vst [vmem:[%s7636_s13 + $0xe0] sm:$0xff] %v3706_v36  ;;  %v3709_v37 = vadd.f32 %v7625_v46, %v3708_v45  ;;  %v3710_v10 = vpop.f32.mrb[187].mxu1 }
 0x457   : > { %3877 = vst [vmem:[%s7636_s13 + $0xe8] sm:$0xff] %v3709_v37 }
 0x45a   : > { %v3713_v41 = vpop.f32.mrb[188].mxu1 }
 0x45b   : > { %v3714_v60 = vadd.f32 %v7625_v46, %v3713_v41  ;;  %v3715_v16 = vpop.f32.mrb[189].mxu1 }
 0x45c   : > { %v3716_v27 = vpop.f32.mrb[190].mxu1 }
 0x45d   : > { %3878 = vst [vmem:[%s7636_s13 + $0xf0] sm:$0xff] %v3714_v60  ;;  %v3717_v49 = vadd.f32 %v7625_v46, %v3716_v27  ;;  %v3718_v12 = vpop.f32.mrb[191].mxu1 }
 0x45f   : > { %3879 = vst [vmem:[%s7636_s13 + $0xf8] sm:$0xff] %v3717_v49 }
 0x462   : > { %v3721_v1 = vpop.f32.mrb[192].mxu1 }
 0x463   : > { %v3722_v48 = vadd.f32 %v7625_v46, %v3721_v1  ;;  %v3723_v15 = vpop.f32.mrb[193].mxu1 }
 0x464   : > { %v3724_v6 = vpop.f32.mrb[194].mxu1 }
 0x465   : > { %3880 = vst [vmem:[%s7636_s13 + $0x100] sm:$0xff] %v3722_v48  ;;  %v3725_v26 = vadd.f32 %v7625_v46, %v3724_v6  ;;  %v3726_v4 = vpop.f32.mrb[195].mxu1 }
 0x467   : > { %3881 = vst [vmem:[%s7636_s13 + $0x108] sm:$0xff] %v3725_v26 }
 0x46a   : > { %v3729_v34 = vpop.f32.mrb[196].mxu1 }
 0x46b   : > { %v3730_v24 = vadd.f32 %v7625_v46, %v3729_v34  ;;  %v3731_v21 = vpop.f32.mrb[197].mxu1 }
 0x46c   : > { %v3732_v35 = vpop.f32.mrb[198].mxu1 }
 0x46d   : > { %3882 = vst [vmem:[%s7636_s13 + $0x110] sm:$0xff] %v3730_v24  ;;  %v3733_v22 = vadd.f32 %v7625_v46, %v3732_v35  ;;  %v3734_v11 = vpop.f32.mrb[199].mxu1 }
 0x46f   : > { %3883 = vst [vmem:[%s7636_s13 + $0x118] sm:$0xff] %v3733_v22 }
 0x472   : > { %v3737_v18 = vpop.f32.mrb[200].mxu1 }
 0x473   : > { %v3738_v42 = vadd.f32 %v7625_v46, %v3737_v18  ;;  %v3739_v47 = vpop.f32.mrb[201].mxu1 }
 0x474   : > { %v3740_v51 = vpop.f32.mrb[202].mxu1 }
 0x475   : > { %3884 = vst [vmem:[%s7636_s13 + $0x120] sm:$0xff] %v3738_v42  ;;  %v3741_v20 = vadd.f32 %v7625_v46, %v3740_v51  ;;  %v3742_v13 = vpop.f32.mrb[203].mxu1 }
 0x477   : > { %3885 = vst [vmem:[%s7636_s13 + $0x128] sm:$0xff] %v3741_v20 }
 0x47a   : > { %v3745_v33 = vpop.f32.mrb[204].mxu1 }
 0x47b   : > { %v3746_v55 = vadd.f32 %v7625_v46, %v3745_v33  ;;  %v3747_v14 = vpop.f32.mrb[205].mxu1 }
 0x47c   : > { %v3748_v32 = vpop.f32.mrb[206].mxu1 }
 0x47d   : > { %3886 = vst [vmem:[%s7636_s13 + $0x130] sm:$0xff] %v3746_v55  ;;  %v3749_v58 = vadd.f32 %v7625_v46, %v3748_v32  ;;  %v3750_v29 = vpop.f32.mrb[207].mxu1 }
 0x47f   : > { %3887 = vst [vmem:[%s7636_s13 + $0x138] sm:$0xff] %v3749_v58 }
 0x482   : > { %v3753_v23 = vpop.f32.mrb[208].mxu1 }
 0x483   : > { %v3754_v52 = vadd.f32 %v7625_v46, %v3753_v23  ;;  %v3755_v25 = vpop.f32.mrb[209].mxu1 }
 0x484   : > { %v3756_v61 = vpop.f32.mrb[210].mxu1 }
 0x485   : > { %3888 = vst [vmem:[%s7636_s13 + $0x140] sm:$0xff] %v3754_v52  ;;  %v3757_v5 = vadd.f32 %v7625_v46, %v3756_v61  ;;  %v3758_v28 = vpop.f32.mrb[211].mxu1 }
 0x487   : > { %3889 = vst [vmem:[%s7636_s13 + $0x148] sm:$0xff] %v3757_v5 }
 0x48a   : > { %v3761_v39 = vpop.f32.mrb[212].mxu1 }
 0x48b   : > { %v3762_v63 = vadd.f32 %v7625_v46, %v3761_v39  ;;  %v3763_v62 = vpop.f32.mrb[213].mxu1 }
 0x48c   : > { %v3764_v8 = vpop.f32.mrb[214].mxu1 }
 0x48d   : > { %3890 = vst [vmem:[%s7636_s13 + $0x150] sm:$0xff] %v3762_v63  ;;  %v3765_v38 = vadd.f32 %v7625_v46, %v3764_v8  ;;  %v3766_v17 = vpop.f32.mrb[215].mxu1 }
 0x48f   : > { %3891 = vst [vmem:[%s7636_s13 + $0x158] sm:$0xff] %v3765_v38 }
 0x492   : > { %v3769_v19 = vpop.f32.mrb[216].mxu1 }
 0x493   : > { %v3770_v30 = vadd.f32 %v7625_v46, %v3769_v19  ;;  %v3771_v7 = vpop.f32.mrb[217].mxu1 }
 0x494   : > { %v3772_v2 = vpop.f32.mrb[218].mxu1 }
 0x495   : > { %3892 = vst [vmem:[%s7636_s13 + $0x160] sm:$0xff] %v3770_v30  ;;  %v3773_v44 = vadd.f32 %v7625_v46, %v3772_v2  ;;  %v3774_v0 = vpop.f32.mrb[219].mxu1 }
 0x497   : > { %3893 = vst [vmem:[%s7636_s13 + $0x168] sm:$0xff] %v3773_v44 }
 0x49a   : > { %v3777_v53 = vpop.f32.mrb[220].mxu1 }
 0x49b   : > { %v3778_v9 = vadd.f32 %v7625_v46, %v3777_v53  ;;  %v3779_v54 = vpop.f32.mrb[221].mxu1 }
 0x49c   : > { %v3780_v50 = vpop.f32.mrb[222].mxu1 }
 0x49d   : > { %3894 = vst [vmem:[%s7636_s13 + $0x170] sm:$0xff] %v3778_v9  ;;  %v3781_v31 = vadd.f32 %v7625_v46, %v3780_v50  ;;  %v3782_v57 = vpop.f32.mrb[223].mxu1 }
 0x49f   : > { %3895 = vst [vmem:[%s7636_s13 + $0x178] sm:$0xff] %v3781_v31 }
 0x4a2   : > { %v3785_v56 = vpop.f32.mrb[224].mxu1 }
 0x4a3   : > { %v3786_v43 = vadd.f32 %v7625_v46, %v3785_v56  ;;  %v3787_v59 = vpop.f32.mrb[225].mxu1 }
 0x4a4   : > { %v3788_v3 = vpop.f32.mrb[226].mxu1 }
 0x4a5   : > { %3896 = vst [vmem:[%s7636_s13 + $0x180] sm:$0xff] %v3786_v43  ;;  %v3789_v36 = vadd.f32 %v7625_v46, %v3788_v3  ;;  %v3790_v40 = vpop.f32.mrb[227].mxu1 }
 0x4a7   : > { %3897 = vst [vmem:[%s7636_s13 + $0x188] sm:$0xff] %v3789_v36 }
 0x4aa   : > { %v3793_v45 = vpop.f32.mrb[228].mxu1 }
 0x4ab   : > { %v3794_v37 = vadd.f32 %v7625_v46, %v3793_v45  ;;  %v3795_v10 = vpop.f32.mrb[229].mxu1 }
 0x4ac   : > { %v3796_v41 = vpop.f32.mrb[230].mxu1 }
 0x4ad   : > { %3898 = vst [vmem:[%s7636_s13 + $0x190] sm:$0xff] %v3794_v37  ;;  %v3797_v60 = vadd.f32 %v7625_v46, %v3796_v41  ;;  %v3798_v16 = vpop.f32.mrb[231].mxu1 }
 0x4af   : > { %3899 = vst [vmem:[%s7636_s13 + $0x198] sm:$0xff] %v3797_v60 }
 0x4b2   : > { %v3801_v27 = vpop.f32.mrb[232].mxu1 }
 0x4b3   : > { %v3802_v49 = vadd.f32 %v7625_v46, %v3801_v27  ;;  %v3803_v12 = vpop.f32.mrb[233].mxu1 }
 0x4b4   : > { %v3804_v1 = vpop.f32.mrb[234].mxu1 }
 0x4b5   : > { %3900 = vst [vmem:[%s7636_s13 + $0x1a0] sm:$0xff] %v3802_v49  ;;  %v3805_v48 = vadd.f32 %v7625_v46, %v3804_v1  ;;  %v3806_v15 = vpop.f32.mrb[235].mxu1 }
 0x4b7   : > { %3901 = vst [vmem:[%s7636_s13 + $0x1a8] sm:$0xff] %v3805_v48 }
 0x4ba   : > { %v3809_v6 = vpop.f32.mrb[236].mxu1 }
 0x4bb   : > { %v3810_v26 = vadd.f32 %v7625_v46, %v3809_v6  ;;  %v3811_v4 = vpop.f32.mrb[237].mxu1 }
 0x4bc   : > { %v3812_v34 = vpop.f32.mrb[238].mxu1 }
 0x4bd   : > { %3902 = vst [vmem:[%s7636_s13 + $0x1b0] sm:$0xff] %v3810_v26  ;;  %v3813_v24 = vadd.f32 %v7625_v46, %v3812_v34  ;;  %v3814_v21 = vpop.f32.mrb[239].mxu1 }
 0x4bf   : > { %3903 = vst [vmem:[%s7636_s13 + $0x1b8] sm:$0xff] %v3813_v24 }
 0x4c2   : > { %v3817_v35 = vpop.f32.mrb[240].mxu1 }
 0x4c3   : > { %v3818_v22 = vadd.f32 %v7625_v46, %v3817_v35  ;;  %v3819_v11 = vpop.f32.mrb[241].mxu1 }
 0x4c4   : > { %v3820_v18 = vpop.f32.mrb[242].mxu1 }
 0x4c5   : > { %3904 = vst [vmem:[%s7636_s13 + $0x1c0] sm:$0xff] %v3818_v22  ;;  %v3821_v42 = vadd.f32 %v7625_v46, %v3820_v18  ;;  %v3822_v47 = vpop.f32.mrb[243].mxu1 }
 0x4c7   : > { %3905 = vst [vmem:[%s7636_s13 + $0x1c8] sm:$0xff] %v3821_v42 }
 0x4ca   : > { %v3825_v51 = vpop.f32.mrb[244].mxu1 }
 0x4cb   : > { %v3826_v20 = vadd.f32 %v7625_v46, %v3825_v51  ;;  %v3827_v13 = vpop.f32.mrb[245].mxu1 }
 0x4cc   : > { %v3828_v33 = vpop.f32.mrb[246].mxu1 }
 0x4cd   : > { %3906 = vst [vmem:[%s7636_s13 + $0x1d0] sm:$0xff] %v3826_v20  ;;  %v3829_v55 = vadd.f32 %v7625_v46, %v3828_v33  ;;  %v3830_v14 = vpop.f32.mrb[247].mxu1 }
 0x4cf   : > { %3907 = vst [vmem:[%s7636_s13 + $0x1d8] sm:$0xff] %v3829_v55 }
 0x4d2   : > { %v3833_v32 = vpop.f32.mrb[248].mxu1 }
 0x4d3   : > { %v3834_v58 = vadd.f32 %v7625_v46, %v3833_v32  ;;  %v3835_v29 = vpop.f32.mrb[249].mxu1 }
 0x4d4   : > { %v3836_v23 = vpop.f32.mrb[250].mxu1 }
 0x4d5   : > { %3908 = vst [vmem:[%s7636_s13 + $0x1e0] sm:$0xff] %v3834_v58  ;;  %v3837_v52 = vadd.f32 %v7625_v46, %v3836_v23  ;;  %v3838_v25 = vpop.f32.mrb[251].mxu1 }
 0x4d7   : > { %3909 = vst [vmem:[%s7636_s13 + $0x1e8] sm:$0xff] %v3837_v52 }
 0x4d9   : > { %3918 = sbr.rel (!%p8154_p6) target bundleno = 1320 (0x528), region = 52 }
 0x4da   : > { %v3841_v61 = vpop.f32.mrb[252].mxu1 }
 0x4db   : > { %v3842_v5 = vadd.f32 %v7625_v46, %v3841_v61  ;;  %v3843_v28 = vpop.f32.mrb[253].mxu1 }
 0x4dc   : > { %v3844_v39 = vpop.f32.mrb[254].mxu1 }
 0x4dd   : > { %3910 = vst [vmem:[%s7636_s13 + $0x1f0] sm:$0xff] %v3842_v5  ;;  %v3845_v63 = vadd.f32 %v7625_v46, %v3844_v39  ;;  %v3846_v62 = vpop.f32.mrb[255].mxu1 }
 0x4df   : > { %3911 = vst [vmem:[%s7636_s13 + $0x1f8] sm:$0xff] %v3845_v63 }
 0x4e0   : > { %s8167_s14 = smov (!%p3921_p7, %s3920_s14), 64 }
 0x4e1   : > { %s4564_s24 = sshll.u32 %s8167_s14, 7 }
 0x4e2   : > { %p4567_p9 = scmp.eq.s32.totalorder %s4564_s24, 0 }
 0x4e3   : > { %s7794_s29 = sshrl.u32 (!%p4567_p9), %s8167_s14, 6 }
 0x4e4   : > { %3929 = sbr.rel (%p4567_p9) target bundleno = 1320 (0x528), region = 56  ;;  %p4568_p12 = scmp.le.s32.totalorder (!%p4567_p9), %s7794_s29, 0 }
 0x4eb   : > { %4344 = sbr.rel (%p4568_p12) target bundleno = 1299 (0x513), region = 138  ;;  %s8155_s22 = smov (!%p4568_p12), %s7788_s21 }
 0x4ec   : > { %s8156_s25 = smov (!%p4568_p12), %s7636_s13  ;;  %s7803_s6 = smov (!%p4568_p12), 0  }
 0x4ed   : > { %s7805_s9 = smov (!%p4568_p12), 0  }
 0x4f2 LB: >> { %v4117_v46 = vld [vmem:[%s5838_s25] sm:$0xff]  ;;  %v4119_v8 = vld [vmem:[%s5838_s25 + $0x8] sm:$0xff]  ;;  %v4121_v38 = vld [vmem:[%s5838_s25 + $0x10] sm:$0xff]  ;;  %s4245_s8 = sadd.s32 1, %s5842_s6  ;;  %s4111_s9 = sadd.s32 1, %s5846_s9   ;;  %s5846_s9 = sphi %s7805_s9, %s4111_s9   ;;  %s5842_s6 = sphi %s7803_s6, %s8159_s6   ;;  %s5838_s25 = sphi %s8156_s25, %s8158_s25   ;;  %s5834_s22 = sphi %s8155_s22, %s8157_s22  }
 0x4f3   : >> { %4118 = vst [vmem:[%s5834_s22] sm:$0xff] %v4117_v46  ;;  %4120 = vst [vmem:[%s5834_s22 + $0x8] sm:$0xff] %v4119_v8  ;;  %v4123_v17 = vld [vmem:[%s5838_s25 + $0x18] sm:$0xff]  ;;  %v4125_v19 = vld [vmem:[%s5838_s25 + $0x20] sm:$0xff]  ;;  %p4246_p0 = scmp.ge.s32.totalorder %s4245_s8, %s7794_s29  ;;  %p4110_p2 = scmp.ge.s32.totalorder %s4111_s9, %s7794_s29 }
 0x4f4   : >> { %4122 = vst [vmem:[%s5834_s22 + $0x10] sm:$0xff] %v4121_v38  ;;  %v4127_v30 = vld [vmem:[%s5838_s25 + $0x28] sm:$0xff]  ;;  %4124 = vst [vmem:[%s5834_s22 + $0x18] sm:$0xff] %v4123_v17  ;;  %v4129_v7 = vld [vmem:[%s5838_s25 + $0x30] sm:$0xff] }
 0x4f5   : >> { %4126 = vst [vmem:[%s5834_s22 + $0x20] sm:$0xff] %v4125_v19  ;;  %4128 = vst [vmem:[%s5834_s22 + $0x28] sm:$0xff] %v4127_v30  ;;  %v4131_v2 = vld [vmem:[%s5838_s25 + $0x38] sm:$0xff]  ;;  %v4133_v44 = vld [vmem:[%s5838_s25 + $0x40] sm:$0xff]  ;;  %s8169_s8 = smov (%p4246_p0, %s4245_s8), 0 }
 0x4f6   : >> { %4130 = vst [vmem:[%s5834_s22 + $0x30] sm:$0xff] %v4129_v7  ;;  %4132 = vst [vmem:[%s5834_s22 + $0x38] sm:$0xff] %v4131_v2  ;;  %v4135_v0 = vld [vmem:[%s5838_s25 + $0x48] sm:$0xff]  ;;  %v4137_v53 = vld [vmem:[%s5838_s25 + $0x50] sm:$0xff]  ;;  %s4569_s7 = sshll.u32 %s8169_s8, 9  ;;  %s8159_s6 = smov %s8169_s8 }
 0x4f7   : >> { %4134 = vst [vmem:[%s5834_s22 + $0x40] sm:$0xff] %v4133_v44  ;;  %v4139_v9 = vld [vmem:[%s5838_s25 + $0x58] sm:$0xff]  ;;  %4136 = vst [vmem:[%s5834_s22 + $0x48] sm:$0xff] %v4135_v0  ;;  %v4141_v54 = vld [vmem:[%s5838_s25 + $0x60] sm:$0xff]  ;;  %s7861_s27 = scalar_lea.vmem %s7636_s13, %s4569_s7 [#allocation6]   ;;  %s7864_s12 = scalar_lea.vmem %s7788_s21, %s4569_s7  }
 0x4f8   : >> { %4138 = vst [vmem:[%s5834_s22 + $0x50] sm:$0xff] %v4137_v53  ;;  %4140 = vst [vmem:[%s5834_s22 + $0x58] sm:$0xff] %v4139_v9  ;;  %v4143_v50 = vld [vmem:[%s5838_s25 + $0x68] sm:$0xff]  ;;  %v4145_v31 = vld [vmem:[%s5838_s25 + $0x70] sm:$0xff] }
 0x4f9   : >> { %4142 = vst [vmem:[%s5834_s22 + $0x60] sm:$0xff] %v4141_v54  ;;  %4144 = vst [vmem:[%s5834_s22 + $0x68] sm:$0xff] %v4143_v50  ;;  %v4147_v57 = vld [vmem:[%s5838_s25 + $0x78] sm:$0xff]  ;;  %v4149_v56 = vld [vmem:[%s5838_s25 + $0x80] sm:$0xff] }
 0x4fa   : >> { %4146 = vst [vmem:[%s5834_s22 + $0x70] sm:$0xff] %v4145_v31  ;;  %v4151_v43 = vld [vmem:[%s5838_s25 + $0x88] sm:$0xff]  ;;  %4148 = vst [vmem:[%s5834_s22 + $0x78] sm:$0xff] %v4147_v57  ;;  %v4153_v59 = vld [vmem:[%s5838_s25 + $0x90] sm:$0xff] }
 0x4fb   : >> { %4150 = vst [vmem:[%s5834_s22 + $0x80] sm:$0xff] %v4149_v56  ;;  %4152 = vst [vmem:[%s5834_s22 + $0x88] sm:$0xff] %v4151_v43  ;;  %v4155_v3 = vld [vmem:[%s5838_s25 + $0x98] sm:$0xff]  ;;  %v4157_v36 = vld [vmem:[%s5838_s25 + $0xa0] sm:$0xff] }
 0x4fc   : >> { %4154 = vst [vmem:[%s5834_s22 + $0x90] sm:$0xff] %v4153_v59  ;;  %4156 = vst [vmem:[%s5834_s22 + $0x98] sm:$0xff] %v4155_v3  ;;  %v4159_v40 = vld [vmem:[%s5838_s25 + $0xa8] sm:$0xff]  ;;  %v4161_v45 = vld [vmem:[%s5838_s25 + $0xb0] sm:$0xff] }
 0x4fd   : >> { %4158 = vst [vmem:[%s5834_s22 + $0xa0] sm:$0xff] %v4157_v36  ;;  %v4163_v37 = vld [vmem:[%s5838_s25 + $0xb8] sm:$0xff]  ;;  %4160 = vst [vmem:[%s5834_s22 + $0xa8] sm:$0xff] %v4159_v40  ;;  %v4165_v10 = vld [vmem:[%s5838_s25 + $0xc0] sm:$0xff] }
 0x4fe   : >> { %4162 = vst [vmem:[%s5834_s22 + $0xb0] sm:$0xff] %v4161_v45  ;;  %4164 = vst [vmem:[%s5834_s22 + $0xb8] sm:$0xff] %v4163_v37  ;;  %v4167_v41 = vld [vmem:[%s5838_s25 + $0xc8] sm:$0xff]  ;;  %v4169_v60 = vld [vmem:[%s5838_s25 + $0xd0] sm:$0xff] }
 0x4ff   : >> { %4166 = vst [vmem:[%s5834_s22 + $0xc0] sm:$0xff] %v4165_v10  ;;  %4168 = vst [vmem:[%s5834_s22 + $0xc8] sm:$0xff] %v4167_v41  ;;  %v4171_v16 = vld [vmem:[%s5838_s25 + $0xd8] sm:$0xff]  ;;  %v4173_v27 = vld [vmem:[%s5838_s25 + $0xe0] sm:$0xff] }
 0x500   : >> { %4170 = vst [vmem:[%s5834_s22 + $0xd0] sm:$0xff] %v4169_v60  ;;  %v4175_v49 = vld [vmem:[%s5838_s25 + $0xe8] sm:$0xff]  ;;  %4172 = vst [vmem:[%s5834_s22 + $0xd8] sm:$0xff] %v4171_v16  ;;  %v4177_v12 = vld [vmem:[%s5838_s25 + $0xf0] sm:$0xff] }
 0x501   : >> { %4174 = vst [vmem:[%s5834_s22 + $0xe0] sm:$0xff] %v4173_v27  ;;  %4176 = vst [vmem:[%s5834_s22 + $0xe8] sm:$0xff] %v4175_v49  ;;  %v4179_v1 = vld [vmem:[%s5838_s25 + $0xf8] sm:$0xff]  ;;  %v4181_v48 = vld [vmem:[%s5838_s25 + $0x100] sm:$0xff] }
 0x502   : >> { %4178 = vst [vmem:[%s5834_s22 + $0xf0] sm:$0xff] %v4177_v12  ;;  %4180 = vst [vmem:[%s5834_s22 + $0xf8] sm:$0xff] %v4179_v1  ;;  %v4183_v15 = vld [vmem:[%s5838_s25 + $0x108] sm:$0xff]  ;;  %v4185_v6 = vld [vmem:[%s5838_s25 + $0x110] sm:$0xff] }
 0x503   : >> { %4182 = vst [vmem:[%s5834_s22 + $0x100] sm:$0xff] %v4181_v48  ;;  %v4187_v26 = vld [vmem:[%s5838_s25 + $0x118] sm:$0xff]  ;;  %4184 = vst [vmem:[%s5834_s22 + $0x108] sm:$0xff] %v4183_v15  ;;  %v4189_v4 = vld [vmem:[%s5838_s25 + $0x120] sm:$0xff] }
 0x504   : >> { %4186 = vst [vmem:[%s5834_s22 + $0x110] sm:$0xff] %v4185_v6  ;;  %4188 = vst [vmem:[%s5834_s22 + $0x118] sm:$0xff] %v4187_v26  ;;  %v4191_v34 = vld [vmem:[%s5838_s25 + $0x128] sm:$0xff]  ;;  %v4193_v24 = vld [vmem:[%s5838_s25 + $0x130] sm:$0xff] }
 0x505   : >> { %4190 = vst [vmem:[%s5834_s22 + $0x120] sm:$0xff] %v4189_v4  ;;  %4192 = vst [vmem:[%s5834_s22 + $0x128] sm:$0xff] %v4191_v34  ;;  %v4195_v21 = vld [vmem:[%s5838_s25 + $0x138] sm:$0xff]  ;;  %v4197_v35 = vld [vmem:[%s5838_s25 + $0x140] sm:$0xff] }
 0x506   : >> { %4194 = vst [vmem:[%s5834_s22 + $0x130] sm:$0xff] %v4193_v24  ;;  %v4199_v22 = vld [vmem:[%s5838_s25 + $0x148] sm:$0xff]  ;;  %4196 = vst [vmem:[%s5834_s22 + $0x138] sm:$0xff] %v4195_v21  ;;  %v4201_v11 = vld [vmem:[%s5838_s25 + $0x150] sm:$0xff] }
 0x507   : >> { %4198 = vst [vmem:[%s5834_s22 + $0x140] sm:$0xff] %v4197_v35  ;;  %4200 = vst [vmem:[%s5834_s22 + $0x148] sm:$0xff] %v4199_v22  ;;  %v4203_v18 = vld [vmem:[%s5838_s25 + $0x158] sm:$0xff]  ;;  %v4205_v42 = vld [vmem:[%s5838_s25 + $0x160] sm:$0xff] }
 0x508   : >> { %4202 = vst [vmem:[%s5834_s22 + $0x150] sm:$0xff] %v4201_v11  ;;  %4204 = vst [vmem:[%s5834_s22 + $0x158] sm:$0xff] %v4203_v18  ;;  %v4207_v47 = vld [vmem:[%s5838_s25 + $0x168] sm:$0xff]  ;;  %v4209_v51 = vld [vmem:[%s5838_s25 + $0x170] sm:$0xff] }
 0x509   : >> { %4206 = vst [vmem:[%s5834_s22 + $0x160] sm:$0xff] %v4205_v42  ;;  %v4211_v20 = vld [vmem:[%s5838_s25 + $0x178] sm:$0xff]  ;;  %4208 = vst [vmem:[%s5834_s22 + $0x168] sm:$0xff] %v4207_v47  ;;  %v4213_v13 = vld [vmem:[%s5838_s25 + $0x180] sm:$0xff] }
 0x50a   : >> { %4210 = vst [vmem:[%s5834_s22 + $0x170] sm:$0xff] %v4209_v51  ;;  %4212 = vst [vmem:[%s5834_s22 + $0x178] sm:$0xff] %v4211_v20  ;;  %v4215_v33 = vld [vmem:[%s5838_s25 + $0x188] sm:$0xff]  ;;  %v4217_v55 = vld [vmem:[%s5838_s25 + $0x190] sm:$0xff] }
 0x50b   : >> { %4214 = vst [vmem:[%s5834_s22 + $0x180] sm:$0xff] %v4213_v13  ;;  %4216 = vst [vmem:[%s5834_s22 + $0x188] sm:$0xff] %v4215_v33  ;;  %v4219_v14 = vld [vmem:[%s5838_s25 + $0x198] sm:$0xff]  ;;  %v4221_v32 = vld [vmem:[%s5838_s25 + $0x1a0] sm:$0xff] }
 0x50c   : >> { %4218 = vst [vmem:[%s5834_s22 + $0x190] sm:$0xff] %v4217_v55  ;;  %v4223_v58 = vld [vmem:[%s5838_s25 + $0x1a8] sm:$0xff]  ;;  %4220 = vst [vmem:[%s5834_s22 + $0x198] sm:$0xff] %v4219_v14  ;;  %v4225_v29 = vld [vmem:[%s5838_s25 + $0x1b0] sm:$0xff]  ;;  %4113 = sbr.rel (!%p4110_p2) target bundleno = 1266 (0x4f2), region = 144 }
 0x50d   : >> { %4222 = vst [vmem:[%s5834_s22 + $0x1a0] sm:$0xff] %v4221_v32  ;;  %4224 = vst [vmem:[%s5834_s22 + $0x1a8] sm:$0xff] %v4223_v58  ;;  %v4227_v23 = vld [vmem:[%s5838_s25 + $0x1b8] sm:$0xff]  ;;  %v4229_v52 = vld [vmem:[%s5838_s25 + $0x1c0] sm:$0xff] }
 0x50e   : >> { %4226 = vst [vmem:[%s5834_s22 + $0x1b0] sm:$0xff] %v4225_v29  ;;  %4228 = vst [vmem:[%s5834_s22 + $0x1b8] sm:$0xff] %v4227_v23  ;;  %v4231_v25 = vld [vmem:[%s5838_s25 + $0x1c8] sm:$0xff]  ;;  %v4233_v61 = vld [vmem:[%s5838_s25 + $0x1d0] sm:$0xff] }
 0x50f   : >> { %4230 = vst [vmem:[%s5834_s22 + $0x1c0] sm:$0xff] %v4229_v52  ;;  %v4235_v5 = vld [vmem:[%s5838_s25 + $0x1d8] sm:$0xff]  ;;  %4232 = vst [vmem:[%s5834_s22 + $0x1c8] sm:$0xff] %v4231_v25  ;;  %v4237_v28 = vld [vmem:[%s5838_s25 + $0x1e0] sm:$0xff] }
 0x510   : >> { %4234 = vst [vmem:[%s5834_s22 + $0x1d0] sm:$0xff] %v4233_v61  ;;  %4236 = vst [vmem:[%s5834_s22 + $0x1d8] sm:$0xff] %v4235_v5  ;;  %v4239_v39 = vld [vmem:[%s5838_s25 + $0x1e8] sm:$0xff]  ;;  %v4241_v63 = vld [vmem:[%s5838_s25 + $0x1f0] sm:$0xff] }
 0x511   : >> { %4238 = vst [vmem:[%s5834_s22 + $0x1e0] sm:$0xff] %v4237_v28  ;;  %4240 = vst [vmem:[%s5834_s22 + $0x1e8] sm:$0xff] %v4239_v39  ;;  %v4243_v62 = vld [vmem:[%s5838_s25 + $0x1f8] sm:$0xff]  ;;  %s8158_s25 = smov %s7861_s27 }
 0x512   : >> { %4242 = vst [vmem:[%s5834_s22 + $0x1f0] sm:$0xff] %v4241_v63  ;;  %4244 = vst [vmem:[%s5834_s22 + $0x1f8] sm:$0xff] %v4243_v62  ;;  %s8157_s22 = smov %s7864_s12 }
 0x513 PF: > { %s7969_s16 = sand.u32 63, %s8167_s14   ;;  %s4583_s18 = sshll.u32 %s7794_s29, 9 }
 0x514   : > { %s4256_s17 = scalar_lea.vmem %s7636_s13, %s4583_s18 [#allocation6]   ;;  %s4258_s30 = scalar_lea.vmem %s7788_s21, %s4583_s18  }
 0x515   : > { %p4574_p5 = scmp.le.s32.totalorder %s7969_s16, 0 }
 0x516   : > { %s5848_s10 = smov (!%p4574_p5), %s4258_s30   ;;  %s5852_s11 = smov (!%p4574_p5), %s4256_s17  }
 0x517   : > { %4358 = sbr.rel (%p4574_p5) target bundleno = 1320 (0x528), region = 149  ;;  %s5856_s28 = smov (!%p4574_p5), 0  }
 0x518   : > { %s5860_s15 = smov (!%p4574_p5), 0  }
 0x51e LB: >> { %v4268_v46 = vld [vmem:[%s5854_s11] sm:$0xff]  ;;  %s4270_s14 = sadd.s32 1, %s5858_s28  ;;  %s4262_s15 = sadd.s32 1, %s5862_s15   ;;  %s5862_s15 = sphi %s5860_s15, %s4262_s15   ;;  %s5858_s28 = sphi %s5856_s28, %s5857_s28   ;;  %s5854_s11 = sphi %s5852_s11, %s4275_s11   ;;  %s5850_s10 = sphi %s5848_s10, %s4276_s10  }
 0x51f   : >> { %4269 = vst [vmem:[%s5850_s10] sm:$0xff] %v4268_v46  ;;  %p4271_p8 = scmp.ge.s32.totalorder %s4270_s14, %s7969_s16  ;;  %p4261_p10 = scmp.ge.s32.totalorder %s4262_s15, %s7969_s16 }
 0x521   : >> { %s8171_s14 = smov (%p4271_p8, %s4270_s14), 0  ;;  %4264 = sbr.rel (!%p4261_p10) target bundleno = 1310 (0x51e), region = 155 }
 0x522   : >> { %s4575_s13 = sshll.u32 %s8171_s14, 3  ;;  %s5857_s28 = smov %s8171_s14  }
 0x523   : >> { %s4275_s11 = scalar_lea.vmem %s4256_s17, %s4575_s13 [#allocation6]   ;;  %s4276_s10 = scalar_lea.vmem %s4258_s30, %s4575_s13  }
 0x528 PF: > { %p16_p13 = scmp.ge.s32.totalorder %s5921_s23, 4   ;;  %s8160_s18 = smov %s5822_s19 }
 0x529   : > { %s8161_s19 = smov %s5826_s20  ;;  %s8162_s20 = smov %s5931_s26 }
 0x52a   : > { %s8163_s21 = smov %s5921_s23  ;;  %18 = sbr.rel (!%p16_p13) target bundleno = 4 (0x4), region = 166 }
 0x531   :  { %4292 = vsyncpa [#allocation3], 1 }
 0x532   :  { %4294 = vsyncpa [#allocation3 + $0x1], 1 }
 0x533   :  { %4295 = vsyncpa [#allocation5], 1 }

</bundles_post_ra>
